<compile_context>
chip_gen: v7x
topology: tpu7x:2x2x1
jax: 0.10.0
libtpu: 0.0.40
codegen_flags: <defaults>
</compile_context>

<pallas_src>
import functools

import jax
import jax.numpy as jnp
import numpy as np
from jax.experimental import pallas as pl
from jax.experimental.pallas import tpu as pltpu

LANES = 128                        # TPU lane width; channel dims padded to this
_RESIDENT_MAX_NODES = 1024         # keep bf16 L fully VMEM-resident up to this many padded nodes
_TPREV_RESIDENT_BYTES = 4 * 1024 * 1024   # keep full T_{k-1} resident if it fits this budget


# ----------------------------------------------------------------------------- helpers
def _round_up(x, m):
    return ((x + m - 1) // m) * m


def _pick_tile(n):
    # largest MXU/roofline-friendly tile that divides the padded node count
    for t in (512, 256, 128):
        if n % t == 0:
            return t
    return 128


def _pad2d(a, rows, cols):
    a = jnp.asarray(a, jnp.float32)
    return jnp.pad(a, ((0, rows - a.shape[0]), (0, cols - a.shape[1])))


def _stack_weights(w):
    """(K, c_in, c_out) -> (K*LANES, LANES) zero-padded, stacked along the contraction dim."""
    w = jnp.asarray(w, jnp.float32)
    k, cin, cout = w.shape
    out = jnp.zeros((k * LANES, LANES), jnp.float32)
    for i in range(k):
        out = out.at[i * LANES:i * LANES + cin, :cout].set(w[i])
    return out


def _pad_bias(b, cout):
    b = jnp.asarray(b, jnp.float32).reshape(-1)
    return jnp.zeros((1, LANES), jnp.float32).at[0, :cout].set(b)


# ------------------------------------------------------- tiled path: Chebyshev propagation
def _cheb_propagate_kernel(l_ref, tp_ref, tpp_ref, o_ref, acc_ref, *, scale, tk, tp_resident):
    """One row-tile of  T_new = scale * (L @ T_prev) - T_prevprev, reducing over L columns."""
    c = pl.program_id(1)

    @pl.when(c == 0)
    def _():
        acc_ref[...] = jnp.zeros_like(acc_ref)

    if tp_resident:
        start = pl.multiple_of(c * tk, tk)
        t_blk = tp_ref[pl.ds(start, tk), :]          # slice of the VMEM-resident T_prev
    else:
        t_blk = tp_ref[...]                          # column block streamed per step
    acc_ref[...] += jnp.dot(l_ref[...], t_blk, preferred_element_type=jnp.float32)

    @pl.when(c == pl.num_programs(1) - 1)
    def _():
        o_ref[...] = scale * acc_ref[...] - tpp_ref[...]


def _cheb_propagate(l_bf16, t_prev_bf16, t_pp_f32, scale, tile):
    n = l_bf16.shape[0]
    grid = (n // tile, n // tile)
    tp_resident = (n * LANES * 2) <= _TPREV_RESIDENT_BYTES
    if tp_resident:
        # full T_prev stays in VMEM for the whole grid (index map never changes)
        tp_spec = pl.BlockSpec((n, LANES), lambda i, j: (0, 0))
    else:
        tp_spec = pl.BlockSpec((tile, LANES), lambda i, j: (j, 0))
    cost = pl.CostEstimate(
        flops=2 * n * n * LANES + 2 * n * LANES,
        transcendentals=0,
        bytes_accessed=n * n * 2 + n * LANES * (2 + 4 + 4))
    return pl.pallas_call(
        functools.partial(_cheb_propagate_kernel, scale=scale, tk=tile, tp_resident=tp_resident),
        out_shape=jax.ShapeDtypeStruct((n, LANES), jnp.float32),
        grid=grid,
        in_specs=[pl.BlockSpec((tile, tile), lambda i, j: (i, j)),    # L: streamed bf16 tiles
                  tp_spec,                                            # T_{k-1} (bf16)
                  pl.BlockSpec((tile, LANES), lambda i, j: (i, 0))],  # T_{k-2} row slab (f32)
        out_specs=pl.BlockSpec((tile, LANES), lambda i, j: (i, 0)),
        scratch_shapes=[pltpu.VMEM((tile, LANES), jnp.float32)],
        compiler_params=pltpu.CompilerParams(
            dimension_semantics=("parallel", "arbitrary")),
        cost_estimate=cost,
    )(l_bf16, t_prev_bf16, t_pp_f32)


# ------------------------------------------------------- tiled path: fused stacked-weight epilogue
def _fused_linear_kernel(b_ref, w_ref, bias_ref, o_ref, *, leaky):
    y = jnp.dot(b_ref[...], w_ref[...], preferred_element_type=jnp.float32) + bias_ref[...]
    if leaky:
        y = jnp.where(y > 0, y, 0.01 * y)       # torch default negative_slope = 0.01
    o_ref[...] = y.astype(o_ref.dtype)


def _fused_linear(basis, w, bias, tile, *, leaky):
    n, win = basis.shape
    cout = w.shape[1]
    cost = pl.CostEstimate(flops=2 * n * win * cout, transcendentals=0,
                           bytes_accessed=n * win * 4 + win * cout * 4 + n * cout * 4)
    return pl.pallas_call(
        functools.partial(_fused_linear_kernel, leaky=leaky),
        out_shape=jax.ShapeDtypeStruct((n, cout), jnp.float32),
        grid=(n // tile,),
        in_specs=[pl.BlockSpec((tile, win), lambda i: (i, 0)),   # Chebyshev basis row tile
                  pl.BlockSpec((win, cout), lambda i: (0, 0)),   # stacked weight, VMEM-resident
                  pl.BlockSpec((1, cout), lambda i: (0, 0))],    # padded bias
        out_specs=pl.BlockSpec((tile, cout), lambda i: (i, 0)),
        compiler_params=pltpu.CompilerParams(dimension_semantics=("parallel",)),
        cost_estimate=cost,
    )(basis, w, bias)


def _resconv_tiled(l_bf16, x_pad, w1s, b1p, w2p, b2p, *, K):
    n = x_pad.shape[0]
    tile = _pick_tile(n)

    def cheb_basis(feat_f32):
        ts = [feat_f32]
        if K > 1:
            ts.append(_cheb_propagate(l_bf16, feat_f32.astype(jnp.bfloat16),
                                      jnp.zeros_like(feat_f32), 1.0, tile))
            for _ in range(2, K):
                ts.append(_cheb_propagate(l_bf16, ts[-1].astype(jnp.bfloat16),
                                          ts[-2], 2.0, tile))
        return ts

    basis1 = jnp.concatenate(cheb_basis(x_pad), axis=1)          # (N, K*128)
    h = _fused_linear(basis1, w1s, b1p, tile, leaky=True)        # conv1 + leaky_relu
    basis2 = jnp.concatenate(cheb_basis(h) + [x_pad], axis=1)    # (N, (K+1)*128), shortcut folded
    return _fused_linear(basis2, w2p, b2p, tile, leaky=False)    # conv2 + shortcut + biases


# ------------------------------------------------------- resident path (L fits in VMEM)
def _resident_kernel(l_ref, x_ref, w1_ref, b1_ref, w2_ref, b2_ref, o_ref, *, K):
    l = l_ref[...]            # bf16 (N, N), loaded once, reused for all 2(K-1) recurrences
    x = x_ref[...]            # f32  (N, 128)

    def cheb(feat, w_ref):
        t0 = feat
        acc = jnp.dot(t0, w_ref[0:LANES, :], preferred_element_type=jnp.float32)
        if K > 1:
            t1 = jnp.dot(l, t0.astype(jnp.bfloat16), preferred_element_type=jnp.float32)
            acc = acc + jnp.dot(t1, w_ref[LANES:2 * LANES, :], preferred_element_type=jnp.float32)
            tm2, tm1 = t0, t1
            for k in range(2, K):
                tk = 2.0 * jnp.dot(l, tm1.astype(jnp.bfloat16),
                                   preferred_element_type=jnp.float32) - tm2
                acc = acc + jnp.dot(tk, w_ref[k * LANES:(k + 1) * LANES, :],
                                    preferred_element_type=jnp.float32)
                tm2, tm1 = tm1, tk
        return acc

    h = cheb(x, w1_ref) + b1_ref[...]
    h = jnp.where(h > 0, h, 0.01 * h)                       # leaky_relu

    out = cheb(h, w2_ref)                                   # conv2 (first K weight blocks)
    out = out + jnp.dot(x, w2_ref[K * LANES:(K + 1) * LANES, :],
                        preferred_element_type=jnp.float32)  # folded K=1 shortcut
    o_ref[...] = (out + b2_ref[...]).astype(o_ref.dtype)     # b2 already includes shortcut bias


def _resconv_resident(l_bf16, x_pad, w1s, b1p, w2p, b2p, *, K):
    n = x_pad.shape[0]
    vmem = pl.BlockSpec(memory_space=pltpu.MemorySpace.VMEM)
    cost = pl.CostEstimate(
        flops=2 * (2 * max(K - 1, 0)) * n * n * LANES + 2 * n * (2 * K + 1) * LANES * LANES,
        transcendentals=0,
        bytes_accessed=n * n * 2 + n * LANES * 8 + (2 * K + 1) * LANES * LANES * 4)
    return pl.pallas_call(
        functools.partial(_resident_kernel, K=K),
        out_shape=jax.ShapeDtypeStruct((n, LANES), jnp.float32),
        in_specs=[vmem] * 6,
        out_specs=vmem,
        compiler_params=pltpu.CompilerParams(vmem_limit_bytes=32 * 1024 * 1024),
        cost_estimate=cost,
    )(l_bf16, x_pad, w1s, b1p, w2p, b2p)


# ------------------------------------------------------- public forward
def resconv_forward(L_hat, x, w_short, b_short, w1, b1, w2, b2, *, K=None, use_resident=None):
    x = jnp.asarray(x, jnp.float32)
    w1 = jnp.asarray(w1, jnp.float32)
    n, c_in = x.shape
    k = w1.shape[0] if K is None else K
    c_out = w1.shape[-1]
    n_pad = _round_up(max(n, LANES), LANES)

    l_bf16 = _pad2d(L_hat, n_pad, n_pad).astype(jnp.bfloat16)   # bf16 L: half the HBM traffic
    x_pad = _pad2d(x, n_pad, LANES)                             # lane-dense features

    w1s = _stack_weights(jnp.reshape(w1, (k, c_in, c_out)))
    w2s = _stack_weights(jnp.reshape(jnp.asarray(w2, jnp.float32), (k, c_out, c_out)))
    wss = _stack_weights(jnp.reshape(jnp.asarray(w_short, jnp.float32), (1, c_in, c_out)))
    w2p = jnp.concatenate([w2s, wss], axis=0)                   # fold shortcut into conv2 matmul
    b1p = _pad_bias(b1, c_out)
    b2p = _pad_bias(b2, c_out) + _pad_bias(b_short, c_out)      # fold shortcut bias

    if use_resident is None:
        use_resident = n_pad <= _RESIDENT_MAX_NODES             # trace-time gate on graph size
    if use_resident:
        out_pad = _resconv_resident(l_bf16, x_pad, w1s, b1p, w2p, b2p, K=k)
    else:
        out_pad = _resconv_tiled(l_bf16, x_pad, w1s, b1p, w2p, b2p, K=k)
    return out_pad[:n, :c_out]


# ------------------------------------------------------- graph glue + pure-JAX reference
def build_scaled_laplacian(edge_index, num_nodes, edge_weight=None, lambda_max=2.0):
    """Dense L_hat = 2*(I - D^-1/2 A D^-1/2)/lambda_max - I  (PyG ChebConv 'sym' norm)."""
    src, dst = edge_index
    if edge_weight is None:
        edge_weight = jnp.ones(src.shape[0], jnp.float32)
    a = jnp.zeros((num_nodes, num_nodes), jnp.float32).at[src, dst].add(edge_weight)
    deg = a.sum(axis=1)
    dinv = jnp.where(deg > 0, 1.0 / jnp.sqrt(deg), 0.0)
    a_norm = dinv[:, None] * a * dinv[None, :]
    lap = jnp.eye(num_nodes, dtype=jnp.float32) - a_norm
    return 2.0 * lap / lambda_max - jnp.eye(num_nodes, dtype=jnp.float32)


def _cheb_ref(L, x, w, b):
    k = w.shape[0]
    t0 = x
    out = t0 @ w[0]
    if k > 1:
        t1 = L @ x
        out = out + t1 @ w[1]
        for i in range(2, k):
            t2 = 2.0 * (L @ t1) - t0
            out = out + t2 @ w[i]
            t0, t1 = t1, t2
    return out + jnp.reshape(b, (1, -1))


def resconv_reference(L, x, ws, bs, w1, b1, w2, b2):
    shortcut = _cheb_ref(L, x, jnp.reshape(ws, (1,) + ws.shape[-2:]), bs)
    h = jax.nn.leaky_relu(_cheb_ref(L, x, w1, b1), 0.01)
    return _cheb_ref(L, h, w2, b2) + shortcut


if __name__ == "__main__":
    # Small, ChebConv-consistent shapes: N nodes, c_in -> c_out, Chebyshev order K.
    N, c_in, c_out, K = 256, 8, 16, 3

    # Deterministic bidirectional ring graph as edge_index [2, E].
    s = np.arange(N)
    d = (s + 1) % N
    edge_index = jnp.asarray(np.stack([np.concatenate([s, d]), np.concatenate([d, s])]),
                             dtype=jnp.int32)
    L_hat = build_scaled_laplacian(edge_index, N)

    key = jax.random.PRNGKey(0)
    ks = jax.random.split(key, 7)
    x = jax.random.normal(ks[0], (N, c_in), jnp.float32)
    w_short = jax.random.normal(ks[1], (1, c_in, c_out), jnp.float32) * 0.1
    b_short = jax.random.normal(ks[2], (1, c_out), jnp.float32) * 0.1
    w1 = jax.random.normal(ks[3], (K, c_in, c_out), jnp.float32) * 0.1
    b1 = jax.random.normal(ks[4], (1, c_out), jnp.float32) * 0.1
    w2 = jax.random.normal(ks[5], (K, c_out, c_out), jnp.float32) * 0.1
    b2 = jax.random.normal(ks[6], (1, c_out), jnp.float32) * 0.1

    ref = resconv_reference(L_hat, x, w_short[0], b_short, w1, b1, w2, b2)

    # Exercise both code paths (VMEM-resident L and tiled/streamed L).
    out_small = resconv_forward(L_hat, x, w_short, b_short, w1, b1, w2, b2,
                                K=K, use_resident=True)
    out_tiled = resconv_forward(L_hat, x, w_short, b_short, w1, b1, w2, b2,
                                K=K, use_resident=False)
    jax.block_until_ready((out_small, out_tiled))

    assert out_small.shape == (N, c_out) and out_tiled.shape == (N, c_out)
    # bf16-L / bf16-operand rounding inside the kernels -> loose tolerance vs f32 reference.
    np.testing.assert_allclose(np.asarray(out_small), np.asarray(ref), atol=5e-2, rtol=5e-2)
    np.testing.assert_allclose(np.asarray(out_tiled), np.asarray(ref), atol=5e-2, rtol=5e-2)
    print("KERNEL_OK")
</pallas_src>

<mosaic_0001>
module attributes {stable_mosaic.version = 11 : i64} {
  func.func @_resident_kernel(%arg0: memref<256x256xbf16, #tpu.memory_space<vmem>>, %arg1: memref<256x128xf32, #tpu.memory_space<vmem>>, %arg2: memref<384x128xf32, #tpu.memory_space<vmem>>, %arg3: memref<1x128xf32, #tpu.memory_space<vmem>>, %arg4: memref<512x128xf32, #tpu.memory_space<vmem>>, %arg5: memref<1x128xf32, #tpu.memory_space<vmem>>, %arg6: memref<256x128xf32, #tpu.memory_space<vmem>>) attributes {dimension_semantics = [], scalar_prefetch = 0 : i64, scratch_operands = 0 : i64, tpu.core_type = #tpu.core_type<tc>} {
    %c0 = arith.constant 0 : index
    %c0_0 = arith.constant 0 : index
    %0 = vector.load %arg0[%c0, %c0_0] : memref<256x256xbf16, #tpu.memory_space<vmem>>, vector<256x256xbf16>
    %c0_1 = arith.constant 0 : index
    %c0_2 = arith.constant 0 : index
    %1 = vector.load %arg1[%c0_1, %c0_2] : memref<256x128xf32, #tpu.memory_space<vmem>>, vector<256x128xf32>
    %c0_3 = arith.constant 0 : index
    %c0_4 = arith.constant 0 : index
    %2 = vector.load %arg2[%c0_3, %c0_4] : memref<384x128xf32, #tpu.memory_space<vmem>>, vector<128x128xf32>
    %cst = arith.constant dense<0.000000e+00> : vector<256x128xf32>
    %3 = tpu.matmul %1, %2, %cst {dimension_numbers = #tpu.dot_dimension_numbers<[1], [0], [0], [1], [0, 0, 1, 1], [], []>} : vector<256x128xf32>, vector<128x128xf32>, vector<256x128xf32> -> vector<256x128xf32>
    %4 = arith.truncf %1 : vector<256x128xf32> to vector<256x128xbf16>
    %cst_5 = arith.constant dense<0.000000e+00> : vector<256x128xf32>
    %5 = tpu.matmul %0, %4, %cst_5 {dimension_numbers = #tpu.dot_dimension_numbers<[1], [0], [0], [1], [0, 0, 1, 1], [], []>} : vector<256x256xbf16>, vector<256x128xbf16>, vector<256x128xf32> -> vector<256x128xf32>
    %c128 = arith.constant 128 : index
    %c0_6 = arith.constant 0 : index
    %6 = vector.load %arg2[%c128, %c0_6] : memref<384x128xf32, #tpu.memory_space<vmem>>, vector<128x128xf32>
    %cst_7 = arith.constant dense<0.000000e+00> : vector<256x128xf32>
    %7 = tpu.matmul %5, %6, %cst_7 {dimension_numbers = #tpu.dot_dimension_numbers<[1], [0], [0], [1], [0, 0, 1, 1], [], []>} : vector<256x128xf32>, vector<128x128xf32>, vector<256x128xf32> -> vector<256x128xf32>
    %8 = arith.addf %3, %7 : vector<256x128xf32>
    %9 = arith.truncf %5 : vector<256x128xf32> to vector<256x128xbf16>
    %cst_8 = arith.constant dense<0.000000e+00> : vector<256x128xf32>
    %10 = tpu.matmul %0, %9, %cst_8 {dimension_numbers = #tpu.dot_dimension_numbers<[1], [0], [0], [1], [0, 0, 1, 1], [], []>} : vector<256x256xbf16>, vector<256x128xbf16>, vector<256x128xf32> -> vector<256x128xf32>
    %cst_9 = arith.constant 2.000000e+00 : f32
    %11 = vector.broadcast %cst_9 : f32 to vector<256x128xf32>
    %12 = arith.mulf %11, %10 : vector<256x128xf32>
    %13 = arith.subf %12, %1 : vector<256x128xf32>
    %c256 = arith.constant 256 : index
    %c0_10 = arith.constant 0 : index
    %14 = vector.load %arg2[%c256, %c0_10] : memref<384x128xf32, #tpu.memory_space<vmem>>, vector<128x128xf32>
    %cst_11 = arith.constant dense<0.000000e+00> : vector<256x128xf32>
    %15 = tpu.matmul %13, %14, %cst_11 {dimension_numbers = #tpu.dot_dimension_numbers<[1], [0], [0], [1], [0, 0, 1, 1], [], []>} : vector<256x128xf32>, vector<128x128xf32>, vector<256x128xf32> -> vector<256x128xf32>
    %16 = arith.addf %8, %15 : vector<256x128xf32>
    %c0_12 = arith.constant 0 : index
    %c0_13 = arith.constant 0 : index
    %17 = vector.load %arg3[%c0_12, %c0_13] : memref<1x128xf32, #tpu.memory_space<vmem>>, vector<1x128xf32>
    %18 = vector.broadcast %17 : vector<1x128xf32> to vector<256x128xf32>
    %19 = arith.addf %16, %18 : vector<256x128xf32>
    %cst_14 = arith.constant 0.000000e+00 : f32
    %20 = vector.broadcast %cst_14 : f32 to vector<256x128xf32>
    %21 = arith.cmpf ogt, %19, %20 : vector<256x128xf32>
    %cst_15 = arith.constant 0.00999999977 : f32
    %22 = vector.broadcast %cst_15 : f32 to vector<256x128xf32>
    %23 = arith.mulf %22, %19 : vector<256x128xf32>
    %24 = arith.select %21, %19, %23 : vector<256x128xi1>, vector<256x128xf32>
    %c0_16 = arith.constant 0 : index
    %c0_17 = arith.constant 0 : index
    %25 = vector.load %arg4[%c0_16, %c0_17] : memref<512x128xf32, #tpu.memory_space<vmem>>, vector<128x128xf32>
    %cst_18 = arith.constant dense<0.000000e+00> : vector<256x128xf32>
    %26 = tpu.matmul %24, %25, %cst_18 {dimension_numbers = #tpu.dot_dimension_numbers<[1], [0], [0], [1], [0, 0, 1, 1], [], []>} : vector<256x128xf32>, vector<128x128xf32>, vector<256x128xf32> -> vector<256x128xf32>
    %27 = arith.truncf %24 : vector<256x128xf32> to vector<256x128xbf16>
    %cst_19 = arith.constant dense<0.000000e+00> : vector<256x128xf32>
    %28 = tpu.matmul %0, %27, %cst_19 {dimension_numbers = #tpu.dot_dimension_numbers<[1], [0], [0], [1], [0, 0, 1, 1], [], []>} : vector<256x256xbf16>, vector<256x128xbf16>, vector<256x128xf32> -> vector<256x128xf32>
    %c128_20 = arith.constant 128 : index
    %c0_21 = arith.constant 0 : index
    %29 = vector.load %arg4[%c128_20, %c0_21] : memref<512x128xf32, #tpu.memory_space<vmem>>, vector<128x128xf32>
    %cst_22 = arith.constant dense<0.000000e+00> : vector<256x128xf32>
    %30 = tpu.matmul %28, %29, %cst_22 {dimension_numbers = #tpu.dot_dimension_numbers<[1], [0], [0], [1], [0, 0, 1, 1], [], []>} : vector<256x128xf32>, vector<128x128xf32>, vector<256x128xf32> -> vector<256x128xf32>
    %31 = arith.addf %26, %30 : vector<256x128xf32>
    %32 = arith.truncf %28 : vector<256x128xf32> to vector<256x128xbf16>
    %cst_23 = arith.constant dense<0.000000e+00> : vector<256x128xf32>
    %33 = tpu.matmul %0, %32, %cst_23 {dimension_numbers = #tpu.dot_dimension_numbers<[1], [0], [0], [1], [0, 0, 1, 1], [], []>} : vector<256x256xbf16>, vector<256x128xbf16>, vector<256x128xf32> -> vector<256x128xf32>
    %cst_24 = arith.constant 2.000000e+00 : f32
    %34 = vector.broadcast %cst_24 : f32 to vector<256x128xf32>
    %35 = arith.mulf %34, %33 : vector<256x128xf32>
    %36 = arith.subf %35, %24 : vector<256x128xf32>
    %c256_25 = arith.constant 256 : index
    %c0_26 = arith.constant 0 : index
    %37 = vector.load %arg4[%c256_25, %c0_26] : memref<512x128xf32, #tpu.memory_space<vmem>>, vector<128x128xf32>
    %cst_27 = arith.constant dense<0.000000e+00> : vector<256x128xf32>
    %38 = tpu.matmul %36, %37, %cst_27 {dimension_numbers = #tpu.dot_dimension_numbers<[1], [0], [0], [1], [0, 0, 1, 1], [], []>} : vector<256x128xf32>, vector<128x128xf32>, vector<256x128xf32> -> vector<256x128xf32>
    %39 = arith.addf %31, %38 : vector<256x128xf32>
    %c384 = arith.constant 384 : index
    %c0_28 = arith.constant 0 : index
    %40 = vector.load %arg4[%c384, %c0_28] : memref<512x128xf32, #tpu.memory_space<vmem>>, vector<128x128xf32>
    %cst_29 = arith.constant dense<0.000000e+00> : vector<256x128xf32>
    %41 = tpu.matmul %1, %40, %cst_29 {dimension_numbers = #tpu.dot_dimension_numbers<[1], [0], [0], [1], [0, 0, 1, 1], [], []>} : vector<256x128xf32>, vector<128x128xf32>, vector<256x128xf32> -> vector<256x128xf32>
    %42 = arith.addf %39, %41 : vector<256x128xf32>
    %c0_30 = arith.constant 0 : index
    %c0_31 = arith.constant 0 : index
    %43 = vector.load %arg5[%c0_30, %c0_31] : memref<1x128xf32, #tpu.memory_space<vmem>>, vector<1x128xf32>
    %44 = vector.broadcast %43 : vector<1x128xf32> to vector<256x128xf32>
    %45 = arith.addf %42, %44 : vector<256x128xf32>
    %c0_32 = arith.constant 0 : index
    %c0_33 = arith.constant 0 : index
    %46 = vector.load %arg6[%c0_32, %c0_33] : memref<256x128xf32, #tpu.memory_space<vmem>>, vector<256x128xf32>
    tpu.vector_store %arg6[%c0_32, %c0_33], %45 {strides = array<i32>} : memref<256x128xf32, #tpu.memory_space<vmem>>, vector<256x128xf32>,
    return
  }
}

</mosaic_0001>

<bundles_post_ra>
// kernel: tpu_custom_call.1
= control target key start
LH: loop header
LB: loop body
LE: loop exit
PB: predicated region body
PF: predicated region fallthrough
CT: control target
= control target key end

     0   :  { %11 = vsyncpa [#allocation3], 0  ;;  %s6194_s0 = inlined_call_operand.hbm [shape: bf16[256,256], index: 0, kind: input, shape index: {}]   ;;  %s6195_s1 = inlined_call_operand.hbm [shape: f32[256,128], index: 1, kind: input, shape index: {}]   ;;  %s6196_s2 = inlined_call_operand.hbm [shape: f32[384,128], index: 2, kind: input, shape index: {}]   ;;  %s6197_s3 = inlined_call_operand.vmem [shape: f32[1,128], index: 3, kind: input, shape index: {}]   ;;  %s6198_s4 = inlined_call_operand.hbm [shape: f32[512,128], index: 4, kind: input, shape index: {}]   ;;  %s6199_s5 = inlined_call_operand.vmem [shape: f32[1,128], index: 5, kind: input, shape index: {}]   ;;  %s6200_s6 = inlined_call_operand.hbm [shape: f32[256,128], index: 6, kind: output, shape index: {}]  }
   0x1   :  { %12 = vsyncpa [#allocation6], 0 }
   0x2   :  { %13 = vsyncpa [#allocation9], 0 }
   0x3   :  { %14 = vsyncpa [#allocation4], 0  ;;  %s5195_s21 = smov [#allocation5]   ;;  %s5196_s23 = smov [#allocation2]  }
   0x4   :  { %s32_s22 = sshll.u32 %s5195_s21, 4  ;;  %s20_s24 = sshll.u32 %s5196_s23, 4  ;;  %s33_s22 = int_to_ptr.vmem [resolvable:$true] %s32_s22  ;;  %s5237_s24 = int_to_ptr.vmem [resolvable:$true] %s20_s24 }
   0x5   :  { %s5077_s27 = scalar_lea.hbm %s6195_s1, 4096 }
   0x6   :  { %p5078_p0 = scmp.ne.s32.totalorder %s6195_s1, %s5077_s27  ;;  %p5081_p1 = scmp.lt.u32.totalorder %s5077_s27, %s6195_s1 }
   0x8   :  { %p5083_p2 = pnand %p5081_p1, %p5078_p0 }
   0xa   :  { %5086 = shalt.err (!%p5083_p2)
}
   0xb   :  { %s5087_s8 = scalar_lea.vmem %s33_s22, 4096  ;;  %p5092_p4 = scmp.lt.s32.totalorder %s33_s22, %s33_s22 }
   0xc   :  { %p5088_p3 = scmp.ne.s32.totalorder %s33_s22, %s5087_s8  ;;  %p5093_p5 = scmp.lt.s32.totalorder %s5087_s8, %s5087_s8 }
   0xe   :  { %p5094_p6 = por %p5093_p5, %p5092_p4 }
  0x10   :  { %p5095_p7 = pnand %p5094_p6, %p5088_p3 }
  0x12   :  { %5098 = shalt.err (!%p5095_p7)
}
  0x13   :  { %s5197_s9 = smov 128   ;;  %s5198_s10 = smov 8  }
  0x14   :  { %38 = dma.hbm_to_vmem [thread:$0]  %s6195_s1, 4096, %s33_s22, [#allocation6], %s5197_s9, %s5197_s9, %s5198_s10  }
  0x15   :  { %s5099_s15 = scalar_lea.hbm %s6194_s0, 4096 }
  0x16   :  { %p5100_p8 = scmp.ne.s32.totalorder %s6194_s0, %s5099_s15  ;;  %p5103_p9 = scmp.lt.u32.totalorder %s5099_s15, %s6194_s0 }
  0x18   :  { %p5105_p10 = pnand %p5103_p9, %p5100_p8 }
  0x1a   :  { %5108 = shalt.err (!%p5105_p10)
}
  0x1b   :  { %s5109_s20 = scalar_lea.vmem %s5237_s24, 4096  ;;  %p5114_p12 = scmp.lt.s32.totalorder %s5237_s24, %s5237_s24 }
  0x1c   :  { %p5110_p11 = scmp.ne.s32.totalorder %s5237_s24, %s5109_s20  ;;  %p5115_p13 = scmp.lt.s32.totalorder %s5109_s20, %s5109_s20 }
  0x1e   :  { %p5116_p0 = por %p5115_p13, %p5114_p12 }
  0x20   :  { %p5117_p1 = pnand %p5116_p0, %p5110_p11 }
  0x22   :  { %5120 = shalt.err (!%p5117_p1)
}
  0x23   :  { %26 = dma.hbm_to_vmem [thread:$0]  %s6194_s0, 4096, %s5237_s24, [#allocation3], %s5197_s9, %s5197_s9, %s5198_s10  }
  0x24   :  { %s5199_s22 = smov [#allocation7]   ;;  %s5200_s25 = smov [#allocation8]  }
  0x25   :  { %s44_s23 = sshll.u32 %s5199_s22, 4  ;;  %s58_s26 = sshll.u32 %s5200_s25, 4  ;;  %s45_s23 = int_to_ptr.vmem [resolvable:$true] %s44_s23  ;;  %s5274_s26 = int_to_ptr.vmem [resolvable:$true] %s58_s26 }
  0x26   :  { %s5121_s29 = scalar_lea.hbm %s6196_s2, 6144 }
  0x27   :  { %p5122_p2 = scmp.ne.s32.totalorder %s6196_s2, %s5121_s29  ;;  %p5125_p3 = scmp.lt.u32.totalorder %s5121_s29, %s6196_s2 }
  0x29   :  { %p5127_p4 = pnand %p5125_p3, %p5122_p2 }
  0x2b   :  { %5130 = shalt.err (!%p5127_p4)
}
  0x2c   :  { %s5131_s0 = scalar_lea.vmem %s45_s23, 6144  ;;  %p5136_p6 = scmp.lt.s32.totalorder %s45_s23, %s45_s23 }
  0x2d   :  { %p5132_p5 = scmp.ne.s32.totalorder %s45_s23, %s5131_s0  ;;  %p5137_p7 = scmp.lt.s32.totalorder %s5131_s0, %s5131_s0 }
  0x2f   :  { %p5138_p8 = por %p5137_p7, %p5136_p6 }
  0x31   :  { %p5139_p9 = pnand %p5138_p8, %p5132_p5 }
  0x33   :  { %5142 = shalt.err (!%p5139_p9)
}
  0x34   :  { %50 = dma.hbm_to_vmem [thread:$0]  %s6196_s2, 6144, %s45_s23, [#allocation6], %s5197_s9, %s5197_s9, %s5198_s10  }
  0x35   :  { %s5143_s15 = scalar_lea.hbm %s6198_s4, 8192 }
  0x36   :  { %p5144_p10 = scmp.ne.s32.totalorder %s6198_s4, %s5143_s15  ;;  %p5147_p11 = scmp.lt.u32.totalorder %s5143_s15, %s6198_s4 }
  0x38   :  { %p5149_p12 = pnand %p5147_p11, %p5144_p10 }
  0x3a   :  { %5152 = shalt.err (!%p5149_p12)
}
  0x3b   :  { %s5153_s20 = scalar_lea.vmem %s5274_s26, 8192  ;;  %p5158_p0 = scmp.lt.s32.totalorder %s5274_s26, %s5274_s26 }
  0x3c   :  { %p5154_p13 = scmp.ne.s32.totalorder %s5274_s26, %s5153_s20  ;;  %p5159_p1 = scmp.lt.s32.totalorder %s5153_s20, %s5153_s20 }
  0x3e   :  { %p5160_p2 = por %p5159_p1, %p5158_p0 }
  0x40   :  { %p5161_p3 = pnand %p5160_p2, %p5154_p13 }
  0x42   :  { %5164 = shalt.err (!%p5161_p3)
}
  0x43   :  { %64 = dma.hbm_to_vmem [thread:$0]  %s6198_s4, 8192, %s5274_s26, [#allocation9], %s5197_s9, %s5197_s9, %s5198_s10  }
  0x44   :  { %5187 = dma.done.wait [#allocation3], 4096  }
  0x45   :  { %5188 = vsyncadd [#allocation3], 4294963200 }
  0x46   :  { %5189 = dma.done.wait [#allocation6], 10240  }
  0x47   :  { %5190 = vsyncadd [#allocation6], 4294957056 }
  0x48   :  { %5191 = dma.done.wait [#allocation9], 8192  }
  0x49   :  { %5192 = vsyncadd [#allocation9], 4294959104  ;;  %v5311_v0 = vld [vmem:[#allocation5 + $0x80] sm:$0xff]  ;;  %v5313_v1 = vld [vmem:[#allocation5 + $0x88] sm:$0xff] }
  0x4a   :  { %6278 = vst [vmem:[#allocation15_spill] sm:$0xff] %v5311_v0  ;;  %6279 = vst [vmem:[#allocation16_spill] sm:$0xff] %v5313_v1  ;;  %v5315_v2 = vld [vmem:[#allocation5] sm:$0xff]  ;;  %v168_v3 = vpack.c.bf16 %v5313_v1, %v5311_v0  ;;  %v5319_v4 = vld [vmem:[#allocation5 + $0x8] sm:$0xff] }
  0x4b   :  { %v5321_v5 = vld [vmem:[#allocation5 + $0x90] sm:$0xff]  ;;  %v5323_v6 = vld [vmem:[#allocation5 + $0x98] sm:$0xff]  ;;  %v160_v7 = vpack.c.bf16 %v5319_v4, %v5315_v2  ;;  %v5333_v11 = vld [vmem:[#allocation5 + $0xa0] sm:$0xff] }
  0x4c   :  { %6280 = vst [vmem:[#allocation17_spill] sm:$0xff] %v5321_v5  ;;  %6281 = vst [vmem:[#allocation18_spill] sm:$0xff] %v5323_v6  ;;  %v169_v8 = vpack.c.bf16 %v5323_v6, %v5321_v5  ;;  %v5329_v9 = vld [vmem:[#allocation5 + $0x10] sm:$0xff]  ;;  %v5331_v10 = vld [vmem:[#allocation5 + $0x18] sm:$0xff]  ;;  %3182 = vmatprep.subr.bf16.mxu0 %v168_v3  ;;  %4750 = vmatprep.subr.bf16.mxu1 %v168_v3 }
  0x4d   :  { %6282 = vst [vmem:[#allocation19_spill] sm:$0xff] %v5333_v11  ;;  %v5335_v12 = vld [vmem:[#allocation5 + $0xa8] sm:$0xff]  ;;  %3183 = vmatpush3.bf16.msra.mxu0 %v160_v7  ;;  %v161_v13 = vpack.c.bf16 %v5331_v10, %v5329_v9  ;;  %4758 = vmatpush3.bf16.msra.mxu1 %v160_v7  ;;  %v5341_v15 = vld [vmem:[#allocation5 + $0x20] sm:$0xff]  ;;  %v5345_v17 = vld [vmem:[#allocation5 + $0xb0] sm:$0xff] }
  0x4e   :  { %6283 = vst [vmem:[#allocation20_spill] sm:$0xff] %v5335_v12  ;;  %3184 = vmatprep.subr.bf16.mxu0 %v169_v8  ;;  %v170_v14 = vpack.c.bf16 %v5335_v12, %v5333_v11  ;;  %v5343_v16 = vld [vmem:[#allocation5 + $0x28] sm:$0xff]  ;;  %4751 = vmatprep.subr.bf16.mxu1 %v169_v8  ;;  %6284 = vst [vmem:[#allocation21_spill] sm:$0xff] %v5345_v17  ;;  %v5347_v18 = vld [vmem:[#allocation5 + $0xb8] sm:$0xff] }
  0x4f   :  { %6285 = vst [vmem:[#allocation22_spill] sm:$0xff] %v5347_v18  ;;  %v162_v19 = vpack.c.bf16 %v5343_v16, %v5341_v15  ;;  %v171_v20 = vpack.c.bf16 %v5347_v18, %v5345_v17  ;;  %v5353_v21 = vld [vmem:[#allocation5 + $0x30] sm:$0xff]  ;;  %v5355_v22 = vld [vmem:[#allocation5 + $0x38] sm:$0xff]  ;;  %v5357_v23 = vld [vmem:[#allocation5 + $0xc0] sm:$0xff] }
  0x50   :  { %6286 = vst [vmem:[#allocation23_spill] sm:$0xff] %v5357_v23  ;;  %v5359_v24 = vld [vmem:[#allocation5 + $0xc8] sm:$0xff]  ;;  %v163_v26 = vpack.c.bf16 %v5355_v22, %v5353_v21  ;;  %v5365_v27 = vld [vmem:[#allocation5 + $0x40] sm:$0xff]  ;;  %v5372_v30 = vld [vmem:[#allocation5 + $0xd0] sm:$0xff] }
  0x51   :  { %3185 = vmatpush3.bf16.msra.mxu0 %v161_v13  ;;  %4759 = vmatpush3.bf16.msra.mxu1 %v161_v13  ;;  %6287 = vst [vmem:[#allocation24_spill] sm:$0xff] %v5359_v24  ;;  %v5361_v25 = vld [vmem:[#allocation2 + $0x4] ss:$8 sps:$4 sm:$0xff]   ;;  %v172_v28 = vpack.c.bf16 %v5359_v24, %v5357_v23  ;;  %6288 = vst [vmem:[#allocation25_spill] sm:$0xff] %v5372_v30  ;;  %v5374_v31 = vld [vmem:[#allocation5 + $0xd8] sm:$0xff] }
  0x52   :  { %3186 = vmatprep.subr.bf16.mxu0 %v170_v14  ;;  %4752 = vmatprep.subr.bf16.mxu1 %v170_v14  ;;  %v5369_v29 = vld [vmem:[#allocation5 + $0x48] sm:$0xff]  ;;  %6289 = vst [vmem:[#allocation26_spill] sm:$0xff] %v5374_v31  ;;  %v5378_v33 = vld [vmem:[#allocation5 + $0x50] sm:$0xff]  ;;  %v173_v34 = vpack.c.bf16 %v5374_v31, %v5372_v30  ;;  %v5382_v35 = vld [vmem:[#allocation5 + $0x58] sm:$0xff] }
  0x53   :  { %368 = vmatprep.mubr.bf16.mxu0 %v5361_v25  ;;  %v164_v32 = vpack.c.bf16 %v5369_v29, %v5365_v27  ;;  %v5384_v36 = vld [vmem:[#allocation5 + $0xe0] sm:$0xff]  ;;  %v5386_v37 = vld [vmem:[#allocation5 + $0xe8] sm:$0xff]  ;;  %v165_v38 = vpack.c.bf16 %v5382_v35, %v5378_v33  ;;  %v5396_v42 = vld [vmem:[#allocation5 + $0xf0] sm:$0xff] }
  0x54   :  { %6290 = vst [vmem:[#allocation27_spill] sm:$0xff] %v5384_v36  ;;  %6291 = vst [vmem:[#allocation28_spill] sm:$0xff] %v5386_v37  ;;  %v5390_v39 = vld [vmem:[#allocation5 + $0x60] sm:$0xff]  ;;  %v174_v40 = vpack.c.bf16 %v5386_v37, %v5384_v36  ;;  %v5394_v41 = vld [vmem:[#allocation5 + $0x68] sm:$0xff] }
  0x55   :  { %3187 = vmatpush3.bf16.msra.mxu0 %v162_v19  ;;  %4760 = vmatpush3.bf16.msra.mxu1 %v162_v19  ;;  %6292 = vst [vmem:[#allocation29_spill] sm:$0xff] %v5390_v39  ;;  %6293 = vst [vmem:[#allocation30_spill] sm:$0xff] %v5394_v41  ;;  %v5398_v43 = vld [vmem:[#allocation5 + $0xf8] sm:$0xff]  ;;  %v5400_v44 = vld [vmem:[#allocation5 + $0x70] sm:$0xff]  ;;  %v166_v45 = vpack.c.bf16 %v5394_v41, %v5390_v39 }
  0x56   :  { %3188 = vmatprep.subr.bf16.mxu0 %v171_v20  ;;  %4753 = vmatprep.subr.bf16.mxu1 %v171_v20  ;;  %6294 = vst [vmem:[#allocation31_spill] sm:$0xff] %v5396_v42  ;;  %6295 = vst [vmem:[#allocation32_spill] sm:$0xff] %v5398_v43  ;;  %v5404_v46 = vld [vmem:[#allocation2 + $0xc4] ss:$8 sps:$4 sm:$0xff]   ;;  %v175_v47 = vpack.c.bf16 %v5398_v43, %v5396_v42  ;;  %v5408_v48 = vld [vmem:[#allocation5 + $0x78] sm:$0xff] }
  0x57   :  { %6296 = vst [vmem:[#allocation33_spill] sm:$0xff] %v5400_v44  ;;  %6297 = vst [vmem:[#allocation34_spill] sm:$0xff] %v5404_v46  ;;  %464 = vmatprep.mubr.bf16.mxu1 %v5404_v46  ;;  %v167_v49 = vpack.c.bf16 %v5408_v48, %v5400_v44  ;;  %v5413_v50 = vld [vmem:[#allocation2] ss:$8 sps:$4 sm:$0xff]   ;;  %v5415_v51 = vld [vmem:[#allocation2 + $0x14] ss:$8 sps:$4 sm:$0xff]  }
  0x58   :  { %6298 = vst [vmem:[#allocation35_spill] sm:$0xff] %v5408_v48  ;;  %v5417_v52 = vld [vmem:[#allocation2 + $0xc0] ss:$8 sps:$4 sm:$0xff]   ;;  %v5419_v53 = vld [vmem:[#allocation2 + $0xd4] ss:$8 sps:$4 sm:$0xff]  }
  0x59   :  { %3189 = vmatpush3.bf16.msra.mxu0 %v163_v26  ;;  %4761 = vmatpush3.bf16.msra.mxu1 %v163_v26  ;;  %6299 = vst [vmem:[#allocation36_spill] sm:$0xff] %v5417_v52  ;;  %6300 = vst [vmem:[#allocation37_spill] sm:$0xff] %v5419_v53  ;;  %v497_v54 = vld [vmem:[#allocation7 + $0x80] sm:$0xff]  ;;  %v498_v55 = vld [vmem:[#allocation7 + $0x88] sm:$0xff] }
  0x5a   :  { %3190 = vmatprep.subr.bf16.mxu0 %v172_v28  ;;  %4754 = vmatprep.subr.bf16.mxu1 %v172_v28  ;;  %v499_v56 = vld [vmem:[#allocation7 + $0x90] sm:$0xff]  ;;  %v4526_v57 = vpack.c.bf16 %v498_v55, %v497_v54  ;;  %v500_v58 = vld [vmem:[#allocation7 + $0x98] sm:$0xff]  ;;  %v501_v60 = vld [vmem:[#allocation7 + $0xa0] sm:$0xff] }
  0x5b   :  { %v4530_v59 = vpack.c.bf16 %v500_v58, %v499_v56  ;;  %v502_v61 = vld [vmem:[#allocation7 + $0xa8] sm:$0xff]  ;;  %v5425_v62 = vld [vmem:[#allocation2 + $0x10] ss:$8 sps:$4 sm:$0xff]   ;;  %v505_v20 = vld [vmem:[#allocation7 + $0xc0] sm:$0xff] }
  0x5c   :  { %v5427_v63 = vld [vmem:[#allocation2 + $0x24] ss:$8 sps:$4 sm:$0xff]   ;;  %v5429_v3 = vld [vmem:[#allocation2 + $0xd0] ss:$8 sps:$4 sm:$0xff]   ;;  %v4534_v14 = vpack.c.bf16 %v502_v61, %v501_v60  ;;  %v5437_v28 = vld [vmem:[#allocation2 + $0x20] ss:$8 sps:$4 sm:$0xff]  }
  0x5d   :  { %3191 = vmatpush3.bf16.msra.mxu0 %v164_v32  ;;  %4762 = vmatpush3.bf16.msra.mxu1 %v164_v32  ;;  %6301 = vst [vmem:[#allocation38_spill] sm:$0xff] %v5429_v3  ;;  %v5431_v7 = vld [vmem:[#allocation2 + $0xe4] ss:$8 sps:$4 sm:$0xff]   ;;  %v503_v8 = vld [vmem:[#allocation7 + $0xb0] sm:$0xff]  ;;  %v504_v13 = vld [vmem:[#allocation7 + $0xb8] sm:$0xff] }
  0x5e   :  { %3192 = vmatprep.subr.bf16.mxu0 %v173_v34  ;;  %4755 = vmatprep.subr.bf16.mxu1 %v173_v34  ;;  %6302 = vst [vmem:[#allocation39_spill] sm:$0xff] %v5431_v7  ;;  %v4538_v19 = vpack.c.bf16 %v504_v13, %v503_v8  ;;  %v506_v26 = vld [vmem:[#allocation7 + $0xc8] sm:$0xff]  ;;  %v5439_v32 = vld [vmem:[#allocation2 + $0x34] ss:$8 sps:$4 sm:$0xff]   ;;  %v509_v54 = vld [vmem:[#allocation7 + $0xe0] sm:$0xff] }
  0x5f   :  { %v5441_v34 = vld [vmem:[#allocation2 + $0xe0] ss:$8 sps:$4 sm:$0xff]   ;;  %v5449_v56 = vld [vmem:[#allocation2 + $0x30] ss:$8 sps:$4 sm:$0xff]   ;;  %v5453_v58 = vld [vmem:[#allocation2 + $0x44] ss:$8 sps:$4 sm:$0xff]  }
  0x60   :  { %6303 = vst [vmem:[#allocation40_spill] sm:$0xff] %v5441_v34  ;;  %v510_v55 = vld [vmem:[#allocation7 + $0xe8] sm:$0xff]  ;;  %v5460_v61 = vld [vmem:[#allocation2 + $0x54] ss:$8 sps:$4 sm:$0xff]   ;;  %v5464_v8 = vld [vmem:[#allocation2 + $0x50] ss:$8 sps:$4 sm:$0xff]  }
  0x61   :  { %3193 = vmatpush3.bf16.msra.mxu0 %v165_v38  ;;  %4763 = vmatpush3.bf16.msra.mxu1 %v165_v38  ;;  %v5443_v38 = vld [vmem:[#allocation2 + $0xf4] ss:$8 sps:$4 sm:$0xff]   ;;  %v5458_v60 = vld [vmem:[#allocation2 + $0x40] ss:$8 sps:$4 sm:$0xff]   ;;  %v5466_v13 = vld [vmem:[#allocation2 + $0x64] ss:$8 sps:$4 sm:$0xff]  }
  0x62   :  { %3194 = vmatprep.subr.bf16.mxu0 %v174_v40  ;;  %4756 = vmatprep.subr.bf16.mxu1 %v174_v40  ;;  %6304 = vst [vmem:[#allocation41_spill] sm:$0xff] %v5443_v38  ;;  %v507_v40 = vld [vmem:[#allocation7 + $0xd0] sm:$0xff] }
  0x65   :  { %3195 = vmatpush3.bf16.msra.mxu0 %v166_v45  ;;  %4764 = vmatpush3.bf16.msra.mxu1 %v166_v45  ;;  %v508_v45 = vld [vmem:[#allocation7 + $0xd8] sm:$0xff] }
  0x66   :  { %3196 = vmatprep.subr.bf16.mxu0 %v175_v47  ;;  %4757 = vmatprep.subr.bf16.mxu1 %v175_v47  ;;  %v4542_v47 = vpack.c.bf16 %v506_v26, %v505_v20  ;;  %v5476_v20 = vld [vmem:[#allocation2 + $0x70] ss:$8 sps:$4 sm:$0xff]   ;;  %v5478_v26 = vld [vmem:[#allocation2 + $0x84] ss:$8 sps:$4 sm:$0xff]  }
  0x67   :  { %6307 = vst [vmem:[#allocation44_spill] sm:$0xff] %v5476_v20  ;;  %6308 = vst [vmem:[#allocation45_spill] sm:$0xff] %v5478_v26 }
  0x69   :  { %3197 = vmatpush3.bf16.msra.mxu0 %v167_v49  ;;  %4765 = vmatpush3.bf16.msra.mxu1 %v167_v49  ;;  %v4546_v49 = vpack.c.bf16 %v508_v45, %v507_v40  ;;  %v5482_v40 = vld [vmem:[#allocation2 + $0x80] ss:$8 sps:$4 sm:$0xff]   ;;  %v5484_v45 = vld [vmem:[#allocation2 + $0x94] ss:$8 sps:$4 sm:$0xff]  }
  0x6a   :  { %4527 = vmatprep.subr.bf16.mxu1 %v4526_v57  ;;  %6309 = vst [vmem:[#allocation46_spill] sm:$0xff] %v5482_v40  ;;  %6310 = vst [vmem:[#allocation47_spill] sm:$0xff] %v5484_v45 }
  0x6c   :  { %369 = vmatmul.mubr.bf16.vlgmr.msra.gmra.mrb[0].mxu0 %v5413_v50  ;;  %465 = vmatmul.mubr.bf16.vlgmr.msra.gmra.mrb[0].mxu1 %v5417_v52 }
  0x6d   :  { %376 = vmatprep.mubr.bf16.mxu0 %v5415_v51  ;;  %472 = vmatprep.mubr.bf16.mxu1 %v5419_v53 }
  0x6e   :  { %4529 = vmatpush3.bf16.msra.mxu1 %v4526_v57  ;;  %v5451_v57 = vld [vmem:[#allocation2 + $0xf0] ss:$8 sps:$4 sm:$0xff]  }
  0x6f   :  { %4531 = vmatprep.subr.bf16.mxu1 %v4530_v59  ;;  %6305 = vst [vmem:[#allocation42_spill] sm:$0xff] %v5451_v57 }
  0x72   :  { %4533 = vmatpush3.bf16.msra.mxu1 %v4530_v59  ;;  %v4550_v59 = vpack.c.bf16 %v510_v55, %v509_v54  ;;  %v5494_v54 = vld [vmem:[#allocation2 + $0xa0] ss:$8 sps:$4 sm:$0xff]   ;;  %v5496_v55 = vld [vmem:[#allocation2 + $0xb4] ss:$8 sps:$4 sm:$0xff]  }
  0x73   :  { %4535 = vmatprep.subr.bf16.mxu1 %v4534_v14  ;;  %6313 = vst [vmem:[#allocation50_spill] sm:$0xff] %v5494_v54  ;;  %6314 = vst [vmem:[#allocation51_spill] sm:$0xff] %v5496_v55 }
  0x74   :  { %377 = vmatmul.mubr.bf16.gmra.mrb[4].mxu0 %v5425_v62  ;;  %473 = vmatmul.mubr.bf16.gmra.mrb[4].mxu1 %v5429_v3 }
  0x75   :  { %384 = vmatprep.mubr.bf16.mxu0 %v5427_v63  ;;  %480 = vmatprep.mubr.bf16.mxu1 %v5431_v7 }
  0x76   :  { %4537 = vmatpush3.bf16.msra.mxu1 %v4534_v14  ;;  %v5470_v14 = vld [vmem:[#allocation2 + $0x60] ss:$8 sps:$4 sm:$0xff]  }
  0x77   :  { %4539 = vmatprep.subr.bf16.mxu1 %v4538_v19 }
  0x7a   :  { %4541 = vmatpush3.bf16.msra.mxu1 %v4538_v19  ;;  %v5472_v19 = vld [vmem:[#allocation2 + $0x74] ss:$8 sps:$4 sm:$0xff]  }
  0x7b   :  { %4543 = vmatprep.subr.bf16.mxu1 %v4542_v47  ;;  %6306 = vst [vmem:[#allocation43_spill] sm:$0xff] %v5472_v19 }
  0x7c   :  { %385 = vmatmul.mubr.bf16.gmra.mrb[8].mxu0 %v5437_v28  ;;  %481 = vmatmul.mubr.bf16.gmra.mrb[8].mxu1 %v5441_v34  ;;  %v5500_v34 = vld [vmem:[#allocation2 + $0xb0] ss:$8 sps:$4 sm:$0xff]  }
  0x7d   :  { %392 = vmatprep.mubr.bf16.mxu0 %v5439_v32  ;;  %488 = vmatprep.mubr.bf16.mxu1 %v5443_v38  ;;  %6315 = vst [vmem:[#allocation52_spill] sm:$0xff] %v5500_v34 }
  0x7e   :  { %4545 = vmatpush3.bf16.msra.mxu1 %v4542_v47  ;;  %v5488_v47 = vld [vmem:[#allocation2 + $0x90] ss:$8 sps:$4 sm:$0xff]  }
  0x7f   :  { %4547 = vmatprep.subr.bf16.mxu1 %v4546_v49  ;;  %6311 = vst [vmem:[#allocation48_spill] sm:$0xff] %v5488_v47 }
  0x82   :  { %4549 = vmatpush3.bf16.msra.mxu1 %v4546_v49  ;;  %v5490_v49 = vld [vmem:[#allocation2 + $0xa4] ss:$8 sps:$4 sm:$0xff]  }
  0x83   :  { %4551 = vmatprep.subr.bf16.mxu1 %v4550_v59  ;;  %6312 = vst [vmem:[#allocation49_spill] sm:$0xff] %v5490_v49 }
  0x84   :  { %393 = vmatmul.mubr.bf16.gmra.mrb[12].mxu0 %v5449_v56  ;;  %489 = vmatmul.mubr.bf16.gmra.mrb[12].mxu1 %v5451_v57  ;;  %v512_v57 = vld [vmem:[#allocation7 + $0xf8] sm:$0xff] }
  0x85   :  { %400 = vmatprep.mubr.bf16.mxu0 %v5453_v58 }
  0x86   :  { %4553 = vmatpush3.bf16.msra.mxu1 %v4550_v59  ;;  %v511_v59 = vld [vmem:[#allocation7 + $0xf0] sm:$0xff] }
  0x87   :  { %v4554_v38 = vpack.c.bf16 %v512_v57, %v511_v59 }
  0x89   :  { %4555 = vmatprep.subr.bf16.mxu1 %v4554_v38 }
  0x8a   :  { %4557 = vmatpush3.bf16.msra.mxu1 %v4554_v38 }
  0x8c   :  { %401 = vmatmul.mubr.bf16.gmra.mrb[16].mxu0 %v5458_v60 }
  0x8d   :  { %408 = vmatprep.mubr.bf16.mxu0 %v5460_v61 }
  0x94   :  { %409 = vmatmul.mubr.bf16.gmra.mrb[20].mxu0 %v5464_v8 }
  0x95   :  { %416 = vmatprep.mubr.bf16.mxu0 %v5466_v13 }
  0x9c   :  { %417 = vmatmul.mubr.bf16.gmra.mrb[24].mxu0 %v5470_v14 }
  0x9d   :  { %424 = vmatprep.mubr.bf16.mxu0 %v5472_v19 }
  0xa4   :  { %425 = vmatmul.mubr.bf16.gmra.mrb[28].mxu0 %v5476_v20 }
  0xa5   :  { %432 = vmatprep.mubr.bf16.mxu0 %v5478_v26 }
  0xac   :  { %433 = vmatmul.mubr.bf16.gmra.mrb[32].mxu0 %v5482_v40 }
  0xad   :  { %440 = vmatprep.mubr.bf16.mxu0 %v5484_v45 }
  0xb4   :  { %441 = vmatmul.mubr.bf16.gmra.mrb[36].mxu0 %v5488_v47 }
  0xb5   :  { %448 = vmatprep.mubr.bf16.mxu0 %v5490_v49 }
  0xbc   :  { %449 = vmatmul.mubr.bf16.gmra.mrb[40].mxu0 %v5494_v54 }
  0xbd   :  { %456 = vmatprep.mubr.bf16.mxu0 %v5496_v55 }
  0xc4   :  { %457 = vmatmul.mubr.bf16.gmra.mrb[44].mxu0 %v5500_v34 }
  0xc5   :  { %1011 = vmatprep.mubr.bf16.mxu0 %v5361_v25 }
 0x13f   :  { %v3198_v7 = vpop.f32.mrb[0].mxu0  ;;  %v3270_v3 = vpop.f32.mrb[0].mxu1 }
 0x140   :  { %v3199_v53 = vpop.f32.mrb[1].mxu0  ;;  %v3271_v52 = vpop.f32.mrb[1].mxu1 }
 0x141   :  { %v5504_v46 = vadd.f32 %v3199_v53, %v3198_v7  ;;  %v3201_v43 = vpop.f32.mrb[2].mxu0  ;;  %v5506_v42 = vadd.f32 %v3271_v52, %v3270_v3  ;;  %v3273_v37 = vpop.f32.mrb[2].mxu1 }
 0x142   :  { %v3202_v55 = vpop.f32.mrb[3].mxu0  ;;  %v3274_v57 = vpop.f32.mrb[3].mxu1 }
 0x143   :  { %v5508_v59 = vadd.f32 %v3202_v55, %v3201_v43  ;;  %3998 = vmatprep.mubr.f32.mxu1 %v5504_v46  ;;  %v5511_v38 = vadd.f32 %v3274_v57, %v3273_v37 }
 0x145   :  { %3999 = vmatmul.mubr.f32.vlgmr.msra.gmra.mrb[16].mxu1 %v5508_v59 }
 0x147   :  { %v3204_v7 = vpop.f32.mrb[4].mxu0  ;;  %v3276_v52 = vpop.f32.mrb[4].mxu1 }
 0x148   :  { %v3205_v3 = vpop.f32.mrb[5].mxu0  ;;  %v3277_v34 = vpop.f32.mrb[5].mxu1 }
 0x149   :  { %v5518_v36 = vadd.f32 %v3205_v3, %v3204_v7  ;;  %v3207_v43 = vpop.f32.mrb[6].mxu0  ;;  %v5520_v55 = vadd.f32 %v3277_v34, %v3276_v52  ;;  %v3279_v54 = vpop.f32.mrb[6].mxu1 }
 0x14a   :  { %v3208_v37 = vpop.f32.mrb[7].mxu0  ;;  %v3280_v57 = vpop.f32.mrb[7].mxu1 }
 0x14b   :  { %v5522_v31 = vadd.f32 %v3208_v37, %v3207_v43  ;;  %4001 = vmatprep.mubr.f32.mxu1 %v5518_v36  ;;  %v5525_v25 = vadd.f32 %v3280_v57, %v3279_v54 }
 0x14d   :  { %4002 = vmatmul.mubr.f32.gmra.mrb[18].mxu1 %v5522_v31 }
 0x14f   :  { %v3210_v3 = vpop.f32.mrb[8].mxu0  ;;  %v3282_v34 = vpop.f32.mrb[8].mxu1 }
 0x150   :  { %v3211_v52 = vpop.f32.mrb[9].mxu0  ;;  %v3283_v30 = vpop.f32.mrb[9].mxu1 }
 0x151   :  { %v5532_v24 = vadd.f32 %v3211_v52, %v3210_v3  ;;  %v3213_v43 = vpop.f32.mrb[10].mxu0  ;;  %v5534_v37 = vadd.f32 %v3283_v30, %v3282_v34  ;;  %v3285_v49 = vpop.f32.mrb[10].mxu1 }
 0x152   :  { %v3214_v54 = vpop.f32.mrb[11].mxu0  ;;  %v3286_v57 = vpop.f32.mrb[11].mxu1 }
 0x153   :  { %v5536_v23 = vadd.f32 %v3214_v54, %v3213_v43  ;;  %4004 = vmatprep.mubr.f32.mxu1 %v5532_v24  ;;  %v5539_v53 = vadd.f32 %v3286_v57, %v3285_v49 }
 0x155   :  { %4005 = vmatmul.mubr.f32.gmra.mrb[20].mxu1 %v5536_v23 }
 0x157   :  { %v3216_v52 = vpop.f32.mrb[12].mxu0  ;;  %v3288_v30 = vpop.f32.mrb[12].mxu1 }
 0x158   :  { %v3217_v34 = vpop.f32.mrb[13].mxu0  ;;  %v3289_v47 = vpop.f32.mrb[13].mxu1 }
 0x159   :  { %v5546_v18 = vadd.f32 %v3217_v34, %v3216_v52  ;;  %v3219_v43 = vpop.f32.mrb[14].mxu0  ;;  %v5548_v54 = vadd.f32 %v3289_v47, %v3288_v30  ;;  %v3291_v17 = vpop.f32.mrb[14].mxu1 }
 0x15a   :  { %v3220_v49 = vpop.f32.mrb[15].mxu0  ;;  %v3292_v57 = vpop.f32.mrb[15].mxu1 }
 0x15b   :  { %v5550_v12 = vadd.f32 %v3220_v49, %v3219_v43  ;;  %4007 = vmatprep.mubr.f32.mxu1 %v5546_v18  ;;  %v5553_v7 = vadd.f32 %v3292_v57, %v3291_v17 }
 0x15d   :  { %4008 = vmatmul.mubr.f32.gmra.mrb[22].mxu1 %v5550_v12 }
 0x15f   :  { %v3222_v34 = vpop.f32.mrb[16].mxu0 }
 0x160   :  { %v3223_v47 = vpop.f32.mrb[17].mxu0 }
 0x161   :  { %v5560_v30 = vadd.f32 %v3223_v47, %v3222_v34  ;;  %v3225_v45 = vpop.f32.mrb[18].mxu0 }
 0x162   :  { %v3226_v11 = vpop.f32.mrb[19].mxu0 }
 0x163   :  { %v5562_v43 = vadd.f32 %v3226_v11, %v3225_v45  ;;  %4010 = vmatprep.mubr.f32.mxu1 %v5560_v30 }
 0x165   :  { %4011 = vmatmul.mubr.f32.gmra.mrb[24].mxu1 %v5562_v43 }
 0x167   :  { %v3228_v49 = vpop.f32.mrb[20].mxu0 }
 0x168   :  { %v3229_v57 = vpop.f32.mrb[21].mxu0 }
 0x169   :  { %v5568_v3 = vadd.f32 %v3229_v57, %v3228_v49  ;;  %v3231_v52 = vpop.f32.mrb[22].mxu0 }
 0x16a   :  { %v3232_v40 = vpop.f32.mrb[23].mxu0 }
 0x16b   :  { %v5570_v6 = vadd.f32 %v3232_v40, %v3231_v52  ;;  %4013 = vmatprep.mubr.f32.mxu1 %v5568_v3 }
 0x16d   :  { %4014 = vmatmul.mubr.f32.gmra.mrb[26].mxu1 %v5570_v6 }
 0x16f   :  { %v3234_v45 = vpop.f32.mrb[24].mxu0 }
 0x170   :  { %v3235_v34 = vpop.f32.mrb[25].mxu0 }
 0x171   :  { %v5576_v47 = vadd.f32 %v3235_v34, %v3234_v45  ;;  %v3237_v17 = vpop.f32.mrb[26].mxu0 }
 0x172   :  { %v3238_v5 = vpop.f32.mrb[27].mxu0 }
 0x173   :  { %v5578_v1 = vadd.f32 %v3238_v5, %v3237_v17  ;;  %4016 = vmatprep.mubr.f32.mxu1 %v5576_v47 }
 0x175   :  { %4017 = vmatmul.mubr.f32.gmra.mrb[28].mxu1 %v5578_v1 }
 0x177   :  { %v3240_v52 = vpop.f32.mrb[28].mxu0 }
 0x178   :  { %v3241_v49 = vpop.f32.mrb[29].mxu0 }
 0x179   :  { %v5584_v57 = vadd.f32 %v3241_v49, %v3240_v52  ;;  %v3243_v11 = vpop.f32.mrb[30].mxu0 }
 0x17a   :  { %v3244_v26 = vpop.f32.mrb[31].mxu0 }
 0x17b   :  { %v5586_v0 = vadd.f32 %v3244_v26, %v3243_v11  ;;  %4019 = vmatprep.mubr.f32.mxu1 %v5584_v57  ;;  %v6316_v11 = vpack.c.bf16 %v5508_v59, %v5504_v46 }
 0x17d   :  { %4020 = vmatmul.mubr.f32.gmra.mrb[30].mxu1 %v5586_v0 }
 0x17f   :  { %v3246_v17 = vpop.f32.mrb[32].mxu0 }
 0x180   :  { %v3247_v45 = vpop.f32.mrb[33].mxu0 }
 0x181   :  { %v3248_v34 = vadd.f32 %v3247_v45, %v3246_v17  ;;  %v3249_v40 = vpop.f32.mrb[34].mxu0 }
 0x182   :  { %v3250_v20 = vpop.f32.mrb[35].mxu0 }
 0x183   :  { %v3251_v48 = vadd.f32 %v3250_v20, %v3249_v40  ;;  %4022 = vmatprep.mubr.f32.mxu1 %v3248_v34 }
 0x185   :  { %v971_v52 = vpack.c.bf16 %v3251_v48, %v3248_v34  ;;  %4023 = vmatmul.mubr.f32.gmra.mrb[32].mxu1 %v3251_v48  ;;  %v6317_v48 = vpack.c.bf16 %v5522_v31, %v5518_v36  ;;  %v6319_v36 = vpack.c.bf16 %v5550_v12, %v5546_v18  ;;  %v6323_v12 = vpack.c.bf16 %v5570_v6, %v5568_v3 }
 0x186   :  { %v6324_v18 = vpack.c.bf16 %v5539_v53, %v5534_v37  ;;  %v6326_v6 = vpack.c.bf16 %v5553_v7, %v5548_v54 }
 0x187   :  { %v3252_v49 = vpop.f32.mrb[36].mxu0  ;;  %3390 = vmatprep.subr.bf16.mxu0 %v971_v52 }
 0x188   :  { %v3253_v26 = vpop.f32.mrb[37].mxu0  ;;  %3391 = vmatpush3.bf16.msra.mxu0 %v6316_v11  ;;  %v6327_v11 = vpack.c.bf16 %v5586_v0, %v5584_v57  ;;  %v157_v57 = vld [vmem:[#allocation7 + $0x68] sm:$0xff] }
 0x189   :  { %v3254_v44 = vadd.f32 %v3253_v26, %v3252_v49  ;;  %v3255_v5 = vpop.f32.mrb[38].mxu0  ;;  %v6322_v26 = vpack.c.bf16 %v5525_v25, %v5520_v55 }
 0x18a   :  { %v3256_v41 = vpop.f32.mrb[39].mxu0 }
 0x18b   :  { %v3257_v19 = vadd.f32 %v3256_v41, %v3255_v5  ;;  %4025 = vmatprep.mubr.f32.mxu1 %v3254_v44 }
 0x18d   :  { %v972_v39 = vpack.c.bf16 %v3257_v19, %v3254_v44  ;;  %4026 = vmatmul.mubr.f32.gmra.mrb[34].mxu1 %v3257_v19  ;;  %v6318_v44 = vpack.c.bf16 %v5536_v23, %v5532_v24  ;;  %v6320_v23 = vpack.c.bf16 %v5511_v38, %v5506_v42  ;;  %v6321_v24 = vpack.c.bf16 %v5562_v43, %v5560_v30  ;;  %v146_v30 = vld [vmem:[#allocation7 + $0x10] sm:$0xff]  ;;  %v147_v43 = vld [vmem:[#allocation7 + $0x18] sm:$0xff] }
 0x18e   :  { %v4562_v3 = vpack.c.bf16 %v147_v43, %v146_v30  ;;  %v6349_v30 = vld [vmem:[#allocation25_spill] sm:$0xff]  ;;  %v6352_v43 = vld [vmem:[#allocation27_spill] sm:$0xff] }
 0x18f   :  { %v3258_v17 = vpop.f32.mrb[40].mxu0  ;;  %3392 = vmatprep.subr.bf16.mxu0 %v972_v39 }
 0x190   :  { %v3259_v20 = vpop.f32.mrb[41].mxu0  ;;  %3393 = vmatpush3.bf16.msra.mxu0 %v6317_v48  ;;  %v154_v48 = vld [vmem:[#allocation7 + $0x50] sm:$0xff] }
 0x191   :  { %v3260_v40 = vadd.f32 %v3259_v20, %v3258_v17  ;;  %v3261_v45 = vpop.f32.mrb[42].mxu0  ;;  %v151_v17 = vld [vmem:[#allocation7 + $0x38] sm:$0xff]  ;;  %v153_v20 = vld [vmem:[#allocation7 + $0x48] sm:$0xff] }
 0x192   :  { %v3262_v34 = vpop.f32.mrb[43].mxu0 }
 0x193   :  { %v3263_v52 = vadd.f32 %v3262_v34, %v3261_v45  ;;  %4028 = vmatprep.mubr.f32.mxu1 %v3260_v40  ;;  %v158_v45 = vld [vmem:[#allocation7 + $0x70] sm:$0xff]  ;;  %v159_v34 = vld [vmem:[#allocation7 + $0x78] sm:$0xff] }
 0x195   :  { %v973_v46 = vpack.c.bf16 %v3263_v52, %v3260_v40  ;;  %4029 = vmatmul.mubr.f32.gmra.mrb[36].mxu1 %v3263_v52  ;;  %v155_v40 = vld [vmem:[#allocation7 + $0x58] sm:$0xff]  ;;  %v4586_v52 = vpack.c.bf16 %v159_v34, %v158_v45 }
 0x196   :  { %v4578_v0 = vpack.c.bf16 %v155_v40, %v154_v48  ;;  %v6359_v48 = vld [vmem:[#allocation36_spill] sm:$0xff]  ;;  %v6360_v40 = vld [vmem:[#allocation37_spill] sm:$0xff]  ;;  %v6365_v45 = vld [vmem:[#allocation42_spill] sm:$0xff] }
 0x197   :  { %v3264_v59 = vpop.f32.mrb[44].mxu0  ;;  %3394 = vmatprep.subr.bf16.mxu0 %v973_v46  ;;  %v1205_v46 = vld [vmem:[#allocation7 + $0x108] sm:$0xff] }
 0x198   :  { %v3265_v41 = vpop.f32.mrb[45].mxu0  ;;  %3395 = vmatpush3.bf16.msra.mxu0 %v6318_v44 }
 0x199   :  { %v3266_v39 = vadd.f32 %v3265_v41, %v3264_v59  ;;  %v3267_v19 = vpop.f32.mrb[46].mxu0  ;;  %v1206_v59 = vld [vmem:[#allocation7 + $0x110] sm:$0xff]  ;;  %v1207_v41 = vld [vmem:[#allocation7 + $0x118] sm:$0xff] }
 0x19a   :  { %v3268_v5 = vpop.f32.mrb[47].mxu0  ;;  %v4594_v44 = vpack.c.bf16 %v1207_v41, %v1206_v59 }
 0x19b   :  { %v3269_v49 = vadd.f32 %v3268_v5, %v3267_v19  ;;  %4031 = vmatprep.mubr.f32.mxu1 %v3266_v39  ;;  %v1210_v19 = vld [vmem:[#allocation7 + $0x130] sm:$0xff]  ;;  %v1211_v5 = vld [vmem:[#allocation7 + $0x138] sm:$0xff] }
 0x19d   :  { %v974_v31 = vpack.c.bf16 %v3269_v49, %v3266_v39  ;;  %4032 = vmatmul.mubr.f32.gmra.mrb[38].mxu1 %v3269_v49  ;;  %v6339_v49 = vld [vmem:[#allocation46_spill] sm:$0xff] }
 0x19e   :  { %4034 = vmatprep.mubr.f32.mxu1 %v5506_v42  ;;  %v144_v42 = vld [vmem:[#allocation7] sm:$0xff] }
 0x19f   :  { %3396 = vmatprep.subr.bf16.mxu0 %v974_v31  ;;  %v6340_v31 = vld [vmem:[#allocation19_spill] sm:$0xff] }
 0x1a0   :  { %3397 = vmatpush3.bf16.msra.mxu0 %v6319_v36  ;;  %v6341_v36 = vld [vmem:[#allocation47_spill] sm:$0xff] }
 0x1a1   :  { %4035 = vmatmul.mubr.f32.gmra.mrb[40].mxu1 %v5511_v38  ;;  %3398 = vmatprep.subr.bf16.mxu0 %v6320_v23  ;;  %v145_v38 = vld [vmem:[#allocation7 + $0x8] sm:$0xff] }
 0x1a2   :  { %4037 = vmatprep.mubr.f32.mxu1 %v5520_v55  ;;  %v4558_v55 = vpack.c.bf16 %v145_v38, %v144_v42  ;;  %v6342_v23 = vld [vmem:[#allocation20_spill] sm:$0xff]  ;;  %v6347_v42 = vld [vmem:[#allocation49_spill] sm:$0xff] }
 0x1a3   :  { %v6348_v38 = vld [vmem:[#allocation24_spill] sm:$0xff] }
 0x1a4   :  { %3399 = vmatpush3.bf16.msra.mxu0 %v6321_v24  ;;  %4559 = vmatprep.subr.bf16.mxu1 %v4558_v55  ;;  %v6343_v24 = vld [vmem:[#allocation21_spill] sm:$0xff] }
 0x1a5   :  { %4038 = vmatmul.mubr.f32.gmra.mrb[42].mxu1 %v5525_v25  ;;  %3400 = vmatprep.subr.bf16.mxu0 %v6322_v26  ;;  %v6325_v25 = vpack.c.bf16 %v5578_v1, %v5576_v47  ;;  %v150_v47 = vld [vmem:[#allocation7 + $0x30] sm:$0xff]  ;;  %v6344_v26 = vld [vmem:[#allocation22_spill] sm:$0xff] }
 0x1a6   :  { %4040 = vmatprep.mubr.f32.mxu1 %v5534_v37  ;;  %v149_v37 = vld [vmem:[#allocation7 + $0x28] sm:$0xff]  ;;  %4561 = vmatpush3.bf16.msra.mxu1 %v4558_v55  ;;  %v6351_v55 = vld [vmem:[#allocation50_spill] sm:$0xff] }
 0x1a7   :  { %4563 = vmatprep.subr.bf16.mxu1 %v4562_v3 }
 0x1a8   :  { %3401 = vmatpush3.bf16.msra.mxu0 %v6323_v12  ;;  %v6345_v12 = vld [vmem:[#allocation48_spill] sm:$0xff] }
 0x1a9   :  { %4041 = vmatmul.mubr.f32.gmra.mrb[44].mxu1 %v5539_v53  ;;  %3402 = vmatprep.subr.bf16.mxu0 %v6324_v18  ;;  %v148_v53 = vld [vmem:[#allocation7 + $0x20] sm:$0xff] }
 0x1aa   :  { %4043 = vmatprep.mubr.f32.mxu1 %v5548_v54  ;;  %v4566_v1 = vpack.c.bf16 %v149_v37, %v148_v53  ;;  %4565 = vmatpush3.bf16.msra.mxu1 %v4562_v3  ;;  %v152_v54 = vld [vmem:[#allocation7 + $0x40] sm:$0xff]  ;;  %v1217_v53 = vld [vmem:[#allocation7 + $0x168] sm:$0xff] }
 0x1ab   :  { %v6346_v18 = vld [vmem:[#allocation23_spill] sm:$0xff]  ;;  %v6354_v37 = vld [vmem:[#allocation28_spill] sm:$0xff] }
 0x1ac   :  { %3403 = vmatpush3.bf16.msra.mxu0 %v6325_v25  ;;  %4567 = vmatprep.subr.bf16.mxu1 %v4566_v1  ;;  %v6350_v25 = vld [vmem:[#allocation26_spill] sm:$0xff]  ;;  %v1216_v3 = vld [vmem:[#allocation7 + $0x160] sm:$0xff] }
 0x1ad   :  { %4044 = vmatmul.mubr.f32.gmra.mrb[46].mxu1 %v5553_v7  ;;  %3404 = vmatprep.subr.bf16.mxu0 %v6326_v6  ;;  %v4570_v7 = vpack.c.bf16 %v151_v17, %v150_v47  ;;  %v6353_v6 = vld [vmem:[#allocation51_spill] sm:$0xff]  ;;  %v1218_v47 = vld [vmem:[#allocation7 + $0x170] sm:$0xff]  ;;  %v1219_v17 = vld [vmem:[#allocation7 + $0x178] sm:$0xff] }
 0x1ae   :  { %4078 = vmatprep.mubr.f32.mxu1 %v5315_v2  ;;  %4569 = vmatpush3.bf16.msra.mxu1 %v4566_v1  ;;  %v4574_v2 = vpack.c.bf16 %v153_v20, %v152_v54  ;;  %v6355_v1 = vld [vmem:[#allocation31_spill] sm:$0xff]  ;;  %v4618_v54 = vpack.c.bf16 %v1219_v17, %v1218_v47  ;;  %v6357_v20 = vld [vmem:[#allocation52_spill] sm:$0xff] }
 0x1af   :  { %4571 = vmatprep.subr.bf16.mxu1 %v4570_v7 }
 0x1b0   :  { %3405 = vmatpush3.bf16.msra.mxu0 %v6327_v11  ;;  %v4614_v11 = vpack.c.bf16 %v1217_v53, %v1216_v3  ;;  %v4988_v3 = vld [vmem:[#allocation5 + $0x38] sm:$0xff] }
 0x1b2   :  { %4573 = vmatpush3.bf16.msra.mxu1 %v4570_v7  ;;  %v6356_v7 = vld [vmem:[#allocation32_spill] sm:$0xff] }
 0x1b3   :  { %1012 = vmatmul.mubr.bf16.vlgmr.msra.gmra.mrb[48].mxu0 %v5413_v50  ;;  %4575 = vmatprep.subr.bf16.mxu1 %v4574_v2  ;;  %v156_v50 = vld [vmem:[#allocation7 + $0x60] sm:$0xff] }
 0x1b4   :  { %1019 = vmatprep.mubr.bf16.mxu0 %v5415_v51  ;;  %v4582_v51 = vpack.c.bf16 %v157_v57, %v156_v50  ;;  %v6362_v50 = vld [vmem:[#allocation39_spill] sm:$0xff]  ;;  %v6363_v57 = vld [vmem:[#allocation40_spill] sm:$0xff] }
 0x1b6   :  { %4577 = vmatpush3.bf16.msra.mxu1 %v4574_v2  ;;  %v6358_v2 = vld [vmem:[#allocation34_spill] sm:$0xff] }
 0x1b7   :  { %4579 = vmatprep.subr.bf16.mxu1 %v4578_v0 }
 0x1ba   :  { %4581 = vmatpush3.bf16.msra.mxu1 %v4578_v0  ;;  %v6361_v0 = vld [vmem:[#allocation38_spill] sm:$0xff] }
 0x1bb   :  { %1020 = vmatmul.mubr.bf16.gmra.mrb[52].mxu0 %v5425_v62  ;;  %4583 = vmatprep.subr.bf16.mxu1 %v4582_v51  ;;  %v1204_v62 = vld [vmem:[#allocation7 + $0x100] sm:$0xff] }
 0x1bc   :  { %1027 = vmatprep.mubr.bf16.mxu0 %v5427_v63  ;;  %v4590_v63 = vpack.c.bf16 %v1205_v46, %v1204_v62 }
 0x1be   :  { %4585 = vmatpush3.bf16.msra.mxu1 %v4582_v51  ;;  %v6364_v51 = vld [vmem:[#allocation41_spill] sm:$0xff] }
 0x1bf   :  { %4587 = vmatprep.subr.bf16.mxu1 %v4586_v52 }
 0x1c2   :  { %4589 = vmatpush3.bf16.msra.mxu1 %v4586_v52 }
 0x1c3   :  { %1028 = vmatmul.mubr.bf16.gmra.mrb[56].mxu0 %v5437_v28  ;;  %4591 = vmatprep.subr.bf16.mxu1 %v4590_v63  ;;  %v1208_v28 = vld [vmem:[#allocation7 + $0x120] sm:$0xff] }
 0x1c4   :  { %1035 = vmatprep.mubr.bf16.mxu0 %v5439_v32  ;;  %v1209_v32 = vld [vmem:[#allocation7 + $0x128] sm:$0xff] }
 0x1c5   :  { %4079 = vmatmul.mubr.f32.vlgmr.msra.gmra.mrb[16].mxu1 %v5319_v4  ;;  %v4598_v39 = vpack.c.bf16 %v1209_v32, %v1208_v28  ;;  %v4602_v4 = vpack.c.bf16 %v1211_v5, %v1210_v19 }
 0x1c6   :  { %4081 = vmatprep.mubr.f32.mxu1 %v5329_v9  ;;  %4593 = vmatpush3.bf16.msra.mxu1 %v4590_v63  ;;  %v1213_v9 = vld [vmem:[#allocation7 + $0x148] sm:$0xff] }
 0x1c7   :  { %4595 = vmatprep.subr.bf16.mxu1 %v4594_v44 }
 0x1c9   :  { %4082 = vmatmul.mubr.f32.gmra.mrb[18].mxu1 %v5331_v10 }
 0x1ca   :  { %4084 = vmatprep.mubr.f32.mxu1 %v5341_v15  ;;  %4597 = vmatpush3.bf16.msra.mxu1 %v4594_v44  ;;  %v4981_v44 = vld [vmem:[#allocation5] sm:$0xff] }
 0x1cb   :  { %1036 = vmatmul.mubr.bf16.gmra.mrb[60].mxu0 %v5449_v56  ;;  %4599 = vmatprep.subr.bf16.mxu1 %v4598_v39  ;;  %v1212_v56 = vld [vmem:[#allocation7 + $0x140] sm:$0xff] }
 0x1cc   :  { %1043 = vmatprep.mubr.bf16.mxu0 %v5453_v58  ;;  %v4606_v10 = vpack.c.bf16 %v1213_v9, %v1212_v56  ;;  %v1214_v58 = vld [vmem:[#allocation7 + $0x150] sm:$0xff] }
 0x1cd   :  { %4085 = vmatmul.mubr.f32.gmra.mrb[20].mxu1 %v5343_v16  ;;  %v6328_v16 = vld [vmem:[#allocation29_spill] sm:$0xff] }
 0x1ce   :  { %4087 = vmatprep.mubr.f32.mxu1 %v5353_v21  ;;  %4601 = vmatpush3.bf16.msra.mxu1 %v4598_v39  ;;  %v6329_v21 = vld [vmem:[#allocation43_spill] sm:$0xff]  ;;  %v4982_v39 = vld [vmem:[#allocation5 + $0x8] sm:$0xff] }
 0x1cf   :  { %4603 = vmatprep.subr.bf16.mxu1 %v4602_v4 }
 0x1d1   :  { %4088 = vmatmul.mubr.f32.gmra.mrb[22].mxu1 %v5355_v22  ;;  %v6330_v22 = vld [vmem:[#allocation30_spill] sm:$0xff] }
 0x1d2   :  { %4090 = vmatprep.mubr.f32.mxu1 %v5365_v27  ;;  %4605 = vmatpush3.bf16.msra.mxu1 %v4602_v4  ;;  %v6331_v27 = vld [vmem:[#allocation33_spill] sm:$0xff] }
 0x1d3   :  { %1044 = vmatmul.mubr.bf16.gmra.mrb[64].mxu0 %v5458_v60  ;;  %v1215_v60 = vld [vmem:[#allocation7 + $0x158] sm:$0xff]  ;;  %4607 = vmatprep.subr.bf16.mxu1 %v4606_v10 }
 0x1d4   :  { %1051 = vmatprep.mubr.bf16.mxu0 %v5460_v61  ;;  %v4610_v15 = vpack.c.bf16 %v1215_v60, %v1214_v58  ;;  %v6332_v61 = vld [vmem:[#allocation35_spill] sm:$0xff] }
 0x1d5   :  { %4091 = vmatmul.mubr.f32.gmra.mrb[24].mxu1 %v5369_v29  ;;  %v6333_v29 = vld [vmem:[#allocation44_spill] sm:$0xff] }
 0x1d6   :  { %4093 = vmatprep.mubr.f32.mxu1 %v5378_v33  ;;  %4609 = vmatpush3.bf16.msra.mxu1 %v4606_v10  ;;  %v6334_v33 = vld [vmem:[#allocation15_spill] sm:$0xff] }
 0x1d7   :  { %4611 = vmatprep.subr.bf16.mxu1 %v4610_v15 }
 0x1d9   :  { %4094 = vmatmul.mubr.f32.gmra.mrb[26].mxu1 %v5382_v35  ;;  %v6336_v35 = vld [vmem:[#allocation16_spill] sm:$0xff] }
 0x1da   :  { %4096 = vmatprep.mubr.f32.mxu1 %v6328_v16  ;;  %4613 = vmatpush3.bf16.msra.mxu1 %v4610_v15  ;;  %v4983_v15 = vld [vmem:[#allocation5 + $0x10] sm:$0xff] }
 0x1db   :  { %1052 = vmatmul.mubr.bf16.gmra.mrb[68].mxu0 %v5464_v8  ;;  %v6335_v8 = vld [vmem:[#allocation45_spill] sm:$0xff]  ;;  %4615 = vmatprep.subr.bf16.mxu1 %v4614_v11 }
 0x1dc   :  { %1059 = vmatprep.mubr.bf16.mxu0 %v5466_v13  ;;  %v6337_v13 = vld [vmem:[#allocation17_spill] sm:$0xff] }
 0x1dd   :  { %4097 = vmatmul.mubr.f32.gmra.mrb[28].mxu1 %v6330_v22  ;;  %v4984_v22 = vld [vmem:[#allocation5 + $0x18] sm:$0xff] }
 0x1de   :  { %4099 = vmatprep.mubr.f32.mxu1 %v6331_v27  ;;  %4617 = vmatpush3.bf16.msra.mxu1 %v4614_v11 }
 0x1df   :  { %4619 = vmatprep.subr.bf16.mxu1 %v4618_v54 }
 0x1e1   :  { %4100 = vmatmul.mubr.f32.gmra.mrb[30].mxu1 %v6332_v61 }
 0x1e2   :  { %4102 = vmatprep.mubr.f32.mxu1 %v6334_v33  ;;  %4621 = vmatpush3.bf16.msra.mxu1 %v4618_v54 }
 0x1e3   :  { %1060 = vmatmul.mubr.bf16.gmra.mrb[72].mxu0 %v5470_v14  ;;  %v6338_v14 = vld [vmem:[#allocation18_spill] sm:$0xff] }
 0x1e4   :  { %1067 = vmatprep.mubr.bf16.mxu0 %v6329_v21 }
 0x1e5   :  { %4103 = vmatmul.mubr.f32.gmra.mrb[32].mxu1 %v6336_v35 }
 0x1e6   :  { %4105 = vmatprep.mubr.f32.mxu1 %v6337_v13 }
 0x1e9   :  { %4106 = vmatmul.mubr.f32.gmra.mrb[34].mxu1 %v6338_v14 }
 0x1ea   :  { %4108 = vmatprep.mubr.f32.mxu1 %v6340_v31 }
 0x1eb   :  { %1068 = vmatmul.mubr.bf16.gmra.mrb[76].mxu0 %v6333_v29 }
 0x1ec   :  { %1075 = vmatprep.mubr.bf16.mxu0 %v6335_v8 }
 0x1ed   :  { %4109 = vmatmul.mubr.f32.gmra.mrb[36].mxu1 %v6342_v23  ;;  %v4986_v23 = vld [vmem:[#allocation5 + $0x28] sm:$0xff] }
 0x1ee   :  { %4111 = vmatprep.mubr.f32.mxu1 %v6343_v24 }
 0x1f1   :  { %4112 = vmatmul.mubr.f32.gmra.mrb[38].mxu1 %v6344_v26 }
 0x1f2   :  { %4114 = vmatprep.mubr.f32.mxu1 %v6346_v18 }
 0x1f3   :  { %1076 = vmatmul.mubr.bf16.gmra.mrb[80].mxu0 %v6339_v49  ;;  %v4985_v49 = vld [vmem:[#allocation5 + $0x20] sm:$0xff] }
 0x1f4   :  { %1083 = vmatprep.mubr.bf16.mxu0 %v6341_v36 }
 0x1f5   :  { %4115 = vmatmul.mubr.f32.gmra.mrb[40].mxu1 %v6348_v38 }
 0x1f6   :  { %4117 = vmatprep.mubr.f32.mxu1 %v6349_v30 }
 0x1f9   :  { %4118 = vmatmul.mubr.f32.gmra.mrb[42].mxu1 %v6350_v25 }
 0x1fa   :  { %4120 = vmatprep.mubr.f32.mxu1 %v6352_v43 }
 0x1fb   :  { %1084 = vmatmul.mubr.bf16.gmra.mrb[84].mxu0 %v6345_v12 }
 0x1fc   :  { %1091 = vmatprep.mubr.bf16.mxu0 %v6347_v42 }
 0x1fd   :  { %4121 = vmatmul.mubr.f32.gmra.mrb[44].mxu1 %v6354_v37 }
 0x1fe   :  { %4123 = vmatprep.mubr.f32.mxu1 %v6355_v1 }
 0x201   :  { %4124 = vmatmul.mubr.f32.gmra.mrb[46].mxu1 %v6356_v7 }
 0x203   :  { %1092 = vmatmul.mubr.bf16.gmra.mrb[88].mxu0 %v6351_v55  ;;  %v4987_v55 = vld [vmem:[#allocation5 + $0x30] sm:$0xff] }
 0x204   :  { %1099 = vmatprep.mubr.bf16.mxu0 %v6353_v6 }
 0x20b   :  { %1100 = vmatmul.mubr.bf16.gmra.mrb[92].mxu0 %v6357_v20  ;;  %v4989_v20 = vld [vmem:[#allocation5 + $0x40] sm:$0xff] }
 0x20c   :  { %1107 = vmatprep.mubr.bf16.mxu0 %v6358_v2 }
 0x213   :  { %1108 = vmatmul.mubr.bf16.gmra.mrb[96].mxu0 %v6359_v48 }
 0x214   :  { %1115 = vmatprep.mubr.bf16.mxu0 %v6360_v40  ;;  %v4990_v40 = vld [vmem:[#allocation5 + $0x48] sm:$0xff] }
 0x21b   :  { %1116 = vmatmul.mubr.bf16.gmra.mrb[100].mxu0 %v6361_v0 }
 0x21c   :  { %1123 = vmatprep.mubr.bf16.mxu0 %v6362_v50 }
 0x223   :  { %1124 = vmatmul.mubr.bf16.gmra.mrb[104].mxu0 %v6363_v57 }
 0x224   :  { %1131 = vmatprep.mubr.bf16.mxu0 %v6364_v51 }
 0x22b   :  { %1132 = vmatmul.mubr.bf16.gmra.mrb[108].mxu0 %v6365_v45 }
 0x286   :  { %v3406_v34 = vpop.f32.mrb[48].mxu0 }
 0x287   :  { %v3407_v52 = vpop.f32.mrb[49].mxu0 }
 0x288   :  { %v3408_v62 = vadd.f32 %v3407_v52, %v3406_v34  ;;  %v3409_v46 = vpop.f32.mrb[50].mxu0 }
 0x289   :  { %v3410_v63 = vpop.f32.mrb[51].mxu0 }
 0x28a   :  { %v1140_v59 = vmul.f32 2.0, %v3408_v62  ;;  %v3411_v41 = vadd.f32 %v3410_v63, %v3409_v46  ;;  %v4991_v46 = vld [vmem:[#allocation5 + $0x50] sm:$0xff] }
 0x28c   :  { %v1172_v28 = vsub.f32 %v1140_v59, %v4981_v44  ;;  %v1141_v32 = vmul.f32 2.0, %v3411_v41  ;;  %v4992_v41 = vld [vmem:[#allocation5 + $0x58] sm:$0xff] }
 0x28e   :  { %v1173_v19 = vsub.f32 %v1141_v32, %v4982_v39  ;;  %v3412_v5 = vpop.f32.mrb[52].mxu0  ;;  %4158 = vmatprep.mubr.f32.mxu1 %v1172_v28 }
 0x28f   :  { %v3413_v4 = vpop.f32.mrb[53].mxu0 }
 0x290   :  { %v3414_v56 = vadd.f32 %v3413_v4, %v3412_v5  ;;  %v3415_v9 = vpop.f32.mrb[54].mxu0  ;;  %4159 = vmatmul.mubr.f32.vlgmr.msra.gmra.mrb[16].mxu1 %v1173_v19 }
 0x291   :  { %v3416_v10 = vpop.f32.mrb[55].mxu0 }
 0x292   :  { %v1142_v58 = vmul.f32 2.0, %v3414_v56  ;;  %v3417_v60 = vadd.f32 %v3416_v10, %v3415_v9  ;;  %v4993_v9 = vld [vmem:[#allocation5 + $0x60] sm:$0xff] }
 0x294   :  { %v1174_v16 = vsub.f32 %v1142_v58, %v4983_v15  ;;  %v1143_v21 = vmul.f32 2.0, %v3417_v60  ;;  %v4994_v60 = vld [vmem:[#allocation5 + $0x68] sm:$0xff] }
 0x296   :  { %v1175_v27 = vsub.f32 %v1143_v21, %v4984_v22  ;;  %v3418_v61 = vpop.f32.mrb[56].mxu0  ;;  %4161 = vmatprep.mubr.f32.mxu1 %v1174_v16 }
 0x297   :  { %v3419_v29 = vpop.f32.mrb[57].mxu0 }
 0x298   :  { %v3420_v33 = vadd.f32 %v3419_v29, %v3418_v61  ;;  %v3421_v8 = vpop.f32.mrb[58].mxu0  ;;  %4162 = vmatmul.mubr.f32.gmra.mrb[18].mxu1 %v1175_v27 }
 0x299   :  { %v3422_v35 = vpop.f32.mrb[59].mxu0 }
 0x29a   :  { %v1144_v13 = vmul.f32 2.0, %v3420_v33  ;;  %v3423_v14 = vadd.f32 %v3422_v35, %v3421_v8  ;;  %v4995_v8 = vld [vmem:[#allocation5 + $0x70] sm:$0xff] }
 0x29c   :  { %v1176_v31 = vsub.f32 %v1144_v13, %v4985_v49  ;;  %v1145_v36 = vmul.f32 2.0, %v3423_v14  ;;  %v4996_v14 = vld [vmem:[#allocation5 + $0x78] sm:$0xff] }
 0x29e   :  { %v1177_v24 = vsub.f32 %v1145_v36, %v4986_v23  ;;  %v3424_v26 = vpop.f32.mrb[60].mxu0  ;;  %4164 = vmatprep.mubr.f32.mxu1 %v1176_v31 }
 0x29f   :  { %v3425_v12 = vpop.f32.mrb[61].mxu0 }
 0x2a0   :  { %v3426_v18 = vadd.f32 %v3425_v12, %v3424_v26  ;;  %v3427_v42 = vpop.f32.mrb[62].mxu0  ;;  %4165 = vmatmul.mubr.f32.gmra.mrb[20].mxu1 %v1177_v24 }
 0x2a1   :  { %v3428_v38 = vpop.f32.mrb[63].mxu0 }
 0x2a2   :  { %v1146_v30 = vmul.f32 2.0, %v3426_v18  ;;  %v3429_v25 = vadd.f32 %v3428_v38, %v3427_v42  ;;  %v4997_v42 = vld [vmem:[#allocation5 + $0x80] sm:$0xff] }
 0x2a4   :  { %v1178_v43 = vsub.f32 %v1146_v30, %v4987_v55  ;;  %v1147_v6 = vmul.f32 2.0, %v3429_v25  ;;  %v4998_v25 = vld [vmem:[#allocation5 + $0x88] sm:$0xff] }
 0x2a6   :  { %v1179_v53 = vsub.f32 %v1147_v6, %v4988_v3  ;;  %v3430_v37 = vpop.f32.mrb[64].mxu0  ;;  %4167 = vmatprep.mubr.f32.mxu1 %v1178_v43 }
 0x2a7   :  { %v3431_v11 = vpop.f32.mrb[65].mxu0 }
 0x2a8   :  { %v3432_v1 = vadd.f32 %v3431_v11, %v3430_v37  ;;  %v3433_v47 = vpop.f32.mrb[66].mxu0  ;;  %4168 = vmatmul.mubr.f32.gmra.mrb[22].mxu1 %v1179_v53 }
 0x2a9   :  { %v3434_v17 = vpop.f32.mrb[67].mxu0 }
 0x2aa   :  { %v1148_v7 = vmul.f32 2.0, %v3432_v1  ;;  %v3435_v54 = vadd.f32 %v3434_v17, %v3433_v47  ;;  %v4999_v47 = vld [vmem:[#allocation5 + $0x90] sm:$0xff] }
 0x2ac   :  { %v1180_v2 = vsub.f32 %v1148_v7, %v4989_v20  ;;  %v1149_v48 = vmul.f32 2.0, %v3435_v54  ;;  %v5000_v54 = vld [vmem:[#allocation5 + $0x98] sm:$0xff] }
 0x2ae   :  { %v1181_v0 = vsub.f32 %v1149_v48, %v4990_v40  ;;  %v3436_v50 = vpop.f32.mrb[68].mxu0  ;;  %4170 = vmatprep.mubr.f32.mxu1 %v1180_v2 }
 0x2af   :  { %v3437_v57 = vpop.f32.mrb[69].mxu0 }
 0x2b0   :  { %v3438_v51 = vadd.f32 %v3437_v57, %v3436_v50  ;;  %v3439_v45 = vpop.f32.mrb[70].mxu0  ;;  %4171 = vmatmul.mubr.f32.gmra.mrb[24].mxu1 %v1181_v0 }
 0x2b1   :  { %v3440_v34 = vpop.f32.mrb[71].mxu0 }
 0x2b2   :  { %v1150_v52 = vmul.f32 2.0, %v3438_v51  ;;  %v3441_v62 = vadd.f32 %v3440_v34, %v3439_v45  ;;  %v5001_v45 = vld [vmem:[#allocation5 + $0xa0] sm:$0xff] }
 0x2b4   :  { %v1182_v63 = vsub.f32 %v1150_v52, %v4991_v46  ;;  %v1151_v59 = vmul.f32 2.0, %v3441_v62  ;;  %v5002_v62 = vld [vmem:[#allocation5 + $0xa8] sm:$0xff] }
 0x2b6   :  { %v1183_v44 = vsub.f32 %v1151_v59, %v4992_v41  ;;  %v3442_v28 = vpop.f32.mrb[72].mxu0  ;;  %4173 = vmatprep.mubr.f32.mxu1 %v1182_v63 }
 0x2b7   :  { %v3443_v32 = vpop.f32.mrb[73].mxu0 }
 0x2b8   :  { %v3444_v39 = vadd.f32 %v3443_v32, %v3442_v28  ;;  %v3445_v19 = vpop.f32.mrb[74].mxu0  ;;  %4174 = vmatmul.mubr.f32.gmra.mrb[26].mxu1 %v1183_v44 }
 0x2b9   :  { %v3446_v5 = vpop.f32.mrb[75].mxu0 }
 0x2ba   :  { %v1152_v4 = vmul.f32 2.0, %v3444_v39  ;;  %v3447_v56 = vadd.f32 %v3446_v5, %v3445_v19  ;;  %v5003_v19 = vld [vmem:[#allocation5 + $0xb0] sm:$0xff] }
 0x2bc   :  { %v1184_v10 = vsub.f32 %v1152_v4, %v4993_v9  ;;  %v1153_v58 = vmul.f32 2.0, %v3447_v56  ;;  %v5004_v56 = vld [vmem:[#allocation5 + $0xb8] sm:$0xff] }
 0x2be   :  { %v1185_v15 = vsub.f32 %v1153_v58, %v4994_v60  ;;  %v3448_v16 = vpop.f32.mrb[76].mxu0  ;;  %4176 = vmatprep.mubr.f32.mxu1 %v1184_v10 }
 0x2bf   :  { %v3449_v21 = vpop.f32.mrb[77].mxu0 }
 0x2c0   :  { %v3450_v22 = vadd.f32 %v3449_v21, %v3448_v16  ;;  %v3451_v27 = vpop.f32.mrb[78].mxu0  ;;  %4177 = vmatmul.mubr.f32.gmra.mrb[28].mxu1 %v1185_v15 }
 0x2c1   :  { %v3452_v61 = vpop.f32.mrb[79].mxu0 }
 0x2c2   :  { %v1154_v29 = vmul.f32 2.0, %v3450_v22  ;;  %v3453_v33 = vadd.f32 %v3452_v61, %v3451_v27  ;;  %v5005_v27 = vld [vmem:[#allocation5 + $0xc0] sm:$0xff] }
 0x2c4   :  { %v1186_v35 = vsub.f32 %v1154_v29, %v4995_v8  ;;  %v1155_v13 = vmul.f32 2.0, %v3453_v33  ;;  %v5006_v33 = vld [vmem:[#allocation5 + $0xc8] sm:$0xff] }
 0x2c6   :  { %v1187_v49 = vsub.f32 %v1155_v13, %v4996_v14  ;;  %v3454_v31 = vpop.f32.mrb[80].mxu0  ;;  %4179 = vmatprep.mubr.f32.mxu1 %v1186_v35 }
 0x2c7   :  { %v3455_v36 = vpop.f32.mrb[81].mxu0 }
 0x2c8   :  { %v3456_v23 = vadd.f32 %v3455_v36, %v3454_v31  ;;  %v3457_v24 = vpop.f32.mrb[82].mxu0  ;;  %4180 = vmatmul.mubr.f32.gmra.mrb[30].mxu1 %v1187_v49 }
 0x2c9   :  { %v3458_v26 = vpop.f32.mrb[83].mxu0 }
 0x2ca   :  { %v1156_v12 = vmul.f32 2.0, %v3456_v23  ;;  %v3459_v18 = vadd.f32 %v3458_v26, %v3457_v24  ;;  %v5007_v24 = vld [vmem:[#allocation5 + $0xd0] sm:$0xff] }
 0x2cc   :  { %v1188_v38 = vsub.f32 %v1156_v12, %v4997_v42  ;;  %v1157_v30 = vmul.f32 2.0, %v3459_v18  ;;  %v5008_v18 = vld [vmem:[#allocation5 + $0xd8] sm:$0xff] }
 0x2ce   :  { %v1189_v55 = vsub.f32 %v1157_v30, %v4998_v25  ;;  %v3460_v43 = vpop.f32.mrb[84].mxu0  ;;  %4182 = vmatprep.mubr.f32.mxu1 %v1188_v38 }
 0x2cf   :  { %v3461_v6 = vpop.f32.mrb[85].mxu0 }
 0x2d0   :  { %v3462_v3 = vadd.f32 %v3461_v6, %v3460_v43  ;;  %v3463_v53 = vpop.f32.mrb[86].mxu0  ;;  %4183 = vmatmul.mubr.f32.gmra.mrb[32].mxu1 %v1189_v55 }
 0x2d1   :  { %v3464_v37 = vpop.f32.mrb[87].mxu0 }
 0x2d2   :  { %v1158_v11 = vmul.f32 2.0, %v3462_v3  ;;  %v3465_v1 = vadd.f32 %v3464_v37, %v3463_v53  ;;  %v5009_v53 = vld [vmem:[#allocation5 + $0xe0] sm:$0xff] }
 0x2d4   :  { %v1190_v17 = vsub.f32 %v1158_v11, %v4999_v47  ;;  %v1159_v7 = vmul.f32 2.0, %v3465_v1  ;;  %v5010_v1 = vld [vmem:[#allocation5 + $0xe8] sm:$0xff] }
 0x2d6   :  { %v1191_v20 = vsub.f32 %v1159_v7, %v5000_v54  ;;  %v3466_v2 = vpop.f32.mrb[88].mxu0  ;;  %4185 = vmatprep.mubr.f32.mxu1 %v1190_v17 }
 0x2d7   :  { %v3467_v48 = vpop.f32.mrb[89].mxu0 }
 0x2d8   :  { %v3468_v40 = vadd.f32 %v3467_v48, %v3466_v2  ;;  %v3469_v0 = vpop.f32.mrb[90].mxu0  ;;  %4186 = vmatmul.mubr.f32.gmra.mrb[34].mxu1 %v1191_v20 }
 0x2d9   :  { %v3470_v50 = vpop.f32.mrb[91].mxu0 }
 0x2da   :  { %v1160_v57 = vmul.f32 2.0, %v3468_v40  ;;  %v3471_v51 = vadd.f32 %v3470_v50, %v3469_v0  ;;  %v5011_v0 = vld [vmem:[#allocation5 + $0xf0] sm:$0xff] }
 0x2dc   :  { %v1192_v34 = vsub.f32 %v1160_v57, %v5001_v45  ;;  %v1161_v52 = vmul.f32 2.0, %v3471_v51  ;;  %v5012_v51 = vld [vmem:[#allocation5 + $0xf8] sm:$0xff] }
 0x2de   :  { %v1193_v46 = vsub.f32 %v1161_v52, %v5002_v62  ;;  %v3472_v63 = vpop.f32.mrb[92].mxu0  ;;  %4188 = vmatprep.mubr.f32.mxu1 %v1192_v34  ;;  %v5699_v34 = vld [vmem:[#allocation2 + $0x4] ss:$8 sps:$4 sm:$0xff]  }
 0x2df   :  { %v3473_v59 = vpop.f32.mrb[93].mxu0 }
 0x2e0   :  { %v3474_v41 = vadd.f32 %v3473_v59, %v3472_v63  ;;  %v3475_v44 = vpop.f32.mrb[94].mxu0  ;;  %4189 = vmatmul.mubr.f32.gmra.mrb[36].mxu1 %v1193_v46 }
 0x2e1   :  { %v3476_v28 = vpop.f32.mrb[95].mxu0 }
 0x2e2   :  { %v1162_v32 = vmul.f32 2.0, %v3474_v41  ;;  %v3477_v39 = vadd.f32 %v3476_v28, %v3475_v44 }
 0x2e4   :  { %v1194_v5 = vsub.f32 %v1162_v32, %v5003_v19  ;;  %v1163_v4 = vmul.f32 2.0, %v3477_v39 }
 0x2e6   :  { %v1195_v9 = vsub.f32 %v1163_v4, %v5004_v56  ;;  %v3478_v10 = vpop.f32.mrb[96].mxu0  ;;  %4191 = vmatprep.mubr.f32.mxu1 %v1194_v5 }
 0x2e7   :  { %v3479_v58 = vpop.f32.mrb[97].mxu0 }
 0x2e8   :  { %v3480_v60 = vadd.f32 %v3479_v58, %v3478_v10  ;;  %v3481_v15 = vpop.f32.mrb[98].mxu0  ;;  %4192 = vmatmul.mubr.f32.gmra.mrb[38].mxu1 %v1195_v9  ;;  %v5723_v10 = vld [vmem:[%s6197_s3] ss:$0 sm:$0xff] }
 0x2e9   :  { %v3482_v16 = vpop.f32.mrb[99].mxu0 }
 0x2ea   :  { %v1164_v21 = vmul.f32 2.0, %v3480_v60  ;;  %v3483_v22 = vadd.f32 %v3482_v16, %v3481_v15 }
 0x2ec   :  { %v1196_v61 = vsub.f32 %v1164_v21, %v5005_v27  ;;  %v1165_v29 = vmul.f32 2.0, %v3483_v22 }
 0x2ee   :  { %v1197_v8 = vsub.f32 %v1165_v29, %v5006_v33  ;;  %v3484_v35 = vpop.f32.mrb[100].mxu0  ;;  %4194 = vmatprep.mubr.f32.mxu1 %v1196_v61 }
 0x2ef   :  { %v3485_v13 = vpop.f32.mrb[101].mxu0 }
 0x2f0   :  { %v3486_v14 = vadd.f32 %v3485_v13, %v3484_v35  ;;  %v3487_v49 = vpop.f32.mrb[102].mxu0  ;;  %4195 = vmatmul.mubr.f32.gmra.mrb[40].mxu1 %v1197_v8 }
 0x2f1   :  { %v3488_v31 = vpop.f32.mrb[103].mxu0 }
 0x2f2   :  { %v1166_v36 = vmul.f32 2.0, %v3486_v14  ;;  %v3489_v23 = vadd.f32 %v3488_v31, %v3487_v49 }
 0x2f4   :  { %v1198_v26 = vsub.f32 %v1166_v36, %v5007_v24  ;;  %v1167_v12 = vmul.f32 2.0, %v3489_v23 }
 0x2f6   :  { %v1199_v42 = vsub.f32 %v1167_v12, %v5008_v18  ;;  %v3490_v38 = vpop.f32.mrb[104].mxu0  ;;  %4197 = vmatprep.mubr.f32.mxu1 %v1198_v26 }
 0x2f7   :  { %v3491_v30 = vpop.f32.mrb[105].mxu0 }
 0x2f8   :  { %v3492_v25 = vadd.f32 %v3491_v30, %v3490_v38  ;;  %v3493_v55 = vpop.f32.mrb[106].mxu0  ;;  %4198 = vmatmul.mubr.f32.gmra.mrb[42].mxu1 %v1199_v42 }
 0x2f9   :  { %v3494_v43 = vpop.f32.mrb[107].mxu0 }
 0x2fa   :  { %v1168_v6 = vmul.f32 2.0, %v3492_v25  ;;  %v3495_v3 = vadd.f32 %v3494_v43, %v3493_v55 }
 0x2fc   :  { %v1200_v37 = vsub.f32 %v1168_v6, %v5009_v53  ;;  %v1169_v11 = vmul.f32 2.0, %v3495_v3 }
 0x2fe   :  { %v1201_v47 = vsub.f32 %v1169_v11, %v5010_v1  ;;  %v3496_v17 = vpop.f32.mrb[108].mxu0  ;;  %4200 = vmatprep.mubr.f32.mxu1 %v1200_v37 }
 0x2ff   :  { %v3497_v7 = vpop.f32.mrb[109].mxu0 }
 0x300   :  { %v3498_v54 = vadd.f32 %v3497_v7, %v3496_v17  ;;  %v3499_v20 = vpop.f32.mrb[110].mxu0  ;;  %4201 = vmatmul.mubr.f32.gmra.mrb[44].mxu1 %v1201_v47 }
 0x301   :  { %v3500_v2 = vpop.f32.mrb[111].mxu0 }
 0x302   :  { %v1170_v48 = vmul.f32 2.0, %v3498_v54  ;;  %v3501_v40 = vadd.f32 %v3500_v2, %v3499_v20 }
 0x304   :  { %v1202_v50 = vsub.f32 %v1170_v48, %v5011_v0  ;;  %v1171_v57 = vmul.f32 2.0, %v3501_v40 }
 0x306   :  { %v1203_v45 = vsub.f32 %v1171_v57, %v5012_v51  ;;  %4203 = vmatprep.mubr.f32.mxu1 %v1202_v50 }
 0x308   :  { %4204 = vmatmul.mubr.f32.gmra.mrb[46].mxu1 %v1203_v45 }
 0x309   :  { %1676 = vmatprep.mubr.bf16.mxu1 %v5699_v34 }
 0x363   :  { %v4160_v52 = vpop.f32.mrb[16].mxu1 }
 0x364   :  { %v1286_v62 = vpop.f32.mrb[17].mxu1  ;;  %v1485_v60 = vadd.f32 %v4160_v52, %v5723_v10 }
 0x365   :  { %v1484_v15 = vadd.f32 %v5723_v10, %v1286_v62 }
 0x366   :  { %v1549_v16 = vmul.f32 0.01, %v1485_v60  ;;  %vm1517_vm0 = vcmp.gt.f32.partialorder %v1485_v60, 0.0 }
 0x367   :  { %v1548_v22 = vmul.f32 0.01, %v1484_v15  ;;  %vm1516_vm1 = vcmp.gt.f32.partialorder %v1484_v15, 0.0 }
 0x368   :  { %v5731_v8 = vsel %vm1517_vm0, %v1485_v60, %v1549_v16 }
 0x369   :  { %v5733_v13 = vsel %vm1516_vm1, %v1484_v15, %v1548_v22 }
 0x36a   :  { %v1628_v24 = vpack.c.bf16 %v5731_v8, %v5733_v13 }
 0x36b   :  { %v4163_v46 = vpop.f32.mrb[18].mxu1 }
 0x36c   :  { %v1296_v63 = vpop.f32.mrb[19].mxu1  ;;  %v1487_v14 = vadd.f32 %v4163_v46, %v5723_v10 }
 0x36d   :  { %v1486_v49 = vadd.f32 %v5723_v10, %v1296_v63 }
 0x36e   :  { %v1551_v12 = vmul.f32 0.01, %v1487_v14  ;;  %vm1519_vm4 = vcmp.gt.f32.partialorder %v1487_v14, 0.0 }
 0x36f   :  { %v1550_v18 = vmul.f32 0.01, %v1486_v49  ;;  %vm1518_vm5 = vcmp.gt.f32.partialorder %v1486_v49, 0.0 }
 0x370   :  { %v5748_v6 = vsel %vm1519_vm4, %v1487_v14, %v1551_v12 }
 0x371   :  { %v5750_v3 = vsel %vm1518_vm5, %v1486_v49, %v1550_v18 }
 0x372   :  { %v1629_v47 = vpack.c.bf16 %v5748_v6, %v5750_v3 }
 0x373   :  { %v4166_v59 = vpop.f32.mrb[20].mxu1 }
 0x374   :  { %v1306_v41 = vpop.f32.mrb[21].mxu1  ;;  %v1489_v55 = vadd.f32 %v4166_v59, %v5723_v10 }
 0x375   :  { %v1488_v53 = vadd.f32 %v5723_v10, %v1306_v41 }
 0x376   :  { %v1553_v17 = vmul.f32 0.01, %v1489_v55  ;;  %vm1521_vm8 = vcmp.gt.f32.partialorder %v1489_v55, 0.0 }
 0x377   :  { %v1552_v54 = vmul.f32 0.01, %v1488_v53  ;;  %vm1520_vm9 = vcmp.gt.f32.partialorder %v1488_v53, 0.0 }
 0x378   :  { %v5763_v0 = vsel %vm1521_vm8, %v1489_v55, %v1553_v17 }
 0x379   :  { %v5765_v57 = vsel %vm1520_vm9, %v1488_v53, %v1552_v54 }
 0x37a   :  { %v1630_v63 = vpack.c.bf16 %v5763_v0, %v5765_v57 }
 0x37b   :  { %v5702_v44 = vpop.f32.mrb[22].mxu1 }
 0x37c   :  { %v5704_v28 = vpop.f32.mrb[23].mxu1  ;;  %v1491_v51 = vadd.f32 %v5702_v44, %v5723_v10 }
 0x37d   :  { %v1490_v45 = vadd.f32 %v5723_v10, %v5704_v28 }
 0x37e   :  { %v1555_v41 = vmul.f32 0.01, %v1491_v51  ;;  %vm1523_vm12 = vcmp.gt.f32.partialorder %v1491_v51, 0.0 }
 0x37f   :  { %v1554_v60 = vmul.f32 0.01, %v1490_v45  ;;  %vm1522_vm13 = vcmp.gt.f32.partialorder %v1490_v45, 0.0 }
 0x383   :  { %v5706_v32 = vpop.f32.mrb[24].mxu1 }
 0x384   :  { %v5708_v39 = vpop.f32.mrb[25].mxu1 }
 0x38b   :  { %v5710_v19 = vpop.f32.mrb[26].mxu1 }
 0x38c   :  { %v5712_v5 = vpop.f32.mrb[27].mxu1 }
 0x38d   :  { %v1494_v55 = vadd.f32 %v5723_v10, %v5712_v5 }
 0x38f   :  { %v1558_v54 = vmul.f32 0.01, %v1494_v55  ;;  %vm1526_vm5 = vcmp.gt.f32.partialorder %v1494_v55, 0.0 }
 0x393   :  { %v5714_v4 = vpop.f32.mrb[28].mxu1 }
 0x394   :  { %v5716_v56 = vpop.f32.mrb[29].mxu1 }
 0x39b   :  { %v5718_v9 = vpop.f32.mrb[30].mxu1 }
 0x39c   :  { %v5725_v58 = vpop.f32.mrb[31].mxu1 }
 0x3a3   :  { %v4184_v21 = vpop.f32.mrb[32].mxu1 }
 0x3a4   :  { %v1501_v27 = vadd.f32 %v4184_v21, %v5723_v10  ;;  %v1366_v61 = vpop.f32.mrb[33].mxu1  ;;  %v1493_v21 = vadd.f32 %v5706_v32, %v5723_v10 }
 0x3a5   :  { %v1500_v29 = vadd.f32 %v5723_v10, %v1366_v61  ;;  %v5785_v61 = vsel %vm1522_vm13, %v1490_v45, %v1554_v60  ;;  %v1496_v45 = vadd.f32 %v5723_v10, %v5716_v56 }
 0x3a6   :  { %vm1533_vm2 = vcmp.gt.f32.partialorder %v1501_v27, 0.0  ;;  %v1565_v33 = vmul.f32 0.01, %v1501_v27  ;;  %v1557_v32 = vmul.f32 0.01, %v1493_v21  ;;  %vm1525_vm0 = vcmp.gt.f32.partialorder %v1493_v21, 0.0 }
 0x3a7   :  { %vm1532_vm3 = vcmp.gt.f32.partialorder %v1500_v29, 0.0  ;;  %v1564_v35 = vmul.f32 0.01, %v1500_v29  ;;  %vm1528_vm9 = vcmp.gt.f32.partialorder %v1496_v45, 0.0 }
 0x3a8   :  { %v5737_v31 = vsel %vm1533_vm2, %v1501_v27, %v1565_v33  ;;  %v5783_v27 = vsel %vm1523_vm12, %v1491_v51, %v1555_v41  ;;  %v5821_v51 = vsel %vm1526_vm5, %v1494_v55, %v1558_v54  ;;  %v1806_v54 = vld [vmem:[#allocation8 + $0x88] sm:$0xff] }
 0x3a9   :  { %v5739_v36 = vsel %vm1532_vm3, %v1500_v29, %v1564_v35  ;;  %v1492_v29 = vadd.f32 %v5723_v10, %v5708_v39  ;;  %v1631_v49 = vpack.c.bf16 %v5783_v27, %v5785_v61 }
 0x3aa   :  { %v1636_v23 = vpack.c.bf16 %v5737_v31, %v5739_v36 }
 0x3ab   :  { %v4187_v26 = vpop.f32.mrb[34].mxu1  ;;  %vm1524_vm1 = vcmp.gt.f32.partialorder %v1492_v29, 0.0 }
 0x3ac   :  { %v1503_v42 = vadd.f32 %v4187_v26, %v5723_v10  ;;  %v1376_v38 = vpop.f32.mrb[35].mxu1  ;;  %3550 = vmatprep.subr.bf16.mxu1 %v1636_v23 }
 0x3ad   :  { %v1502_v30 = vadd.f32 %v5723_v10, %v1376_v38  ;;  %3551 = vmatpush3.bf16.msra.mxu1 %v1628_v24  ;;  %v1556_v24 = vmul.f32 0.01, %v1492_v29 }
 0x3ae   :  { %vm1535_vm6 = vcmp.gt.f32.partialorder %v1503_v42, 0.0  ;;  %v1567_v25 = vmul.f32 0.01, %v1503_v42 }
 0x3af   :  { %vm1534_vm7 = vcmp.gt.f32.partialorder %v1502_v30, 0.0  ;;  %v1566_v43 = vmul.f32 0.01, %v1502_v30 }
 0x3b0   :  { %v5753_v37 = vsel %vm1535_vm6, %v1503_v42, %v1567_v25  ;;  %v5799_v42 = vsel %vm1525_vm0, %v1493_v21, %v1557_v32  ;;  %v1495_v25 = vadd.f32 %v5710_v19, %v5723_v10 }
 0x3b1   :  { %v5755_v11 = vsel %vm1534_vm7, %v1502_v30, %v1566_v43  ;;  %v5801_v30 = vsel %vm1524_vm1, %v1492_v29, %v1556_v24 }
 0x3b2   :  { %v1637_v1 = vpack.c.bf16 %v5753_v37, %v5755_v11  ;;  %vm1527_vm4 = vcmp.gt.f32.partialorder %v1495_v25, 0.0 }
 0x3b3   :  { %v4190_v7 = vpop.f32.mrb[36].mxu1 }
 0x3b4   :  { %v1505_v20 = vadd.f32 %v4190_v7, %v5723_v10  ;;  %v1386_v2 = vpop.f32.mrb[37].mxu1  ;;  %3552 = vmatprep.subr.bf16.mxu1 %v1637_v1  ;;  %v1559_v7 = vmul.f32 0.01, %v1495_v25 }
 0x3b5   :  { %v1504_v48 = vadd.f32 %v5723_v10, %v1386_v2  ;;  %3553 = vmatpush3.bf16.msra.mxu1 %v1629_v47  ;;  %v1632_v47 = vpack.c.bf16 %v5799_v42, %v5801_v30 }
 0x3b6   :  { %vm1537_vm10 = vcmp.gt.f32.partialorder %v1505_v20, 0.0  ;;  %v1569_v40 = vmul.f32 0.01, %v1505_v20 }
 0x3b7   :  { %vm1536_vm11 = vcmp.gt.f32.partialorder %v1504_v48, 0.0  ;;  %v1568_v50 = vmul.f32 0.01, %v1504_v48 }
 0x3b8   :  { %v5771_v52 = vsel %vm1537_vm10, %v1505_v20, %v1569_v40 }
 0x3b9   :  { %v5773_v62 = vsel %vm1536_vm11, %v1504_v48, %v1568_v50  ;;  %v1497_v48 = vadd.f32 %v5714_v4, %v5723_v10  ;;  %v5819_v50 = vsel %vm1527_vm4, %v1495_v25, %v1559_v7  ;;  %v1805_v7 = vld [vmem:[#allocation8 + $0x80] sm:$0xff] }
 0x3ba   :  { %v1638_v46 = vpack.c.bf16 %v5771_v52, %v5773_v62  ;;  %v1633_v41 = vpack.c.bf16 %v5819_v50, %v5821_v51 }
 0x3bb   :  { %v4193_v59 = vpop.f32.mrb[38].mxu1  ;;  %v1561_v4 = vmul.f32 0.01, %v1497_v48  ;;  %vm1529_vm8 = vcmp.gt.f32.partialorder %v1497_v48, 0.0 }
 0x3bc   :  { %v1507_v15 = vadd.f32 %v4193_v59, %v5723_v10  ;;  %v1396_v16 = vpop.f32.mrb[39].mxu1  ;;  %3554 = vmatprep.subr.bf16.mxu1 %v1638_v46 }
 0x3bd   :  { %v1506_v44 = vadd.f32 %v5723_v10, %v1396_v16  ;;  %3555 = vmatpush3.bf16.msra.mxu1 %v1630_v63  ;;  %v5835_v21 = vsel %vm1529_vm8, %v1497_v48, %v1561_v4  ;;  %v1811_v4 = vld [vmem:[#allocation8 + $0xb0] sm:$0xff] }
 0x3be   :  { %vm1539_vm14 = vcmp.gt.f32.partialorder %v1507_v15, 0.0  ;;  %v1571_v28 = vmul.f32 0.01, %v1507_v15 }
 0x3bf   :  { %vm1538_vm15 = vcmp.gt.f32.partialorder %v1506_v44, 0.0  ;;  %v1570_v22 = vmul.f32 0.01, %v1506_v44 }
 0x3c0   :  { %v5789_v33 = vsel %vm1539_vm14, %v1507_v15, %v1571_v28  ;;  %v1560_v15 = vmul.f32 0.01, %v1496_v45 }
 0x3c1   :  { %6366 = vst [vmem:[#allocation29_spill] sm:$0xff] %v5789_v33  ;;  %v5791_v35 = vsel %vm1538_vm15, %v1506_v44, %v1570_v22 }
 0x3c2   :  { %v1639_v14 = vpack.c.bf16 %v5789_v33, %v5791_v35  ;;  %v5837_v29 = vsel %vm1528_vm9, %v1496_v45, %v1560_v15  ;;  %v1810_v45 = vld [vmem:[#allocation8 + $0xa8] sm:$0xff] }
 0x3c3   :  { %v4196_v23 = vpop.f32.mrb[40].mxu1  ;;  %v5865_v15 = vld [vmem:[#allocation2] ss:$8 sps:$4 sm:$0xff]  }
 0x3c4   :  { %v1509_v26 = vadd.f32 %v4196_v23, %v5723_v10  ;;  %v1406_v12 = vpop.f32.mrb[41].mxu1  ;;  %3556 = vmatprep.subr.bf16.mxu1 %v1639_v14  ;;  %v1499_v14 = vadd.f32 %v5718_v9, %v5723_v10 }
 0x3c5   :  { %v1508_v39 = vadd.f32 %v5723_v10, %v1406_v12  ;;  %3557 = vmatpush3.bf16.msra.mxu1 %v1631_v49  ;;  %v1498_v49 = vadd.f32 %v5723_v10, %v5725_v58 }
 0x3c6   :  { %vm1541_vm2 = vcmp.gt.f32.partialorder %v1509_v26, 0.0  ;;  %v1573_v18 = vmul.f32 0.01, %v1509_v26  ;;  %vm1531_vm12 = vcmp.gt.f32.partialorder %v1499_v14, 0.0 }
 0x3c7   :  { %vm1540_vm3 = vcmp.gt.f32.partialorder %v1508_v39, 0.0  ;;  %v1572_v38 = vmul.f32 0.01, %v1508_v39  ;;  %vm1530_vm13 = vcmp.gt.f32.partialorder %v1498_v49, 0.0 }
 0x3c8   :  { %v5807_v43 = vsel %vm1541_vm2, %v1509_v26, %v1573_v18  ;;  %v1634_v26 = vpack.c.bf16 %v5835_v21, %v5837_v29  ;;  %v1562_v18 = vmul.f32 0.01, %v1498_v49 }
 0x3c9   :  { %6367 = vst [vmem:[#allocation43_spill] sm:$0xff] %v5807_v43  ;;  %v5809_v53 = vsel %vm1540_vm3, %v1508_v39, %v1572_v38  ;;  %v1563_v39 = vmul.f32 0.01, %v1499_v14 }
 0x3ca   :  { %6368 = vst [vmem:[#allocation30_spill] sm:$0xff] %v5809_v53  ;;  %v1640_v1 = vpack.c.bf16 %v5807_v43, %v5809_v53 }
 0x3cb   :  { %v4199_v17 = vpop.f32.mrb[42].mxu1 }
 0x3cc   :  { %v1511_v20 = vadd.f32 %v4199_v17, %v5723_v10  ;;  %v1416_v2 = vpop.f32.mrb[43].mxu1  ;;  %3558 = vmatprep.subr.bf16.mxu1 %v1640_v1  ;;  %v5853_v1 = vsel %vm1531_vm12, %v1499_v14, %v1563_v39  ;;  %v1815_v14 = vld [vmem:[#allocation8 + $0xd0] sm:$0xff]  ;;  %v1817_v39 = vld [vmem:[#allocation8 + $0xe0] sm:$0xff] }
 0x3cd   :  { %v1510_v19 = vadd.f32 %v5723_v10, %v1416_v2  ;;  %3559 = vmatpush3.bf16.msra.mxu1 %v1632_v47  ;;  %v5855_v47 = vsel %vm1530_vm13, %v1498_v49, %v1562_v18  ;;  %v1816_v49 = vld [vmem:[#allocation8 + $0xd8] sm:$0xff]  ;;  %v1818_v18 = vld [vmem:[#allocation8 + $0xe8] sm:$0xff] }
 0x3ce   :  { %vm1543_vm6 = vcmp.gt.f32.partialorder %v1511_v20, 0.0  ;;  %v1575_v5 = vmul.f32 0.01, %v1511_v20 }
 0x3cf   :  { %vm1542_vm7 = vcmp.gt.f32.partialorder %v1510_v19, 0.0  ;;  %v1574_v40 = vmul.f32 0.01, %v1510_v19 }
 0x3d0   :  { %v5825_v46 = vsel %vm1543_vm6, %v1511_v20, %v1575_v5  ;;  %v1807_v20 = vld [vmem:[#allocation8 + $0x90] sm:$0xff]  ;;  %v1808_v5 = vld [vmem:[#allocation8 + $0x98] sm:$0xff] }
 0x3d1   :  { %6369 = vst [vmem:[#allocation33_spill] sm:$0xff] %v5825_v46  ;;  %v5827_v63 = vsel %vm1542_vm7, %v1510_v19, %v1574_v40  ;;  %v4622_v19 = vpack.c.bf16 %v1806_v54, %v1805_v7  ;;  %v4626_v48 = vpack.c.bf16 %v1808_v5, %v1807_v20  ;;  %v1809_v40 = vld [vmem:[#allocation8 + $0xa0] sm:$0xff]  ;;  %v5892_v54 = vld [vmem:[#allocation2 + $0x54] ss:$8 sps:$4 sm:$0xff]   ;;  %v5895_v20 = vld [vmem:[#allocation2 + $0x50] ss:$8 sps:$4 sm:$0xff]  }
 0x3d2   :  { %6370 = vst [vmem:[#allocation35_spill] sm:$0xff] %v5827_v63  ;;  %v1641_v59 = vpack.c.bf16 %v5825_v46, %v5827_v63  ;;  %v5889_v7 = vld [vmem:[#allocation2 + $0x40] ss:$8 sps:$4 sm:$0xff]   ;;  %6375 = vst [vmem:[#allocation17_spill] sm:$0xff] %v5895_v20 }
 0x3d3   :  { %v4202_v60 = vpop.f32.mrb[44].mxu1  ;;  %4623 = vmatprep.subr.bf16.mxu0 %v4622_v19  ;;  %v5901_v5 = vld [vmem:[#allocation2 + $0x60] ss:$8 sps:$4 sm:$0xff]  }
 0x3d4   :  { %v1513_v16 = vadd.f32 %v4202_v60, %v5723_v10  ;;  %v1426_v44 = vpop.f32.mrb[45].mxu1  ;;  %3560 = vmatprep.subr.bf16.mxu1 %v1641_v59  ;;  %v1635_v59 = vpack.c.bf16 %v5853_v1, %v5855_v47  ;;  %4625 = vmatpush3.bf16.msra.mxu0 %v4622_v19  ;;  %v1812_v60 = vld [vmem:[#allocation8 + $0xb8] sm:$0xff]  ;;  %v5898_v19 = vld [vmem:[#allocation2 + $0x64] ss:$8 sps:$4 sm:$0xff]   ;;  %6377 = vst [vmem:[#allocation46_spill] sm:$0xff] %v5901_v5 }
 0x3d5   :  { %v1512_v56 = vadd.f32 %v5723_v10, %v1426_v44  ;;  %3561 = vmatpush3.bf16.msra.mxu1 %v1633_v41  ;;  %4627 = vmatprep.subr.bf16.mxu0 %v4626_v48  ;;  %v4630_v41 = vpack.c.bf16 %v1810_v45, %v1809_v40  ;;  %v4634_v44 = vpack.c.bf16 %v1812_v60, %v1811_v4  ;;  %v5910_v40 = vld [vmem:[#allocation2 + $0x84] ss:$8 sps:$4 sm:$0xff]   ;;  %v5913_v45 = vld [vmem:[#allocation2 + $0x80] ss:$8 sps:$4 sm:$0xff]  }
 0x3d6   :  { %vm1545_vm10 = vcmp.gt.f32.partialorder %v1513_v16, 0.0  ;;  %v1577_v28 = vmul.f32 0.01, %v1513_v16  ;;  %6376 = vst [vmem:[#allocation18_spill] sm:$0xff] %v5898_v19  ;;  %6380 = vst [vmem:[#allocation20_spill] sm:$0xff] %v5910_v40 }
 0x3d7   :  { %vm1544_vm11 = vcmp.gt.f32.partialorder %v1512_v56, 0.0  ;;  %v1576_v22 = vmul.f32 0.01, %v1512_v56  ;;  %6381 = vst [vmem:[#allocation21_spill] sm:$0xff] %v5913_v45  ;;  %v5922_v4 = vld [vmem:[#allocation2 + $0xa4] ss:$8 sps:$4 sm:$0xff]  }
 0x3d8   :  { %v5843_v32 = vsel %vm1545_vm10, %v1513_v16, %v1577_v28  ;;  %4629 = vmatpush3.bf16.msra.mxu0 %v4626_v48  ;;  %v5868_v16 = vld [vmem:[#allocation2 + $0x14] ss:$8 sps:$4 sm:$0xff]   ;;  %v1814_v28 = vld [vmem:[#allocation8 + $0xc8] sm:$0xff]  ;;  %v5907_v48 = vld [vmem:[#allocation2 + $0x70] ss:$8 sps:$4 sm:$0xff]   ;;  %6384 = vst [vmem:[#allocation23_spill] sm:$0xff] %v5922_v4 }
 0x3d9   :  { %6371 = vst [vmem:[#allocation44_spill] sm:$0xff] %v5843_v32  ;;  %v5845_v23 = vsel %vm1544_vm11, %v1512_v56, %v1576_v22  ;;  %4631 = vmatprep.subr.bf16.mxu0 %v4630_v41  ;;  %v1813_v56 = vld [vmem:[#allocation8 + $0xc0] sm:$0xff]  ;;  %6379 = vst [vmem:[#allocation47_spill] sm:$0xff] %v5907_v48 }
 0x3da   :  { %6372 = vst [vmem:[#allocation15_spill] sm:$0xff] %v5845_v23  ;;  %v1642_v24 = vpack.c.bf16 %v5843_v32, %v5845_v23  ;;  %v4638_v22 = vpack.c.bf16 %v1814_v28, %v1813_v56  ;;  %v5925_v60 = vld [vmem:[#allocation2 + $0xa0] ss:$8 sps:$4 sm:$0xff]   ;;  %v1819_v56 = vld [vmem:[#allocation8 + $0xf0] sm:$0xff]  ;;  %v1820_v28 = vld [vmem:[#allocation8 + $0xf8] sm:$0xff] }
 0x3db   :  { %v4205_v12 = vpop.f32.mrb[46].mxu1  ;;  %6385 = vst [vmem:[#allocation49_spill] sm:$0xff] %v5925_v60 }
 0x3dc   :  { %v1515_v38 = vadd.f32 %v4205_v12, %v5723_v10  ;;  %v1436_v25 = vpop.f32.mrb[47].mxu1  ;;  %3562 = vmatprep.subr.bf16.mxu1 %v1642_v24  ;;  %4633 = vmatpush3.bf16.msra.mxu0 %v4630_v41  ;;  %v5871_v24 = vld [vmem:[#allocation2 + $0x10] ss:$8 sps:$4 sm:$0xff]   ;;  %v4642_v12 = vpack.c.bf16 %v1816_v49, %v1815_v14  ;;  %v5934_v49 = vld [vmem:[#allocation2 + $0xc4] ss:$8 sps:$4 sm:$0xff]  }
 0x3dd   :  { %v1514_v9 = vadd.f32 %v5723_v10, %v1436_v25  ;;  %3563 = vmatpush3.bf16.msra.mxu1 %v1634_v26  ;;  %4635 = vmatprep.subr.bf16.mxu0 %v4634_v44  ;;  %v5874_v26 = vld [vmem:[#allocation2 + $0x24] ss:$8 sps:$4 sm:$0xff]   ;;  %v5877_v25 = vld [vmem:[#allocation2 + $0x20] ss:$8 sps:$4 sm:$0xff]   ;;  %v5919_v41 = vld [vmem:[#allocation2 + $0x90] ss:$8 sps:$4 sm:$0xff]  }
 0x3de   :  { %vm1547_vm14 = vcmp.gt.f32.partialorder %v1515_v38, 0.0  ;;  %v1579_v58 = vmul.f32 0.01, %v1515_v38  ;;  %6383 = vst [vmem:[#allocation48_spill] sm:$0xff] %v5919_v41  ;;  %v5931_v14 = vld [vmem:[#allocation2 + $0xb0] ss:$8 sps:$4 sm:$0xff]  }
 0x3df   :  { %vm1546_vm15 = vcmp.gt.f32.partialorder %v1514_v9, 0.0  ;;  %v1578_v55 = vmul.f32 0.01, %v1514_v9  ;;  %6387 = vst [vmem:[#allocation25_spill] sm:$0xff] %v5931_v14  ;;  %6388 = vst [vmem:[#allocation26_spill] sm:$0xff] %v5934_v49 }
 0x3e0   :  { %v5857_v17 = vsel %vm1547_vm14, %v1515_v38, %v1579_v58  ;;  %4637 = vmatpush3.bf16.msra.mxu0 %v4634_v44  ;;  %v4646_v38 = vpack.c.bf16 %v1818_v18, %v1817_v39  ;;  %v5883_v58 = vld [vmem:[#allocation2 + $0x30] ss:$8 sps:$4 sm:$0xff]   ;;  %v5928_v44 = vld [vmem:[#allocation2 + $0xb4] ss:$8 sps:$4 sm:$0xff]  }
 0x3e1   :  { %6373 = vst [vmem:[#allocation45_spill] sm:$0xff] %v5857_v17  ;;  %v5859_v2 = vsel %vm1546_vm15, %v1514_v9, %v1578_v55  ;;  %4639 = vmatprep.subr.bf16.mxu0 %v4638_v22  ;;  %v5880_v9 = vld [vmem:[#allocation2 + $0x34] ss:$8 sps:$4 sm:$0xff]   ;;  %v5886_v55 = vld [vmem:[#allocation2 + $0x44] ss:$8 sps:$4 sm:$0xff]   ;;  %6386 = vst [vmem:[#allocation24_spill] sm:$0xff] %v5928_v44 }
 0x3e2   :  { %6374 = vst [vmem:[#allocation16_spill] sm:$0xff] %v5859_v2  ;;  %v1643_v10 = vpack.c.bf16 %v5857_v17, %v5859_v2  ;;  %v5940_v39 = vld [vmem:[#allocation2 + $0xd4] ss:$8 sps:$4 sm:$0xff]   ;;  %v5943_v18 = vld [vmem:[#allocation2 + $0xd0] ss:$8 sps:$4 sm:$0xff]   ;;  %v1625_v2 = vld [vmem:[#allocation8 + $0x68] sm:$0xff] }
 0x3e3   :  { %6390 = vst [vmem:[#allocation27_spill] sm:$0xff] %v5940_v39  ;;  %6391 = vst [vmem:[#allocation51_spill] sm:$0xff] %v5943_v18 }
 0x3e4   :  { %3564 = vmatprep.subr.bf16.mxu1 %v1643_v10  ;;  %4641 = vmatpush3.bf16.msra.mxu0 %v4638_v22  ;;  %v5904_v10 = vld [vmem:[#allocation2 + $0x74] ss:$8 sps:$4 sm:$0xff]   ;;  %v4650_v22 = vpack.c.bf16 %v1820_v28, %v1819_v56  ;;  %v5949_v56 = vld [vmem:[#allocation2 + $0xe0] ss:$8 sps:$4 sm:$0xff]  }
 0x3e5   :  { %3565 = vmatpush3.bf16.msra.mxu1 %v1635_v59  ;;  %4643 = vmatprep.subr.bf16.mxu0 %v4642_v12  ;;  %6378 = vst [vmem:[#allocation19_spill] sm:$0xff] %v5904_v10  ;;  %v5916_v59 = vld [vmem:[#allocation2 + $0x94] ss:$8 sps:$4 sm:$0xff]   ;;  %6393 = vst [vmem:[#allocation31_spill] sm:$0xff] %v5949_v56 }
 0x3e6   :  { %6382 = vst [vmem:[#allocation22_spill] sm:$0xff] %v5916_v59  ;;  %v5952_v28 = vld [vmem:[#allocation2 + $0xf4] ss:$8 sps:$4 sm:$0xff]  }
 0x3e7   :  { %6394 = vst [vmem:[#allocation32_spill] sm:$0xff] %v5952_v28 }
 0x3e8   :  { %1677 = vmatmul.mubr.bf16.vlgmr.msra.gmra.mrb[48].mxu1 %v5865_v15  ;;  %4645 = vmatpush3.bf16.msra.mxu0 %v4642_v12  ;;  %v5937_v12 = vld [vmem:[#allocation2 + $0xc0] ss:$8 sps:$4 sm:$0xff]  }
 0x3e9   :  { %1684 = vmatprep.mubr.bf16.mxu1 %v5868_v16  ;;  %4647 = vmatprep.subr.bf16.mxu0 %v4646_v38  ;;  %6389 = vst [vmem:[#allocation50_spill] sm:$0xff] %v5937_v12 }
 0x3ec   :  { %4649 = vmatpush3.bf16.msra.mxu0 %v4646_v38  ;;  %v5946_v38 = vld [vmem:[#allocation2 + $0xe4] ss:$8 sps:$4 sm:$0xff]  }
 0x3ed   :  { %4651 = vmatprep.subr.bf16.mxu0 %v4650_v22  ;;  %6392 = vst [vmem:[#allocation28_spill] sm:$0xff] %v5946_v38 }
 0x3f0   :  { %1685 = vmatmul.mubr.bf16.gmra.mrb[52].mxu1 %v5871_v24  ;;  %4653 = vmatpush3.bf16.msra.mxu0 %v4650_v22  ;;  %v5955_v22 = vld [vmem:[#allocation2 + $0xf0] ss:$8 sps:$4 sm:$0xff]  }
 0x3f1   :  { %1692 = vmatprep.mubr.bf16.mxu1 %v5874_v26  ;;  %6395 = vst [vmem:[#allocation52_spill] sm:$0xff] %v5955_v22 }
 0x3f8   :  { %1693 = vmatmul.mubr.bf16.gmra.mrb[56].mxu1 %v5877_v25 }
 0x3f9   :  { %1700 = vmatprep.mubr.bf16.mxu1 %v5880_v9 }
 0x400   :  { %1701 = vmatmul.mubr.bf16.gmra.mrb[60].mxu1 %v5883_v58 }
 0x401   :  { %1708 = vmatprep.mubr.bf16.mxu1 %v5886_v55 }
 0x408   :  { %1709 = vmatmul.mubr.bf16.gmra.mrb[64].mxu1 %v5889_v7 }
 0x409   :  { %1716 = vmatprep.mubr.bf16.mxu1 %v5892_v54 }
 0x410   :  { %1717 = vmatmul.mubr.bf16.gmra.mrb[68].mxu1 %v5895_v20 }
 0x411   :  { %1724 = vmatprep.mubr.bf16.mxu1 %v5898_v19 }
 0x418   :  { %1725 = vmatmul.mubr.bf16.gmra.mrb[72].mxu1 %v5901_v5 }
 0x419   :  { %1732 = vmatprep.mubr.bf16.mxu1 %v5904_v10 }
 0x420   :  { %1733 = vmatmul.mubr.bf16.gmra.mrb[76].mxu1 %v5907_v48 }
 0x421   :  { %1740 = vmatprep.mubr.bf16.mxu1 %v5910_v40  ;;  %v1621_v40 = vld [vmem:[#allocation8 + $0x48] sm:$0xff] }
 0x428   :  { %1741 = vmatmul.mubr.bf16.gmra.mrb[80].mxu1 %v5913_v45  ;;  %v1619_v45 = vld [vmem:[#allocation8 + $0x38] sm:$0xff] }
 0x429   :  { %1748 = vmatprep.mubr.bf16.mxu1 %v5916_v59  ;;  %v1617_v59 = vld [vmem:[#allocation8 + $0x28] sm:$0xff] }
 0x430   :  { %1749 = vmatmul.mubr.bf16.gmra.mrb[84].mxu1 %v5919_v41 }
 0x431   :  { %1756 = vmatprep.mubr.bf16.mxu1 %v5922_v4 }
 0x438   :  { %1757 = vmatmul.mubr.bf16.gmra.mrb[88].mxu1 %v5925_v60 }
 0x439   :  { %1764 = vmatprep.mubr.bf16.mxu1 %v5928_v44  ;;  %v1615_v44 = vld [vmem:[#allocation8 + $0x18] sm:$0xff] }
 0x440   :  { %1765 = vmatmul.mubr.bf16.gmra.mrb[92].mxu1 %v5931_v14  ;;  %v1614_v14 = vld [vmem:[#allocation8 + $0x10] sm:$0xff] }
 0x441   :  { %1772 = vmatprep.mubr.bf16.mxu1 %v5934_v49 }
 0x448   :  { %1773 = vmatmul.mubr.bf16.gmra.mrb[96].mxu1 %v5937_v12 }
 0x449   :  { %1780 = vmatprep.mubr.bf16.mxu1 %v5940_v39  ;;  %v1612_v39 = vld [vmem:[#allocation8] sm:$0xff] }
 0x450   :  { %1781 = vmatmul.mubr.bf16.gmra.mrb[100].mxu1 %v5943_v18  ;;  %v1613_v18 = vld [vmem:[#allocation8 + $0x8] sm:$0xff] }
 0x451   :  { %1788 = vmatprep.mubr.bf16.mxu1 %v5946_v38  ;;  %v4654_v12 = vpack.c.bf16 %v1613_v18, %v1612_v39 }
 0x453   :  { %4655 = vmatprep.subr.bf16.mxu0 %v4654_v12 }
 0x458   :  { %1789 = vmatmul.mubr.bf16.gmra.mrb[104].mxu1 %v5949_v56 }
 0x459   :  { %1796 = vmatprep.mubr.bf16.mxu1 %v5952_v28  ;;  %v4658_v28 = vpack.c.bf16 %v1615_v44, %v1614_v14 }
 0x460   :  { %1797 = vmatmul.mubr.bf16.gmra.mrb[108].mxu1 %v5955_v22  ;;  %v1616_v22 = vld [vmem:[#allocation8 + $0x20] sm:$0xff] }
 0x461   :  { %2319 = vmatprep.mubr.bf16.mxu1 %v5699_v34  ;;  %v4662_v18 = vpack.c.bf16 %v1617_v59, %v1616_v22  ;;  %v1620_v34 = vld [vmem:[#allocation8 + $0x40] sm:$0xff] }
 0x462   :  { %v4670_v22 = vpack.c.bf16 %v1621_v40, %v1620_v34 }
 0x4bb   :  { %v3566_v49 = vpop.f32.mrb[48].mxu1 }
 0x4bc   :  { %v3567_v38 = vpop.f32.mrb[49].mxu1 }
 0x4bd   :  { %v5959_v60 = vadd.f32 %v3567_v38, %v3566_v49  ;;  %v3569_v56 = vpop.f32.mrb[50].mxu1  ;;  %v1618_v38 = vld [vmem:[#allocation8 + $0x30] sm:$0xff] }
 0x4be   :  { %v3570_v4 = vpop.f32.mrb[51].mxu1  ;;  %v4666_v14 = vpack.c.bf16 %v1619_v45, %v1618_v38 }
 0x4bf   :  { %v5961_v41 = vadd.f32 %v3570_v4, %v3569_v56  ;;  %4238 = vmatprep.mubr.f32.mxu0 %v5959_v60 }
 0x4c1   :  { %4239 = vmatmul.mubr.f32.vlgmr.msra.gmra.mrb[112].mxu0 %v5961_v41 }
 0x4c2   :  { %4657 = vmatpush3.bf16.msra.mxu0 %v4654_v12  ;;  %v1624_v12 = vld [vmem:[#allocation8 + $0x60] sm:$0xff] }
 0x4c3   :  { %v3572_v39 = vpop.f32.mrb[52].mxu1  ;;  %4659 = vmatprep.subr.bf16.mxu0 %v4658_v28  ;;  %v4678_v34 = vpack.c.bf16 %v1625_v2, %v1624_v12 }
 0x4c4   :  { %v3573_v49 = vpop.f32.mrb[53].mxu1 }
 0x4c5   :  { %v5967_v17 = vadd.f32 %v3573_v49, %v3572_v39  ;;  %v3575_v4 = vpop.f32.mrb[54].mxu1  ;;  %v1622_v49 = vld [vmem:[#allocation8 + $0x50] sm:$0xff] }
 0x4c6   :  { %v3576_v56 = vpop.f32.mrb[55].mxu1  ;;  %4661 = vmatpush3.bf16.msra.mxu0 %v4658_v28  ;;  %v1623_v28 = vld [vmem:[#allocation8 + $0x58] sm:$0xff] }
 0x4c7   :  { %v5969_v44 = vadd.f32 %v3576_v56, %v3575_v4  ;;  %4241 = vmatprep.mubr.f32.mxu0 %v5967_v17  ;;  %4663 = vmatprep.subr.bf16.mxu0 %v4662_v18  ;;  %v4674_v38 = vpack.c.bf16 %v1623_v28, %v1622_v49 }
 0x4c9   :  { %4242 = vmatmul.mubr.f32.gmra.mrb[114].mxu0 %v5969_v44 }
 0x4ca   :  { %4665 = vmatpush3.bf16.msra.mxu0 %v4662_v18 }
 0x4cb   :  { %v3578_v59 = vpop.f32.mrb[56].mxu1  ;;  %4667 = vmatprep.subr.bf16.mxu0 %v4666_v14 }
 0x4cc   :  { %v3579_v39 = vpop.f32.mrb[57].mxu1 }
 0x4cd   :  { %v5975_v4 = vadd.f32 %v3579_v39, %v3578_v59  ;;  %v3581_v56 = vpop.f32.mrb[58].mxu1  ;;  %v1626_v39 = vld [vmem:[#allocation8 + $0x70] sm:$0xff] }
 0x4ce   :  { %v3582_v48 = vpop.f32.mrb[59].mxu1  ;;  %4669 = vmatpush3.bf16.msra.mxu0 %v4666_v14  ;;  %v1627_v14 = vld [vmem:[#allocation8 + $0x78] sm:$0xff] }
 0x4cf   :  { %v5977_v45 = vadd.f32 %v3582_v48, %v3581_v56  ;;  %4244 = vmatprep.mubr.f32.mxu0 %v5975_v4  ;;  %4671 = vmatprep.subr.bf16.mxu0 %v4670_v22  ;;  %v4682_v28 = vpack.c.bf16 %v1627_v14, %v1626_v39 }
 0x4d1   :  { %4245 = vmatmul.mubr.f32.gmra.mrb[116].mxu0 %v5977_v45 }
 0x4d2   :  { %4673 = vmatpush3.bf16.msra.mxu0 %v4670_v22 }
 0x4d3   :  { %v3584_v40 = vpop.f32.mrb[60].mxu1  ;;  %4675 = vmatprep.subr.bf16.mxu0 %v4674_v38 }
 0x4d4   :  { %v3585_v59 = vpop.f32.mrb[61].mxu1 }
 0x4d5   :  { %v5983_v48 = vadd.f32 %v3585_v59, %v3584_v40  ;;  %v3587_v56 = vpop.f32.mrb[62].mxu1 }
 0x4d6   :  { %v3588_v32 = vpop.f32.mrb[63].mxu1  ;;  %4677 = vmatpush3.bf16.msra.mxu0 %v4674_v38 }
 0x4d7   :  { %v5985_v49 = vadd.f32 %v3588_v32, %v3587_v56  ;;  %4247 = vmatprep.mubr.f32.mxu0 %v5983_v48  ;;  %4679 = vmatprep.subr.bf16.mxu0 %v4678_v34 }
 0x4d9   :  { %4248 = vmatmul.mubr.f32.gmra.mrb[118].mxu0 %v5985_v49 }
 0x4da   :  { %4681 = vmatpush3.bf16.msra.mxu0 %v4678_v34 }
 0x4db   :  { %v3590_v2 = vpop.f32.mrb[64].mxu1  ;;  %4683 = vmatprep.subr.bf16.mxu0 %v4682_v28 }
 0x4dc   :  { %v3591_v12 = vpop.f32.mrb[65].mxu1 }
 0x4dd   :  { %v5991_v40 = vadd.f32 %v3591_v12, %v3590_v2  ;;  %v3593_v59 = vpop.f32.mrb[66].mxu1 }
 0x4de   :  { %v3594_v18 = vpop.f32.mrb[67].mxu1  ;;  %4685 = vmatpush3.bf16.msra.mxu0 %v4682_v28 }
 0x4df   :  { %v5993_v32 = vadd.f32 %v3594_v18, %v3593_v59  ;;  %4250 = vmatprep.mubr.f32.mxu0 %v5991_v40 }
 0x4e1   :  { %4251 = vmatmul.mubr.f32.gmra.mrb[120].mxu0 %v5993_v32 }
 0x4e3   :  { %v3596_v39 = vpop.f32.mrb[68].mxu1 }
 0x4e4   :  { %v3597_v14 = vpop.f32.mrb[69].mxu1 }
 0x4e5   :  { %v5999_v34 = vadd.f32 %v3597_v14, %v3596_v39  ;;  %v3599_v56 = vpop.f32.mrb[70].mxu1 }
 0x4e6   :  { %v3600_v22 = vpop.f32.mrb[71].mxu1 }
 0x4e7   :  { %v6001_v2 = vadd.f32 %v3600_v22, %v3599_v56  ;;  %4253 = vmatprep.mubr.f32.mxu0 %v5999_v34 }
 0x4e9   :  { %4254 = vmatmul.mubr.f32.gmra.mrb[122].mxu0 %v6001_v2 }
 0x4eb   :  { %v3602_v28 = vpop.f32.mrb[72].mxu1 }
 0x4ec   :  { %v3603_v12 = vpop.f32.mrb[73].mxu1 }
 0x4ed   :  { %v6007_v59 = vadd.f32 %v3603_v12, %v3602_v28  ;;  %v3605_v38 = vpop.f32.mrb[74].mxu1 }
 0x4ee   :  { %v3606_v23 = vpop.f32.mrb[75].mxu1 }
 0x4ef   :  { %v6009_v46 = vadd.f32 %v3606_v23, %v3605_v38  ;;  %4256 = vmatprep.mubr.f32.mxu0 %v6007_v59 }
 0x4f1   :  { %4257 = vmatmul.mubr.f32.gmra.mrb[124].mxu0 %v6009_v46 }
 0x4f3   :  { %v3608_v39 = vpop.f32.mrb[76].mxu1 }
 0x4f4   :  { %v3609_v14 = vpop.f32.mrb[77].mxu1 }
 0x4f5   :  { %v6015_v56 = vadd.f32 %v3609_v14, %v3608_v39  ;;  %v3611_v18 = vpop.f32.mrb[78].mxu1 }
 0x4f6   :  { %v3612_v10 = vpop.f32.mrb[79].mxu1 }
 0x4f7   :  { %v6017_v5 = vadd.f32 %v3612_v10, %v3611_v18  ;;  %4259 = vmatprep.mubr.f32.mxu0 %v6015_v56  ;;  %v6396_v18 = vpack.c.bf16 %v5961_v41, %v5959_v60 }
 0x4f9   :  { %4260 = vmatmul.mubr.f32.gmra.mrb[126].mxu0 %v6017_v5 }
 0x4fb   :  { %v3614_v38 = vpop.f32.mrb[80].mxu1 }
 0x4fc   :  { %v3615_v28 = vpop.f32.mrb[81].mxu1 }
 0x4fd   :  { %v3616_v12 = vadd.f32 %v3615_v28, %v3614_v38  ;;  %v3617_v22 = vpop.f32.mrb[82].mxu1 }
 0x4fe   :  { %v3618_v63 = vpop.f32.mrb[83].mxu1 }
 0x4ff   :  { %v3619_v43 = vadd.f32 %v3618_v63, %v3617_v22  ;;  %4262 = vmatprep.mubr.f32.mxu0 %v3616_v12 }
 0x501   :  { %v2279_v39 = vpack.c.bf16 %v3619_v43, %v3616_v12  ;;  %4263 = vmatmul.mubr.f32.gmra.mrb[128].mxu0 %v3619_v43  ;;  %v6397_v43 = vpack.c.bf16 %v5969_v44, %v5967_v17 }
 0x503   :  { %v3620_v14 = vpop.f32.mrb[84].mxu1  ;;  %3758 = vmatprep.subr.bf16.mxu1 %v2279_v39 }
 0x504   :  { %v3621_v10 = vpop.f32.mrb[85].mxu1  ;;  %3759 = vmatpush3.bf16.msra.mxu1 %v6396_v18  ;;  %v6399_v18 = vpack.c.bf16 %v5985_v49, %v5983_v48 }
 0x505   :  { %v3622_v53 = vadd.f32 %v3621_v10, %v3620_v14  ;;  %v3623_v23 = vpop.f32.mrb[86].mxu1 }
 0x506   :  { %v3624_v33 = vpop.f32.mrb[87].mxu1 }
 0x507   :  { %v3625_v19 = vadd.f32 %v3624_v33, %v3623_v23  ;;  %4265 = vmatprep.mubr.f32.mxu0 %v3622_v53 }
 0x509   :  { %v2280_v20 = vpack.c.bf16 %v3625_v19, %v3622_v53  ;;  %4266 = vmatmul.mubr.f32.gmra.mrb[130].mxu0 %v3625_v19  ;;  %v6398_v53 = vpack.c.bf16 %v5977_v45, %v5975_v4 }
 0x50b   :  { %v3626_v38 = vpop.f32.mrb[88].mxu1  ;;  %3760 = vmatprep.subr.bf16.mxu1 %v2280_v20 }
 0x50c   :  { %v3627_v63 = vpop.f32.mrb[89].mxu1  ;;  %3761 = vmatpush3.bf16.msra.mxu1 %v6397_v43 }
 0x50d   :  { %v3628_v22 = vadd.f32 %v3627_v63, %v3626_v38  ;;  %v3629_v28 = vpop.f32.mrb[90].mxu1 }
 0x50e   :  { %v3630_v12 = vpop.f32.mrb[91].mxu1 }
 0x50f   :  { %v3631_v39 = vadd.f32 %v3630_v12, %v3629_v28  ;;  %4268 = vmatprep.mubr.f32.mxu0 %v3628_v22  ;;  %v6400_v12 = vpack.c.bf16 %v5993_v32, %v5991_v40 }
 0x511   :  { %v2281_v41 = vpack.c.bf16 %v3631_v39, %v3628_v22  ;;  %4269 = vmatmul.mubr.f32.gmra.mrb[132].mxu0 %v3631_v39 }
 0x513   :  { %v3632_v60 = vpop.f32.mrb[92].mxu1  ;;  %3762 = vmatprep.subr.bf16.mxu1 %v2281_v41 }
 0x514   :  { %v3633_v33 = vpop.f32.mrb[93].mxu1  ;;  %3763 = vmatpush3.bf16.msra.mxu1 %v6398_v53 }
 0x515   :  { %v3634_v20 = vadd.f32 %v3633_v33, %v3632_v60  ;;  %v3635_v19 = vpop.f32.mrb[94].mxu1 }
 0x516   :  { %v3636_v23 = vpop.f32.mrb[95].mxu1 }
 0x517   :  { %v3637_v14 = vadd.f32 %v3636_v23, %v3635_v19  ;;  %4271 = vmatprep.mubr.f32.mxu0 %v3634_v20 }
 0x519   :  { %v2282_v17 = vpack.c.bf16 %v3637_v14, %v3634_v20  ;;  %4272 = vmatmul.mubr.f32.gmra.mrb[134].mxu0 %v3637_v14  ;;  %v6401_v20 = vpack.c.bf16 %v6001_v2, %v5999_v34  ;;  %v2512_v34 = vld [vmem:[#allocation8 + $0x100] sm:$0xff]  ;;  %v2513_v2 = vld [vmem:[#allocation8 + $0x108] sm:$0xff] }
 0x51b   :  { %v3638_v44 = vpop.f32.mrb[96].mxu1  ;;  %3764 = vmatprep.subr.bf16.mxu1 %v2282_v17 }
 0x51c   :  { %v3639_v10 = vpop.f32.mrb[97].mxu1  ;;  %3765 = vmatpush3.bf16.msra.mxu1 %v6399_v18 }
 0x51d   :  { %v3640_v38 = vadd.f32 %v3639_v10, %v3638_v44  ;;  %v3641_v63 = vpop.f32.mrb[98].mxu1  ;;  %v6402_v10 = vpack.c.bf16 %v6009_v46, %v6007_v59  ;;  %v6403_v46 = vpack.c.bf16 %v6017_v5, %v6015_v56  ;;  %v2516_v59 = vld [vmem:[#allocation8 + $0x120] sm:$0xff] }
 0x51e   :  { %v3642_v43 = vpop.f32.mrb[99].mxu1  ;;  %v2520_v56 = vld [vmem:[#allocation8 + $0x140] sm:$0xff] }
 0x51f   :  { %v3643_v22 = vadd.f32 %v3642_v43, %v3641_v63  ;;  %4274 = vmatprep.mubr.f32.mxu0 %v3640_v38 }
 0x521   :  { %v2283_v4 = vpack.c.bf16 %v3643_v22, %v3640_v38  ;;  %4275 = vmatmul.mubr.f32.gmra.mrb[136].mxu0 %v3643_v22  ;;  %v4686_v22 = vpack.c.bf16 %v2513_v2, %v2512_v34  ;;  %v2524_v34 = vld [vmem:[#allocation8 + $0x160] sm:$0xff]  ;;  %v2525_v2 = vld [vmem:[#allocation8 + $0x168] sm:$0xff] }
 0x523   :  { %v3644_v45 = vpop.f32.mrb[100].mxu1  ;;  %3766 = vmatprep.subr.bf16.mxu1 %v2283_v4  ;;  %v2514_v4 = vld [vmem:[#allocation8 + $0x110] sm:$0xff]  ;;  %4687 = vmatprep.subr.bf16.mxu0 %v4686_v22 }
 0x524   :  { %v3645_v28 = vpop.f32.mrb[101].mxu1  ;;  %3767 = vmatpush3.bf16.msra.mxu1 %v6400_v12 }
 0x525   :  { %v3646_v39 = vadd.f32 %v3645_v28, %v3644_v45  ;;  %v3647_v41 = vpop.f32.mrb[102].mxu1  ;;  %v2515_v45 = vld [vmem:[#allocation8 + $0x118] sm:$0xff] }
 0x526   :  { %v3648_v60 = vpop.f32.mrb[103].mxu1  ;;  %v4690_v12 = vpack.c.bf16 %v2515_v45, %v2514_v4  ;;  %v2526_v4 = vld [vmem:[#allocation8 + $0x170] sm:$0xff]  ;;  %v2527_v45 = vld [vmem:[#allocation8 + $0x178] sm:$0xff] }
 0x527   :  { %v3649_v33 = vadd.f32 %v3648_v60, %v3647_v41  ;;  %4277 = vmatprep.mubr.f32.mxu0 %v3646_v39  ;;  %v2518_v60 = vld [vmem:[#allocation8 + $0x130] sm:$0xff] }
 0x529   :  { %v2284_v48 = vpack.c.bf16 %v3649_v33, %v3646_v39  ;;  %4278 = vmatmul.mubr.f32.gmra.mrb[138].mxu0 %v3649_v33  ;;  %v2517_v39 = vld [vmem:[#allocation8 + $0x128] sm:$0xff]  ;;  %v2519_v33 = vld [vmem:[#allocation8 + $0x138] sm:$0xff] }
 0x52a   :  { %v4694_v41 = vpack.c.bf16 %v2517_v39, %v2516_v59  ;;  %v4698_v5 = vpack.c.bf16 %v2519_v33, %v2518_v60  ;;  %v6427_v59 = vld [vmem:[#allocation50_spill] sm:$0xff]  ;;  %v6428_v39 = vld [vmem:[#allocation27_spill] sm:$0xff]  ;;  %v6430_v60 = vld [vmem:[#allocation28_spill] sm:$0xff] }
 0x52b   :  { %v3650_v49 = vpop.f32.mrb[104].mxu1  ;;  %3768 = vmatprep.subr.bf16.mxu1 %v2284_v48  ;;  %v2521_v48 = vld [vmem:[#allocation8 + $0x148] sm:$0xff]  ;;  %v6431_v33 = vld [vmem:[#allocation31_spill] sm:$0xff] }
 0x52c   :  { %v3651_v53 = vpop.f32.mrb[105].mxu1  ;;  %3769 = vmatpush3.bf16.msra.mxu1 %v6401_v20  ;;  %v6412_v20 = vld [vmem:[#allocation33_spill] sm:$0xff] }
 0x52d   :  { %v3652_v19 = vadd.f32 %v3651_v53, %v3650_v49  ;;  %v3653_v23 = vpop.f32.mrb[106].mxu1  ;;  %v2523_v49 = vld [vmem:[#allocation8 + $0x158] sm:$0xff] }
 0x52e   :  { %v3654_v14 = vpop.f32.mrb[107].mxu1 }
 0x52f   :  { %v3655_v17 = vadd.f32 %v3654_v14, %v3653_v23  ;;  %4280 = vmatprep.mubr.f32.mxu0 %v3652_v19  ;;  %v6414_v23 = vld [vmem:[#allocation44_spill] sm:$0xff] }
 0x530   :  { %v6415_v14 = vld [vmem:[#allocation16_spill] sm:$0xff] }
 0x531   :  { %v2285_v40 = vpack.c.bf16 %v3655_v17, %v3652_v19  ;;  %4281 = vmatmul.mubr.f32.gmra.mrb[140].mxu0 %v3655_v17  ;;  %v6413_v19 = vld [vmem:[#allocation15_spill] sm:$0xff] }
 0x532   :  { %v6416_v17 = vld [vmem:[#allocation47_spill] sm:$0xff] }
 0x533   :  { %v3656_v32 = vpop.f32.mrb[108].mxu1  ;;  %3770 = vmatprep.subr.bf16.mxu1 %v2285_v40  ;;  %v6417_v40 = vld [vmem:[#allocation20_spill] sm:$0xff] }
 0x534   :  { %v3657_v44 = vpop.f32.mrb[109].mxu1  ;;  %3771 = vmatpush3.bf16.msra.mxu1 %v6402_v10  ;;  %v6420_v10 = vld [vmem:[#allocation22_spill] sm:$0xff] }
 0x535   :  { %v3658_v18 = vadd.f32 %v3657_v44, %v3656_v32  ;;  %v3659_v38 = vpop.f32.mrb[110].mxu1  ;;  %v6418_v32 = vld [vmem:[#allocation45_spill] sm:$0xff] }
 0x536   :  { %v3660_v63 = vpop.f32.mrb[111].mxu1  ;;  %v6419_v44 = vld [vmem:[#allocation21_spill] sm:$0xff] }
 0x537   :  { %v3661_v43 = vadd.f32 %v3660_v63, %v3659_v38  ;;  %4283 = vmatprep.mubr.f32.mxu0 %v3658_v18  ;;  %v6422_v38 = vld [vmem:[#allocation23_spill] sm:$0xff]  ;;  %v6423_v63 = vld [vmem:[#allocation49_spill] sm:$0xff] }
 0x539   :  { %v2286_v28 = vpack.c.bf16 %v3661_v43, %v3658_v18  ;;  %4284 = vmatmul.mubr.f32.gmra.mrb[142].mxu0 %v3661_v43  ;;  %v6421_v18 = vld [vmem:[#allocation48_spill] sm:$0xff] }
 0x53a   :  { %4318 = vmatprep.mubr.f32.mxu0 %v5733_v13  ;;  %v6424_v43 = vld [vmem:[#allocation24_spill] sm:$0xff] }
 0x53b   :  { %3772 = vmatprep.subr.bf16.mxu1 %v2286_v28  ;;  %v4714_v28 = vpack.c.bf16 %v2527_v45, %v2526_v4 }
 0x53c   :  { %3773 = vmatpush3.bf16.msra.mxu1 %v6403_v46  ;;  %v6426_v46 = vld [vmem:[#allocation26_spill] sm:$0xff] }
 0x53d   :  { %4319 = vmatmul.mubr.f32.vlgmr.msra.gmra.mrb[112].mxu0 %v5731_v8 }
 0x53e   :  { %4321 = vmatprep.mubr.f32.mxu0 %v5750_v3  ;;  %4689 = vmatpush3.bf16.msra.mxu0 %v4686_v22  ;;  %v4710_v22 = vpack.c.bf16 %v2525_v2, %v2524_v34  ;;  %v2789_v2 = vld [vmem:[#allocation8 + $0x1a0] sm:$0xff] }
 0x53f   :  { %2320 = vmatmul.mubr.bf16.vlgmr.msra.gmra.mrb[112].mxu1 %v5865_v15  ;;  %4691 = vmatprep.subr.bf16.mxu0 %v4690_v12  ;;  %v4702_v15 = vpack.c.bf16 %v2521_v48, %v2520_v56  ;;  %v6433_v56 = vld [vmem:[#allocation52_spill] sm:$0xff]  ;;  %v2785_v48 = vld [vmem:[#allocation8 + $0x180] sm:$0xff] }
 0x540   :  { %2327 = vmatprep.mubr.bf16.mxu1 %v5868_v16  ;;  %v2522_v16 = vld [vmem:[#allocation8 + $0x150] sm:$0xff] }
 0x541   :  { %4322 = vmatmul.mubr.f32.gmra.mrb[114].mxu0 %v5748_v6  ;;  %v4706_v53 = vpack.c.bf16 %v2523_v49, %v2522_v16 }
 0x542   :  { %4324 = vmatprep.mubr.f32.mxu0 %v5765_v57  ;;  %4693 = vmatpush3.bf16.msra.mxu0 %v4690_v12  ;;  %v6425_v12 = vld [vmem:[#allocation25_spill] sm:$0xff] }
 0x543   :  { %4695 = vmatprep.subr.bf16.mxu0 %v4694_v41 }
 0x545   :  { %4325 = vmatmul.mubr.f32.gmra.mrb[116].mxu0 %v5763_v0 }
 0x546   :  { %4327 = vmatprep.mubr.f32.mxu0 %v5785_v61  ;;  %4697 = vmatpush3.bf16.msra.mxu0 %v4694_v41  ;;  %v6429_v41 = vld [vmem:[#allocation51_spill] sm:$0xff] }
 0x547   :  { %2328 = vmatmul.mubr.bf16.gmra.mrb[116].mxu1 %v5871_v24  ;;  %4699 = vmatprep.subr.bf16.mxu0 %v4698_v5  ;;  %v6404_v24 = vld [vmem:[#allocation17_spill] sm:$0xff] }
 0x548   :  { %2335 = vmatprep.mubr.bf16.mxu1 %v5874_v26  ;;  %v6405_v26 = vld [vmem:[#allocation18_spill] sm:$0xff] }
 0x549   :  { %4328 = vmatmul.mubr.f32.gmra.mrb[118].mxu0 %v5783_v27 }
 0x54a   :  { %4330 = vmatprep.mubr.f32.mxu0 %v5801_v30  ;;  %4701 = vmatpush3.bf16.msra.mxu0 %v4698_v5  ;;  %v6432_v5 = vld [vmem:[#allocation32_spill] sm:$0xff] }
 0x54b   :  { %4703 = vmatprep.subr.bf16.mxu0 %v4702_v15 }
 0x54d   :  { %4331 = vmatmul.mubr.f32.gmra.mrb[120].mxu0 %v5799_v42 }
 0x54e   :  { %4333 = vmatprep.mubr.f32.mxu0 %v5821_v51  ;;  %4705 = vmatpush3.bf16.msra.mxu0 %v4702_v15  ;;  %v2786_v15 = vld [vmem:[#allocation8 + $0x188] sm:$0xff] }
 0x54f   :  { %2336 = vmatmul.mubr.bf16.gmra.mrb[120].mxu1 %v5877_v25  ;;  %4707 = vmatprep.subr.bf16.mxu0 %v4706_v53  ;;  %v6406_v25 = vld [vmem:[#allocation29_spill] sm:$0xff]  ;;  %v4718_v16 = vpack.c.bf16 %v2786_v15, %v2785_v48  ;;  %v2793_v48 = vld [vmem:[#allocation8 + $0x1c0] sm:$0xff]  ;;  %v2794_v15 = vld [vmem:[#allocation8 + $0x1c8] sm:$0xff] }
 0x550   :  { %2343 = vmatprep.mubr.bf16.mxu1 %v5880_v9  ;;  %v6407_v9 = vld [vmem:[#allocation30_spill] sm:$0xff] }
 0x551   :  { %4334 = vmatmul.mubr.f32.gmra.mrb[122].mxu0 %v5819_v50 }
 0x552   :  { %4336 = vmatprep.mubr.f32.mxu0 %v5837_v29  ;;  %4709 = vmatpush3.bf16.msra.mxu0 %v4706_v53 }
 0x553   :  { %4711 = vmatprep.subr.bf16.mxu0 %v4710_v22 }
 0x555   :  { %4337 = vmatmul.mubr.f32.gmra.mrb[124].mxu0 %v5835_v21 }
 0x556   :  { %4339 = vmatprep.mubr.f32.mxu0 %v5855_v47  ;;  %4713 = vmatpush3.bf16.msra.mxu0 %v4710_v22  ;;  %v2790_v22 = vld [vmem:[#allocation8 + $0x1a8] sm:$0xff] }
 0x557   :  { %2344 = vmatmul.mubr.bf16.gmra.mrb[124].mxu1 %v5883_v58  ;;  %v6408_v58 = vld [vmem:[#allocation43_spill] sm:$0xff]  ;;  %4715 = vmatprep.subr.bf16.mxu0 %v4714_v28 }
 0x558   :  { %2351 = vmatprep.mubr.bf16.mxu1 %v5886_v55  ;;  %v6409_v55 = vld [vmem:[#allocation35_spill] sm:$0xff] }
 0x559   :  { %4340 = vmatmul.mubr.f32.gmra.mrb[126].mxu0 %v5853_v1 }
 0x55a   :  { %4342 = vmatprep.mubr.f32.mxu0 %v5739_v36  ;;  %4717 = vmatpush3.bf16.msra.mxu0 %v4714_v28 }
 0x55b   :  { %4719 = vmatprep.subr.bf16.mxu0 %v4718_v16 }
 0x55d   :  { %4343 = vmatmul.mubr.f32.gmra.mrb[128].mxu0 %v5737_v31 }
 0x55e   :  { %4345 = vmatprep.mubr.f32.mxu0 %v5755_v11 }
 0x55f   :  { %2352 = vmatmul.mubr.bf16.gmra.mrb[128].mxu1 %v5889_v7  ;;  %v6410_v7 = vld [vmem:[#allocation46_spill] sm:$0xff] }
 0x560   :  { %2359 = vmatprep.mubr.bf16.mxu1 %v5892_v54  ;;  %v6411_v54 = vld [vmem:[#allocation19_spill] sm:$0xff] }
 0x561   :  { %4346 = vmatmul.mubr.f32.gmra.mrb[130].mxu0 %v5753_v37 }
 0x562   :  { %4348 = vmatprep.mubr.f32.mxu0 %v5773_v62 }
 0x565   :  { %4349 = vmatmul.mubr.f32.gmra.mrb[132].mxu0 %v5771_v52 }
 0x566   :  { %4351 = vmatprep.mubr.f32.mxu0 %v5791_v35 }
 0x567   :  { %2360 = vmatmul.mubr.bf16.gmra.mrb[132].mxu1 %v6404_v24 }
 0x568   :  { %2367 = vmatprep.mubr.bf16.mxu1 %v6405_v26 }
 0x569   :  { %4352 = vmatmul.mubr.f32.gmra.mrb[134].mxu0 %v6406_v25 }
 0x56a   :  { %4354 = vmatprep.mubr.f32.mxu0 %v6407_v9 }
 0x56d   :  { %4355 = vmatmul.mubr.f32.gmra.mrb[136].mxu0 %v6408_v58 }
 0x56e   :  { %4357 = vmatprep.mubr.f32.mxu0 %v6409_v55 }
 0x56f   :  { %2368 = vmatmul.mubr.bf16.gmra.mrb[136].mxu1 %v6410_v7 }
 0x570   :  { %2375 = vmatprep.mubr.bf16.mxu1 %v6411_v54 }
 0x571   :  { %4358 = vmatmul.mubr.f32.gmra.mrb[138].mxu0 %v6412_v20 }
 0x572   :  { %4360 = vmatprep.mubr.f32.mxu0 %v6413_v19 }
 0x575   :  { %4361 = vmatmul.mubr.f32.gmra.mrb[140].mxu0 %v6414_v23 }
 0x576   :  { %4363 = vmatprep.mubr.f32.mxu0 %v6415_v14 }
 0x577   :  { %2376 = vmatmul.mubr.bf16.gmra.mrb[140].mxu1 %v6416_v17 }
 0x578   :  { %2383 = vmatprep.mubr.bf16.mxu1 %v6417_v40  ;;  %v2787_v40 = vld [vmem:[#allocation8 + $0x190] sm:$0xff] }
 0x579   :  { %4364 = vmatmul.mubr.f32.gmra.mrb[142].mxu0 %v6418_v32 }
 0x57f   :  { %2384 = vmatmul.mubr.bf16.gmra.mrb[144].mxu1 %v6419_v44  ;;  %v2788_v44 = vld [vmem:[#allocation8 + $0x198] sm:$0xff] }
 0x580   :  { %2391 = vmatprep.mubr.bf16.mxu1 %v6420_v10 }
 0x587   :  { %2392 = vmatmul.mubr.bf16.gmra.mrb[148].mxu1 %v6421_v18 }
 0x588   :  { %2399 = vmatprep.mubr.bf16.mxu1 %v6422_v38 }
 0x58f   :  { %2400 = vmatmul.mubr.bf16.gmra.mrb[152].mxu1 %v6423_v63 }
 0x590   :  { %2407 = vmatprep.mubr.bf16.mxu1 %v6424_v43  ;;  %v4722_v43 = vpack.c.bf16 %v2788_v44, %v2787_v40 }
 0x597   :  { %2408 = vmatmul.mubr.bf16.gmra.mrb[156].mxu1 %v6425_v12 }
 0x598   :  { %2415 = vmatprep.mubr.bf16.mxu1 %v6426_v46 }
 0x59f   :  { %2416 = vmatmul.mubr.bf16.gmra.mrb[160].mxu1 %v6427_v59  ;;  %v4726_v59 = vpack.c.bf16 %v2790_v22, %v2789_v2 }
 0x5a0   :  { %2423 = vmatprep.mubr.bf16.mxu1 %v6428_v39  ;;  %v2791_v39 = vld [vmem:[#allocation8 + $0x1b0] sm:$0xff] }
 0x5a7   :  { %2424 = vmatmul.mubr.bf16.gmra.mrb[164].mxu1 %v6429_v41 }
 0x5a8   :  { %2431 = vmatprep.mubr.bf16.mxu1 %v6430_v60 }
 0x5af   :  { %2432 = vmatmul.mubr.bf16.gmra.mrb[168].mxu1 %v6431_v33 }
 0x5b0   :  { %2439 = vmatprep.mubr.bf16.mxu1 %v6432_v5 }
 0x5b7   :  { %2440 = vmatmul.mubr.bf16.gmra.mrb[172].mxu1 %v6433_v56 }
 0x612   :  { %v3774_v49 = vpop.f32.mrb[112].mxu1 }
 0x613   :  { %v3775_v53 = vpop.f32.mrb[113].mxu1 }
 0x614   :  { %v3776_v24 = vadd.f32 %v3775_v53, %v3774_v49  ;;  %v3777_v26 = vpop.f32.mrb[114].mxu1 }
 0x615   :  { %v3778_v7 = vpop.f32.mrb[115].mxu1 }
 0x616   :  { %v2448_v54 = vmul.f32 2.0, %v3776_v24  ;;  %v3779_v17 = vadd.f32 %v3778_v7, %v3777_v26  ;;  %v2795_v7 = vld [vmem:[#allocation8 + $0x1d0] sm:$0xff] }
 0x618   :  { %v2480_v10 = vsub.f32 %v2448_v54, %v5733_v13  ;;  %v2449_v18 = vmul.f32 2.0, %v3779_v17  ;;  %v2792_v13 = vld [vmem:[#allocation8 + $0x1b8] sm:$0xff] }
 0x619   :  { %v4730_v5 = vpack.c.bf16 %v2792_v13, %v2791_v39  ;;  %v2796_v54 = vld [vmem:[#allocation8 + $0x1d8] sm:$0xff] }
 0x61a   :  { %v2481_v38 = vsub.f32 %v2449_v18, %v5731_v8  ;;  %v3780_v63 = vpop.f32.mrb[116].mxu1  ;;  %4398 = vmatprep.mubr.f32.mxu0 %v2480_v10  ;;  %v4738_v10 = vpack.c.bf16 %v2796_v54, %v2795_v7 }
 0x61b   :  { %v3781_v34 = vpop.f32.mrb[117].mxu1 }
 0x61c   :  { %v3782_v4 = vadd.f32 %v3781_v34, %v3780_v63  ;;  %v3783_v45 = vpop.f32.mrb[118].mxu1  ;;  %4399 = vmatmul.mubr.f32.vlgmr.msra.gmra.mrb[112].mxu0 %v2481_v38  ;;  %v2797_v38 = vld [vmem:[#allocation8 + $0x1e0] sm:$0xff]  ;;  %v2798_v63 = vld [vmem:[#allocation8 + $0x1e8] sm:$0xff] }
 0x61d   :  { %v3784_v28 = vpop.f32.mrb[119].mxu1  ;;  %4721 = vmatpush3.bf16.msra.mxu0 %v4718_v16 }
 0x61e   :  { %v2450_v12 = vmul.f32 2.0, %v3782_v4  ;;  %v3785_v46 = vadd.f32 %v3784_v28, %v3783_v45  ;;  %4723 = vmatprep.subr.bf16.mxu0 %v4722_v43  ;;  %v2799_v45 = vld [vmem:[#allocation8 + $0x1f0] sm:$0xff]  ;;  %v2800_v28 = vld [vmem:[#allocation8 + $0x1f8] sm:$0xff] }
 0x61f   :  { %v4746_v39 = vpack.c.bf16 %v2800_v28, %v2799_v45 }
 0x620   :  { %v2482_v41 = vsub.f32 %v2450_v12, %v5750_v3  ;;  %v2451_v8 = vmul.f32 2.0, %v3785_v46  ;;  %v4734_v3 = vpack.c.bf16 %v2794_v15, %v2793_v48 }
 0x621   :  { %4725 = vmatpush3.bf16.msra.mxu0 %v4722_v43 }
 0x622   :  { %v2483_v60 = vsub.f32 %v2451_v8, %v5748_v6  ;;  %v3786_v33 = vpop.f32.mrb[120].mxu1  ;;  %4401 = vmatprep.mubr.f32.mxu0 %v2482_v41  ;;  %4727 = vmatprep.subr.bf16.mxu0 %v4726_v59 }
 0x623   :  { %v3787_v56 = vpop.f32.mrb[121].mxu1 }
 0x624   :  { %v3788_v16 = vadd.f32 %v3787_v56, %v3786_v33  ;;  %v3789_v49 = vpop.f32.mrb[122].mxu1  ;;  %4402 = vmatmul.mubr.f32.gmra.mrb[114].mxu0 %v2483_v60 }
 0x625   :  { %v3790_v53 = vpop.f32.mrb[123].mxu1  ;;  %4729 = vmatpush3.bf16.msra.mxu0 %v4726_v59 }
 0x626   :  { %v2452_v24 = vmul.f32 2.0, %v3788_v16  ;;  %v3791_v26 = vadd.f32 %v3790_v53, %v3789_v49  ;;  %4731 = vmatprep.subr.bf16.mxu0 %v4730_v5 }
 0x628   :  { %v2484_v6 = vsub.f32 %v2452_v24, %v5765_v57  ;;  %v2453_v17 = vmul.f32 2.0, %v3791_v26  ;;  %v4742_v57 = vpack.c.bf16 %v2798_v63, %v2797_v38 }
 0x629   :  { %4733 = vmatpush3.bf16.msra.mxu0 %v4730_v5 }
 0x62a   :  { %v2485_v40 = vsub.f32 %v2453_v17, %v5763_v0  ;;  %v3792_v44 = vpop.f32.mrb[124].mxu1  ;;  %4404 = vmatprep.mubr.f32.mxu0 %v2484_v6  ;;  %4735 = vmatprep.subr.bf16.mxu0 %v4734_v3 }
 0x62b   :  { %v3793_v18 = vpop.f32.mrb[125].mxu1 }
 0x62c   :  { %v3794_v43 = vadd.f32 %v3793_v18, %v3792_v44  ;;  %v3795_v34 = vpop.f32.mrb[126].mxu1  ;;  %4405 = vmatmul.mubr.f32.gmra.mrb[116].mxu0 %v2485_v40 }
 0x62d   :  { %v3796_v2 = vpop.f32.mrb[127].mxu1  ;;  %4737 = vmatpush3.bf16.msra.mxu0 %v4734_v3 }
 0x62e   :  { %v2454_v22 = vmul.f32 2.0, %v3794_v43  ;;  %v3797_v4 = vadd.f32 %v3796_v2, %v3795_v34  ;;  %4739 = vmatprep.subr.bf16.mxu0 %v4738_v10 }
 0x630   :  { %v2486_v0 = vsub.f32 %v2454_v22, %v5785_v61  ;;  %v2455_v12 = vmul.f32 2.0, %v3797_v4 }
 0x631   :  { %4741 = vmatpush3.bf16.msra.mxu0 %v4738_v10 }
 0x632   :  { %v2487_v46 = vsub.f32 %v2455_v12, %v5783_v27  ;;  %v3798_v59 = vpop.f32.mrb[128].mxu1  ;;  %4407 = vmatprep.mubr.f32.mxu0 %v2486_v0  ;;  %4743 = vmatprep.subr.bf16.mxu0 %v4742_v57 }
 0x633   :  { %v3799_v13 = vpop.f32.mrb[129].mxu1 }
 0x634   :  { %v3800_v41 = vadd.f32 %v3799_v13, %v3798_v59  ;;  %v3801_v8 = vpop.f32.mrb[130].mxu1  ;;  %4408 = vmatmul.mubr.f32.gmra.mrb[118].mxu0 %v2487_v46 }
 0x635   :  { %v3802_v60 = vpop.f32.mrb[131].mxu1  ;;  %4745 = vmatpush3.bf16.msra.mxu0 %v4742_v57 }
 0x636   :  { %v2456_v33 = vmul.f32 2.0, %v3800_v41  ;;  %v3803_v5 = vadd.f32 %v3802_v60, %v3801_v8  ;;  %4747 = vmatprep.subr.bf16.mxu0 %v4746_v39 }
 0x638   :  { %v2488_v56 = vsub.f32 %v2456_v33, %v5801_v30  ;;  %v2457_v61 = vmul.f32 2.0, %v3803_v5 }
 0x639   :  { %4749 = vmatpush3.bf16.msra.mxu0 %v4746_v39 }
 0x63a   :  { %v2489_v48 = vsub.f32 %v2457_v61, %v5799_v42  ;;  %v3804_v27 = vpop.f32.mrb[132].mxu1  ;;  %4410 = vmatprep.mubr.f32.mxu0 %v2488_v56 }
 0x63b   :  { %v3805_v15 = vpop.f32.mrb[133].mxu1 }
 0x63c   :  { %v3806_v16 = vadd.f32 %v3805_v15, %v3804_v27  ;;  %v3807_v49 = vpop.f32.mrb[134].mxu1  ;;  %4411 = vmatmul.mubr.f32.gmra.mrb[120].mxu0 %v2489_v48 }
 0x63d   :  { %v3808_v53 = vpop.f32.mrb[135].mxu1 }
 0x63e   :  { %v2458_v24 = vmul.f32 2.0, %v3806_v16  ;;  %v3809_v26 = vadd.f32 %v3808_v53, %v3807_v49 }
 0x640   :  { %v2490_v3 = vsub.f32 %v2458_v24, %v5821_v51  ;;  %v2459_v7 = vmul.f32 2.0, %v3809_v26 }
 0x642   :  { %v2491_v54 = vsub.f32 %v2459_v7, %v5819_v50  ;;  %v3810_v6 = vpop.f32.mrb[136].mxu1  ;;  %4413 = vmatprep.mubr.f32.mxu0 %v2490_v3 }
 0x643   :  { %v3811_v30 = vpop.f32.mrb[137].mxu1 }
 0x644   :  { %v3812_v17 = vadd.f32 %v3811_v30, %v3810_v6  ;;  %v3813_v40 = vpop.f32.mrb[138].mxu1  ;;  %4414 = vmatmul.mubr.f32.gmra.mrb[122].mxu0 %v2491_v54 }
 0x645   :  { %v3814_v42 = vpop.f32.mrb[139].mxu1 }
 0x646   :  { %v2460_v44 = vmul.f32 2.0, %v3812_v17  ;;  %v3815_v10 = vadd.f32 %v3814_v42, %v3813_v40 }
 0x648   :  { %v2492_v18 = vsub.f32 %v2460_v44, %v5837_v29  ;;  %v2461_v38 = vmul.f32 2.0, %v3815_v10 }
 0x64a   :  { %v2493_v63 = vsub.f32 %v2461_v38, %v5835_v21  ;;  %v3816_v43 = vpop.f32.mrb[140].mxu1  ;;  %4416 = vmatprep.mubr.f32.mxu0 %v2492_v18 }
 0x64b   :  { %v3817_v51 = vpop.f32.mrb[141].mxu1 }
 0x64c   :  { %v3818_v34 = vadd.f32 %v3817_v51, %v3816_v43  ;;  %v3819_v2 = vpop.f32.mrb[142].mxu1  ;;  %4417 = vmatmul.mubr.f32.gmra.mrb[124].mxu0 %v2493_v63 }
 0x64d   :  { %v3820_v50 = vpop.f32.mrb[143].mxu1 }
 0x64e   :  { %v2462_v22 = vmul.f32 2.0, %v3818_v34  ;;  %v3821_v4 = vadd.f32 %v3820_v50, %v3819_v2 }
 0x650   :  { %v2494_v57 = vsub.f32 %v2462_v22, %v5855_v47  ;;  %v2463_v45 = vmul.f32 2.0, %v3821_v4 }
 0x652   :  { %v2495_v28 = vsub.f32 %v2463_v45, %v5853_v1  ;;  %v3822_v0 = vpop.f32.mrb[144].mxu1  ;;  %4419 = vmatprep.mubr.f32.mxu0 %v2494_v57 }
 0x653   :  { %v3823_v29 = vpop.f32.mrb[145].mxu1 }
 0x654   :  { %v3824_v12 = vadd.f32 %v3823_v29, %v3822_v0  ;;  %v3825_v46 = vpop.f32.mrb[146].mxu1  ;;  %4420 = vmatmul.mubr.f32.gmra.mrb[126].mxu0 %v2495_v28 }
 0x655   :  { %v3826_v21 = vpop.f32.mrb[147].mxu1 }
 0x656   :  { %v2464_v59 = vmul.f32 2.0, %v3824_v12  ;;  %v3827_v39 = vadd.f32 %v3826_v21, %v3825_v46 }
 0x658   :  { %v2496_v13 = vsub.f32 %v2464_v59, %v5739_v36  ;;  %v2465_v41 = vmul.f32 2.0, %v3827_v39 }
 0x65a   :  { %v2497_v8 = vsub.f32 %v2465_v41, %v5737_v31  ;;  %v3828_v60 = vpop.f32.mrb[148].mxu1  ;;  %4422 = vmatprep.mubr.f32.mxu0 %v2496_v13 }
 0x65b   :  { %v3829_v47 = vpop.f32.mrb[149].mxu1 }
 0x65c   :  { %v3830_v33 = vadd.f32 %v3829_v47, %v3828_v60  ;;  %v3831_v5 = vpop.f32.mrb[150].mxu1  ;;  %4423 = vmatmul.mubr.f32.gmra.mrb[128].mxu0 %v2497_v8 }
 0x65d   :  { %v3832_v1 = vpop.f32.mrb[151].mxu1 }
 0x65e   :  { %v2466_v56 = vmul.f32 2.0, %v3830_v33  ;;  %v3833_v61 = vadd.f32 %v3832_v1, %v3831_v5 }
 0x660   :  { %v2498_v48 = vsub.f32 %v2466_v56, %v5755_v11  ;;  %v2467_v27 = vmul.f32 2.0, %v3833_v61 }
 0x662   :  { %v2499_v15 = vsub.f32 %v2467_v27, %v5753_v37  ;;  %v3834_v16 = vpop.f32.mrb[152].mxu1  ;;  %4425 = vmatprep.mubr.f32.mxu0 %v2498_v48 }
 0x663   :  { %v3835_v36 = vpop.f32.mrb[153].mxu1 }
 0x664   :  { %v3836_v49 = vadd.f32 %v3835_v36, %v3834_v16  ;;  %v3837_v53 = vpop.f32.mrb[154].mxu1  ;;  %4426 = vmatmul.mubr.f32.gmra.mrb[130].mxu0 %v2499_v15  ;;  %v5046_v16 = vld [vmem:[#allocation5 + $0x8] sm:$0xff]  ;;  %v5048_v36 = vld [vmem:[#allocation5 + $0x18] sm:$0xff] }
 0x665   :  { %v3838_v31 = vpop.f32.mrb[155].mxu1 }
 0x666   :  { %v2468_v24 = vmul.f32 2.0, %v3836_v49  ;;  %v3839_v26 = vadd.f32 %v3838_v31, %v3837_v53  ;;  %v5049_v49 = vld [vmem:[#allocation5 + $0x20] sm:$0xff]  ;;  %v5050_v53 = vld [vmem:[#allocation5 + $0x28] sm:$0xff]  ;;  %v5051_v31 = vld [vmem:[#allocation5 + $0x30] sm:$0xff] }
 0x668   :  { %v2500_v3 = vsub.f32 %v2468_v24, %v5773_v62  ;;  %v2469_v7 = vmul.f32 2.0, %v3839_v26  ;;  %v5053_v24 = vld [vmem:[#allocation5 + $0x40] sm:$0xff]  ;;  %v5055_v26 = vld [vmem:[#allocation5 + $0x50] sm:$0xff] }
 0x66a   :  { %v2501_v54 = vsub.f32 %v2469_v7, %v5771_v52  ;;  %v3840_v6 = vpop.f32.mrb[156].mxu1  ;;  %4428 = vmatprep.mubr.f32.mxu0 %v2500_v3  ;;  %v5056_v3 = vld [vmem:[#allocation5 + $0x58] sm:$0xff]  ;;  %v5057_v7 = vld [vmem:[#allocation5 + $0x60] sm:$0xff] }
 0x66b   :  { %v3841_v11 = vpop.f32.mrb[157].mxu1 }
 0x66c   :  { %v3842_v30 = vadd.f32 %v3841_v11, %v3840_v6  ;;  %v3843_v17 = vpop.f32.mrb[158].mxu1  ;;  %4429 = vmatmul.mubr.f32.gmra.mrb[132].mxu0 %v2501_v54  ;;  %v5058_v54 = vld [vmem:[#allocation5 + $0x68] sm:$0xff]  ;;  %v5059_v6 = vld [vmem:[#allocation5 + $0x70] sm:$0xff]  ;;  %v5060_v11 = vld [vmem:[#allocation5 + $0x78] sm:$0xff] }
 0x66d   :  { %v3844_v37 = vpop.f32.mrb[159].mxu1 }
 0x66e   :  { %v2470_v40 = vmul.f32 2.0, %v3842_v30  ;;  %v3845_v42 = vadd.f32 %v3844_v37, %v3843_v17  ;;  %v5061_v30 = vld [vmem:[#allocation5 + $0x80] sm:$0xff]  ;;  %v5062_v17 = vld [vmem:[#allocation5 + $0x88] sm:$0xff]  ;;  %v5063_v37 = vld [vmem:[#allocation5 + $0x90] sm:$0xff] }
 0x670   :  { %v2502_v44 = vsub.f32 %v2470_v40, %v5791_v35  ;;  %v2471_v10 = vmul.f32 2.0, %v3845_v42  ;;  %v5064_v40 = vld [vmem:[#allocation5 + $0x98] sm:$0xff]  ;;  %v5065_v42 = vld [vmem:[#allocation5 + $0xa0] sm:$0xff] }
 0x672   :  { %v2503_v18 = vsub.f32 %v2471_v10, %v6406_v25  ;;  %v3846_v38 = vpop.f32.mrb[160].mxu1  ;;  %4431 = vmatprep.mubr.f32.mxu0 %v2502_v44  ;;  %v5066_v44 = vld [vmem:[#allocation5 + $0xa8] sm:$0xff]  ;;  %v5067_v10 = vld [vmem:[#allocation5 + $0xb0] sm:$0xff] }
 0x673   :  { %v3847_v62 = vpop.f32.mrb[161].mxu1 }
 0x674   :  { %v3848_v63 = vadd.f32 %v3847_v62, %v3846_v38  ;;  %v3849_v43 = vpop.f32.mrb[162].mxu1  ;;  %4432 = vmatmul.mubr.f32.gmra.mrb[134].mxu0 %v2503_v18  ;;  %v5068_v18 = vld [vmem:[#allocation5 + $0xb8] sm:$0xff]  ;;  %v5069_v38 = vld [vmem:[#allocation5 + $0xc0] sm:$0xff]  ;;  %v5070_v62 = vld [vmem:[#allocation5 + $0xc8] sm:$0xff] }
 0x675   :  { %v3850_v52 = vpop.f32.mrb[163].mxu1 }
 0x676   :  { %v2472_v51 = vmul.f32 2.0, %v3848_v63  ;;  %v3851_v34 = vadd.f32 %v3850_v52, %v3849_v43  ;;  %v5071_v63 = vld [vmem:[#allocation5 + $0xd0] sm:$0xff]  ;;  %v5072_v43 = vld [vmem:[#allocation5 + $0xd8] sm:$0xff]  ;;  %v5073_v52 = vld [vmem:[#allocation5 + $0xe0] sm:$0xff] }
 0x678   :  { %v2504_v2 = vsub.f32 %v2472_v51, %v6407_v9  ;;  %v2473_v50 = vmul.f32 2.0, %v3851_v34  ;;  %v5074_v51 = vld [vmem:[#allocation5 + $0xe8] sm:$0xff]  ;;  %v5075_v34 = vld [vmem:[#allocation5 + $0xf0] sm:$0xff] }
 0x67a   :  { %v2505_v22 = vsub.f32 %v2473_v50, %v6408_v58  ;;  %v3852_v4 = vpop.f32.mrb[164].mxu1  ;;  %4434 = vmatprep.mubr.f32.mxu0 %v2504_v2  ;;  %v5076_v2 = vld [vmem:[#allocation5 + $0xf8] sm:$0xff]  ;;  %v6145_v50 = vld [vmem:[%s6199_s5] ss:$0 sm:$0xff]  ;;  %s5201_s5 = smov [#allocation10]  }
 0x67b   :  { %v3853_v35 = vpop.f32.mrb[165].mxu1  ;;  %s3134_s23 = sshll.u32 %s5201_s5, 4  ;;  %s3135_s23 = int_to_ptr.vmem [resolvable:$true] %s3134_s23 }
 0x67c   :  { %v3854_v57 = vadd.f32 %v3853_v35, %v3852_v4  ;;  %v3855_v45 = vpop.f32.mrb[166].mxu1  ;;  %4435 = vmatmul.mubr.f32.gmra.mrb[136].mxu0 %v2505_v22  ;;  %s5165_s25 = scalar_lea.vmem %s3135_s23, 4096  ;;  %p5170_p5 = scmp.lt.s32.totalorder %s3135_s23, %s3135_s23 }
 0x67d   :  { %v3856_v25 = vpop.f32.mrb[167].mxu1  ;;  %p5166_p4 = scmp.ne.s32.totalorder %s3135_s23, %s5165_s25  ;;  %p5171_p6 = scmp.lt.s32.totalorder %s5165_s25, %s5165_s25 }
 0x67e   :  { %v2474_v28 = vmul.f32 2.0, %v3854_v57  ;;  %v3857_v0 = vadd.f32 %v3856_v25, %v3855_v45 }
 0x67f   :  { %p5172_p7 = por %p5171_p6, %p5170_p5 }
 0x680   :  { %v2506_v29 = vsub.f32 %v2474_v28, %v6409_v55  ;;  %v2475_v12 = vmul.f32 2.0, %v3857_v0 }
 0x681   :  { %p5173_p8 = pnand %p5172_p7, %p5166_p4 }
 0x682   :  { %v2507_v46 = vsub.f32 %v2475_v12, %v6412_v20  ;;  %v3858_v21 = vpop.f32.mrb[168].mxu1  ;;  %4437 = vmatprep.mubr.f32.mxu0 %v2506_v29 }
 0x683   :  { %v3859_v9 = vpop.f32.mrb[169].mxu1 }
 0x684   :  { %v3860_v59 = vadd.f32 %v3859_v9, %v3858_v21  ;;  %v3861_v39 = vpop.f32.mrb[170].mxu1  ;;  %4438 = vmatmul.mubr.f32.gmra.mrb[138].mxu0 %v2507_v46 }
 0x685   :  { %v3862_v58 = vpop.f32.mrb[171].mxu1 }
 0x686   :  { %v2476_v13 = vmul.f32 2.0, %v3860_v59  ;;  %v3863_v41 = vadd.f32 %v3862_v58, %v3861_v39 }
 0x688   :  { %v2508_v8 = vsub.f32 %v2476_v13, %v6413_v19  ;;  %v2477_v60 = vmul.f32 2.0, %v3863_v41  ;;  %v5045_v19 = vld [vmem:[#allocation5] sm:$0xff] }
 0x68a   :  { %v2509_v47 = vsub.f32 %v2477_v60, %v6414_v23  ;;  %v3864_v33 = vpop.f32.mrb[172].mxu1  ;;  %4440 = vmatprep.mubr.f32.mxu0 %v2508_v8  ;;  %v5047_v23 = vld [vmem:[#allocation5 + $0x10] sm:$0xff] }
 0x68b   :  { %v3865_v55 = vpop.f32.mrb[173].mxu1 }
 0x68c   :  { %v3866_v5 = vadd.f32 %v3865_v55, %v3864_v33  ;;  %v3867_v1 = vpop.f32.mrb[174].mxu1  ;;  %4441 = vmatmul.mubr.f32.gmra.mrb[140].mxu0 %v2509_v47 }
 0x68d   :  { %v3868_v20 = vpop.f32.mrb[175].mxu1 }
 0x68e   :  { %v2478_v56 = vmul.f32 2.0, %v3866_v5  ;;  %v3869_v61 = vadd.f32 %v3868_v20, %v3867_v1 }
 0x690   :  { %v2510_v48 = vsub.f32 %v2478_v56, %v6415_v14  ;;  %v2479_v27 = vmul.f32 2.0, %v3869_v61  ;;  %v5052_v14 = vld [vmem:[#allocation5 + $0x38] sm:$0xff] }
 0x692   :  { %v2511_v15 = vsub.f32 %v2479_v27, %v6418_v32  ;;  %4443 = vmatprep.mubr.f32.mxu0 %v2510_v48  ;;  %v5054_v32 = vld [vmem:[#allocation5 + $0x48] sm:$0xff] }
 0x694   :  { %4444 = vmatmul.mubr.f32.gmra.mrb[142].mxu0 %v2511_v15 }
 0x695   :  { %4478 = vmatprep.mubr.f32.mxu0 %v5045_v19 }
 0x698   :  { %4479 = vmatmul.mubr.f32.vlgmr.msra.gmra.mrb[112].mxu0 %v5046_v16 }
 0x699   :  { %4481 = vmatprep.mubr.f32.mxu0 %v5047_v23 }
 0x69c   :  { %4482 = vmatmul.mubr.f32.gmra.mrb[114].mxu0 %v5048_v36 }
 0x69d   :  { %4484 = vmatprep.mubr.f32.mxu0 %v5049_v49 }
 0x6a0   :  { %4485 = vmatmul.mubr.f32.gmra.mrb[116].mxu0 %v5050_v53 }
 0x6a1   :  { %4487 = vmatprep.mubr.f32.mxu0 %v5051_v31 }
 0x6a4   :  { %4488 = vmatmul.mubr.f32.gmra.mrb[118].mxu0 %v5052_v14 }
 0x6a5   :  { %4490 = vmatprep.mubr.f32.mxu0 %v5053_v24 }
 0x6a8   :  { %4491 = vmatmul.mubr.f32.gmra.mrb[120].mxu0 %v5054_v32 }
 0x6a9   :  { %4493 = vmatprep.mubr.f32.mxu0 %v5055_v26 }
 0x6ac   :  { %4494 = vmatmul.mubr.f32.gmra.mrb[122].mxu0 %v5056_v3 }
 0x6ad   :  { %4496 = vmatprep.mubr.f32.mxu0 %v5057_v7 }
 0x6b0   :  { %4497 = vmatmul.mubr.f32.gmra.mrb[124].mxu0 %v5058_v54 }
 0x6b1   :  { %4499 = vmatprep.mubr.f32.mxu0 %v5059_v6 }
 0x6b4   :  { %4500 = vmatmul.mubr.f32.gmra.mrb[126].mxu0 %v5060_v11 }
 0x6b5   :  { %4502 = vmatprep.mubr.f32.mxu0 %v5061_v30 }
 0x6b8   :  { %4503 = vmatmul.mubr.f32.gmra.mrb[128].mxu0 %v5062_v17 }
 0x6b9   :  { %4505 = vmatprep.mubr.f32.mxu0 %v5063_v37 }
 0x6bc   :  { %4506 = vmatmul.mubr.f32.gmra.mrb[130].mxu0 %v5064_v40 }
 0x6bd   :  { %4508 = vmatprep.mubr.f32.mxu0 %v5065_v42 }
 0x6c0   :  { %4509 = vmatmul.mubr.f32.gmra.mrb[132].mxu0 %v5066_v44 }
 0x6c1   :  { %4511 = vmatprep.mubr.f32.mxu0 %v5067_v10 }
 0x6c4   :  { %4512 = vmatmul.mubr.f32.gmra.mrb[134].mxu0 %v5068_v18 }
 0x6c5   :  { %4514 = vmatprep.mubr.f32.mxu0 %v5069_v38 }
 0x6c8   :  { %4515 = vmatmul.mubr.f32.gmra.mrb[136].mxu0 %v5070_v62 }
 0x6c9   :  { %4517 = vmatprep.mubr.f32.mxu0 %v5071_v63 }
 0x6cc   :  { %4518 = vmatmul.mubr.f32.gmra.mrb[138].mxu0 %v5072_v43 }
 0x6cd   :  { %4520 = vmatprep.mubr.f32.mxu0 %v5073_v52 }
 0x6d0   :  { %4521 = vmatmul.mubr.f32.gmra.mrb[140].mxu0 %v5074_v51 }
 0x6d1   :  { %4523 = vmatprep.mubr.f32.mxu0 %v5075_v34 }
 0x6d4   :  { %4524 = vmatmul.mubr.f32.gmra.mrb[142].mxu0 %v5076_v2 }
 0x76b   :  { %v4480_v22 = vpop.f32.mrb[112].mxu0 }
 0x76c   :  { %v3066_v4 = vadd.f32 %v4480_v22, %v6145_v50  ;;  %v2867_v35 = vpop.f32.mrb[113].mxu0 }
 0x76d   :  { %v3065_v57 = vadd.f32 %v6145_v50, %v2867_v35 }
 0x76e   :  { %3098 = vst [vmem:[#allocation10 + $0x8] sm:$0xff] %v3066_v4 }
 0x76f   :  { %3097 = vst [vmem:[#allocation10] sm:$0xff] %v3065_v57  ;;  %v4483_v45 = vpop.f32.mrb[114].mxu0 }
 0x770   :  { %v3068_v25 = vadd.f32 %v4483_v45, %v6145_v50  ;;  %v2877_v28 = vpop.f32.mrb[115].mxu0 }
 0x771   :  { %v3067_v0 = vadd.f32 %v6145_v50, %v2877_v28 }
 0x772   :  { %3100 = vst [vmem:[#allocation10 + $0x18] sm:$0xff] %v3068_v25 }
 0x773   :  { %3099 = vst [vmem:[#allocation10 + $0x10] sm:$0xff] %v3067_v0  ;;  %v4486_v29 = vpop.f32.mrb[116].mxu0 }
 0x774   :  { %v3070_v12 = vadd.f32 %v4486_v29, %v6145_v50  ;;  %v2887_v46 = vpop.f32.mrb[117].mxu0 }
 0x775   :  { %v3069_v21 = vadd.f32 %v6145_v50, %v2887_v46 }
 0x776   :  { %3102 = vst [vmem:[#allocation10 + $0x28] sm:$0xff] %v3070_v12 }
 0x777   :  { %3101 = vst [vmem:[#allocation10 + $0x20] sm:$0xff] %v3069_v21  ;;  %v4489_v9 = vpop.f32.mrb[118].mxu0 }
 0x778   :  { %v3072_v59 = vadd.f32 %v4489_v9, %v6145_v50  ;;  %v2897_v39 = vpop.f32.mrb[119].mxu0 }
 0x779   :  { %v3071_v58 = vadd.f32 %v6145_v50, %v2897_v39 }
 0x77a   :  { %3104 = vst [vmem:[#allocation10 + $0x38] sm:$0xff] %v3072_v59 }
 0x77b   :  { %3103 = vst [vmem:[#allocation10 + $0x30] sm:$0xff] %v3071_v58  ;;  %v4492_v13 = vpop.f32.mrb[120].mxu0 }
 0x77c   :  { %v3074_v41 = vadd.f32 %v4492_v13, %v6145_v50  ;;  %v2907_v8 = vpop.f32.mrb[121].mxu0 }
 0x77d   :  { %v3073_v60 = vadd.f32 %v6145_v50, %v2907_v8 }
 0x77e   :  { %3106 = vst [vmem:[#allocation10 + $0x48] sm:$0xff] %v3074_v41 }
 0x77f   :  { %3105 = vst [vmem:[#allocation10 + $0x40] sm:$0xff] %v3073_v60  ;;  %v4495_v47 = vpop.f32.mrb[122].mxu0 }
 0x780   :  { %v3076_v33 = vadd.f32 %v4495_v47, %v6145_v50  ;;  %v2917_v55 = vpop.f32.mrb[123].mxu0 }
 0x781   :  { %v3075_v5 = vadd.f32 %v6145_v50, %v2917_v55 }
 0x782   :  { %3108 = vst [vmem:[#allocation10 + $0x58] sm:$0xff] %v3076_v33 }
 0x783   :  { %3107 = vst [vmem:[#allocation10 + $0x50] sm:$0xff] %v3075_v5  ;;  %v4498_v1 = vpop.f32.mrb[124].mxu0 }
 0x784   :  { %v3078_v20 = vadd.f32 %v4498_v1, %v6145_v50  ;;  %v2927_v56 = vpop.f32.mrb[125].mxu0 }
 0x785   :  { %v3077_v61 = vadd.f32 %v6145_v50, %v2927_v56 }
 0x786   :  { %3110 = vst [vmem:[#allocation10 + $0x68] sm:$0xff] %v3078_v20 }
 0x787   :  { %3109 = vst [vmem:[#allocation10 + $0x60] sm:$0xff] %v3077_v61  ;;  %v4501_v48 = vpop.f32.mrb[126].mxu0 }
 0x788   :  { %v3080_v27 = vadd.f32 %v4501_v48, %v6145_v50  ;;  %v2937_v15 = vpop.f32.mrb[127].mxu0 }
 0x789   :  { %v3079_v19 = vadd.f32 %v6145_v50, %v2937_v15 }
 0x78a   :  { %3112 = vst [vmem:[#allocation10 + $0x78] sm:$0xff] %v3080_v27 }
 0x78b   :  { %3111 = vst [vmem:[#allocation10 + $0x70] sm:$0xff] %v3079_v19  ;;  %v4504_v16 = vpop.f32.mrb[128].mxu0 }
 0x78c   :  { %v3082_v23 = vadd.f32 %v4504_v16, %v6145_v50  ;;  %v2947_v36 = vpop.f32.mrb[129].mxu0 }
 0x78d   :  { %v3081_v49 = vadd.f32 %v6145_v50, %v2947_v36 }
 0x78e   :  { %3114 = vst [vmem:[#allocation10 + $0x88] sm:$0xff] %v3082_v23 }
 0x78f   :  { %3113 = vst [vmem:[#allocation10 + $0x80] sm:$0xff] %v3081_v49  ;;  %v4507_v53 = vpop.f32.mrb[130].mxu0 }
 0x790   :  { %v3084_v31 = vadd.f32 %v4507_v53, %v6145_v50  ;;  %v2957_v14 = vpop.f32.mrb[131].mxu0 }
 0x791   :  { %v3083_v24 = vadd.f32 %v6145_v50, %v2957_v14 }
 0x792   :  { %3116 = vst [vmem:[#allocation10 + $0x98] sm:$0xff] %v3084_v31 }
 0x793   :  { %3115 = vst [vmem:[#allocation10 + $0x90] sm:$0xff] %v3083_v24  ;;  %v4510_v32 = vpop.f32.mrb[132].mxu0 }
 0x794   :  { %v3086_v26 = vadd.f32 %v4510_v32, %v6145_v50  ;;  %v2967_v3 = vpop.f32.mrb[133].mxu0 }
 0x795   :  { %v3085_v7 = vadd.f32 %v6145_v50, %v2967_v3 }
 0x796   :  { %3118 = vst [vmem:[#allocation10 + $0xa8] sm:$0xff] %v3086_v26 }
 0x797   :  { %3117 = vst [vmem:[#allocation10 + $0xa0] sm:$0xff] %v3085_v7  ;;  %v4513_v54 = vpop.f32.mrb[134].mxu0 }
 0x798   :  { %v3088_v6 = vadd.f32 %v4513_v54, %v6145_v50  ;;  %v2977_v11 = vpop.f32.mrb[135].mxu0 }
 0x799   :  { %v3087_v30 = vadd.f32 %v6145_v50, %v2977_v11 }
 0x79a   :  { %3120 = vst [vmem:[#allocation10 + $0xb8] sm:$0xff] %v3088_v6 }
 0x79b   :  { %3119 = vst [vmem:[#allocation10 + $0xb0] sm:$0xff] %v3087_v30  ;;  %v4516_v17 = vpop.f32.mrb[136].mxu0 }
 0x79c   :  { %v3090_v37 = vadd.f32 %v4516_v17, %v6145_v50  ;;  %v2987_v40 = vpop.f32.mrb[137].mxu0 }
 0x79d   :  { %v3089_v42 = vadd.f32 %v6145_v50, %v2987_v40 }
 0x79e   :  { %3122 = vst [vmem:[#allocation10 + $0xc8] sm:$0xff] %v3090_v37 }
 0x79f   :  { %3121 = vst [vmem:[#allocation10 + $0xc0] sm:$0xff] %v3089_v42  ;;  %v4519_v44 = vpop.f32.mrb[138].mxu0 }
 0x7a0   :  { %v3092_v10 = vadd.f32 %v4519_v44, %v6145_v50  ;;  %v2997_v18 = vpop.f32.mrb[139].mxu0 }
 0x7a1   :  { %v3091_v38 = vadd.f32 %v6145_v50, %v2997_v18 }
 0x7a2   :  { %3124 = vst [vmem:[#allocation10 + $0xd8] sm:$0xff] %v3092_v10 }
 0x7a3   :  { %3123 = vst [vmem:[#allocation10 + $0xd0] sm:$0xff] %v3091_v38  ;;  %v4522_v62 = vpop.f32.mrb[140].mxu0 }
 0x7a4   :  { %v3094_v63 = vadd.f32 %v4522_v62, %v6145_v50  ;;  %v3007_v43 = vpop.f32.mrb[141].mxu0 }
 0x7a5   :  { %v3093_v52 = vadd.f32 %v6145_v50, %v3007_v43 }
 0x7a6   :  { %3126 = vst [vmem:[#allocation10 + $0xe8] sm:$0xff] %v3094_v63 }
 0x7a7   :  { %3125 = vst [vmem:[#allocation10 + $0xe0] sm:$0xff] %v3093_v52  ;;  %v4525_v51 = vpop.f32.mrb[142].mxu0 }
 0x7a8   :  { %v3096_v34 = vadd.f32 %v4525_v51, %v6145_v50  ;;  %v3017_v2 = vpop.f32.mrb[143].mxu0 }
 0x7a9   :  { %v3095_v22 = vadd.f32 %v6145_v50, %v3017_v2 }
 0x7aa   :  { %3128 = vst [vmem:[#allocation10 + $0xf8] sm:$0xff] %v3096_v34 }
 0x7ab   :  { %3127 = vst [vmem:[#allocation10 + $0xf0] sm:$0xff] %v3095_v22 }
 0x7ac   :  { %5176 = shalt.err (!%p5173_p8)
}
 0x7ad   :  { %s5177_s28 = scalar_lea.hbm %s6200_s6, 4096 }
 0x7ae   :  { %p5178_p9 = scmp.ne.s32.totalorder %s6200_s6, %s5177_s28  ;;  %p5181_p10 = scmp.lt.u32.totalorder %s5177_s28, %s6200_s6 }
 0x7b0   :  { %p5183_p11 = pnand %p5181_p10, %p5178_p9 }
 0x7b2   :  { %5186 = shalt.err (!%p5183_p11)
}
 0x7b3   :  { %3140 = dma.vmem_to_hbm [thread:$0]  %s3135_s23, 4096, %s6200_s6, [#allocation4], %s5197_s9, %s5197_s9, %s5198_s10  }
 0x7b4   :  { %5193 = dma.done.wait [#allocation4], 4096  }
 0x7b5   :  { %5194 = vsyncadd [#allocation4], 4294963200 }
 0x7b6   :  { %3144 = vsyncpa [#allocation3], 1 }
 0x7b7   :  { %3145 = vsyncpa [#allocation6], 1 }
 0x7b8   :  { %3146 = vsyncpa [#allocation9], 1 }
 0x7b9   :  { %3147 = vsyncpa [#allocation4], 1 }

</bundles_post_ra>
